<compile_context>
chip_gen: v6e
topology: v6e:2x2x1
jax: 0.10.0
libtpu: 0.0.40
codegen_flags: <defaults>
</compile_context>

<pallas_src>
import functools

import jax
import jax.numpy as jnp
from jax import lax
from jax.experimental import pallas as pl
from jax.experimental.pallas import tpu as pltpu


# Non-center taps of the 3x3 stencil, (dy, dx), raster order.
_NB_TAPS = tuple((dy, dx) for dy in (-1, 0, 1) for dx in (-1, 0, 1)
                 if not (dy == 0 and dx == 0))


# ----------------------------- Pallas kernel -----------------------------

def _seam_kernel(H, W, C1, C2, x1_ref, x2_ref, up_ref, msk_ref, dws_ref,
                 pws_ref, o_ref):
    """Fused smooth_1 / (upsample 2x + smooth_2) / add / conv_all.

    Layout: channels on sublanes, flattened (n, h, w) on lanes.
      x1_ref : (C1, N*H*W)        f32
      x2_ref : (C2, N*H2*W2)      f32
      up_ref : (N*H2*W2, N*H*W)   f32  block-diag bilinear 2x upsample matrix
      msk_ref: (8, N*H*W)         f32  per-tap zero-padding / image-edge masks
      dws_ref: (3, Cmax, 11)      f32  9 BN-folded dw taps + bias + PReLU alpha
      pws_ref: (3, C2, Cmax+2)    f32  BN-folded (cout, cin) 1x1 weights
                                       + bias col + PReLU-alpha col
      o_ref  : (C2, N*H*W)
    """
    f32 = jnp.float32
    nhw = x1_ref.shape[1]
    msk = msk_ref[...]                       # shared by all three DSConv blocks

    def dsconv(x, blk, cin):
        """DSConv3x3: dw3x3+BN+PReLU -> 1x1+BN+PReLU.  x: (cin, NHW)."""
        dw = dws_ref[blk][:cin]              # (cin, 11)
        pw = pws_ref[blk]                    # (C2, cin+2 ... zero padded)
        # --- depthwise 3x3 (VPU MACs on XLU lane rolls) ---
        acc = x * dw[:, 4:5]                 # center tap (ky=1, kx=1)
        for i, (dy, dx) in enumerate(_NB_TAPS):
            k = (dy + 1) * 3 + (dx + 1)      # tap index in the 3x3 stencil
            shift = (-(dy * W + dx)) % nhw   # result[p] = x[p + dy*W + dx]
            v = pltpu.roll(x, shift=shift, axis=1)
            acc = acc + (v * msk[i:i + 1, :]) * dw[:, k:k + 1]
        y = acc + dw[:, 9:10]                                 # folded BN shift
        y = jnp.where(y >= 0.0, y, dw[:, 10:11] * y)          # PReLU
        # --- pointwise 1x1 as a compact (cout, cin) MXU matmul ---
        z = jnp.dot(pw[:, :cin], y, preferred_element_type=f32)
        z = z + pw[:, cin:cin + 1]                            # folded BN shift
        return jnp.where(z >= 0.0, z, pw[:, cin + 1:cin + 2] * z)

    x11 = dsconv(x1_ref[...], 0, C1)                          # smooth_1
    x2up = jnp.dot(x2_ref[...], up_ref[...],                  # bilinear 2x up
                   preferred_element_type=f32)                # (C2, NHW)
    x22 = dsconv(x2up, 1, C2)                                 # smooth_2
    out = dsconv(x11 + x22, 2, C2)                            # conv_all
    o_ref[...] = out.astype(o_ref.dtype)


# ----------------------------- wrapper -----------------------------

def seam_aba_forward(x1, x2, packed):
    """x1: (N, H, W, C1), x2: (N, H//2, W//2, C2) NHWC -> (N, H, W, C2).

    (A PyTorch NCHW tensor t corresponds to t.permute(0, 2, 3, 1) here.)
    """
    N, H, W, C1 = x1.shape
    _, H2, W2, C2 = x2.shape
    nhw = N * H * W
    # channels -> sublanes, (n, h, w) -> lanes (wrapper layout plumbing only)
    x1_cl = x1.transpose(3, 0, 1, 2).reshape(C1, nhw)
    x2_cl = x2.transpose(3, 0, 1, 2).reshape(C2, N * H2 * W2)

    up, msk, dws, pws = packed['up'], packed['msk'], packed['dws'], packed['pws']
    out_cl = pl.pallas_call(
        functools.partial(_seam_kernel, H, W, C1, C2),
        out_shape=jax.ShapeDtypeStruct((C2, nhw), x1.dtype),
        # Batch folded into one step: no serial per-image grid iterations on
        # single-TC chips.  (At much larger N/HW, re-introduce a grid axis.)
        grid=(1,),
        in_specs=[
            pl.BlockSpec(x1_cl.shape, lambda i: (0, 0)),
            pl.BlockSpec(x2_cl.shape, lambda i: (0, 0)),
            pl.BlockSpec(up.shape, lambda i: (0, 0)),
            pl.BlockSpec(msk.shape, lambda i: (0, 0)),
            pl.BlockSpec(dws.shape, lambda i: (0, 0, 0)),
            pl.BlockSpec(pws.shape, lambda i: (0, 0, 0)),
        ],
        out_specs=pl.BlockSpec((C2, nhw), lambda i: (0, 0)),
    )(x1_cl, x2_cl, up, msk, dws, pws)
    return out_cl.reshape(C2, N, H, W).transpose(1, 2, 3, 0)


# ----------------------------- one-time param packing -----------------------------

def _interp_matrix(n_in, n_out):
    """1-D bilinear (align_corners=True) interpolation matrix, (n_out, n_in)."""
    if n_in == 1:
        return jnp.ones((n_out, 1), jnp.float32)
    src = jnp.arange(n_out, dtype=jnp.float32) * (n_in - 1) / (n_out - 1)
    i0 = jnp.clip(jnp.floor(src).astype(jnp.int32), 0, n_in - 2)
    frac = src - i0.astype(jnp.float32)
    idx = jnp.arange(n_out)
    m = jnp.zeros((n_out, n_in), jnp.float32)
    m = m.at[idx, i0].add(1.0 - frac)
    m = m.at[idx, i0 + 1].add(frac)
    return m


def _pack_dsconv_compact(p, c_pad):
    """Fold BN scales into compact per-channel weights (no W inflation)."""
    cin = p['w_dw'].shape[2]
    taps = (p['w_dw'] * p['s1'][None, None, :]).reshape(9, cin).T   # (cin, 9)
    dw = jnp.concatenate([taps, p['b1'][:, None], p['a1'][:, None]], axis=1)
    dw = jnp.pad(dw, ((0, c_pad - cin), (0, 0)))                    # (c_pad, 11)
    wt = (p['w_pw'] * p['s2'][None, :]).T                           # (cout, cin)
    pw = jnp.concatenate([wt, p['b2'][:, None], p['a2'][:, None]], axis=1)
    pw = jnp.pad(pw, ((0, 0), (0, c_pad + 2 - pw.shape[1])))        # (cout, c_pad+2)
    return dw, pw


def prepare_seam_params(params, N, H, W, H2, W2):
    """One-time packing (outside jit): BN fold + compact, merged constants."""
    C1 = params['smooth_1']['w_dw'].shape[2]
    C2 = params['smooth_2']['w_dw'].shape[2]
    c_pad = max(C1, C2)
    dw1, pw1 = _pack_dsconv_compact(params['smooth_1'], c_pad)
    dw2, pw2 = _pack_dsconv_compact(params['smooth_2'], c_pad)
    dw3, pw3 = _pack_dsconv_compact(params['conv_all'], c_pad)
    dws = jnp.stack([dw1, dw2, dw3])                 # (3, c_pad, 11)
    pws = jnp.stack([pw1, pw2, pw3])                 # (3, C2, c_pad+2)

    # Block-diagonal (over images) bilinear 2x upsample matrix.
    mh = _interp_matrix(H2, H)                       # (H, H2)
    mw = _interp_matrix(W2, W)                       # (W, W2)
    m_img = jnp.einsum('hp,wq->pqhw', mh, mw).reshape(H2 * W2, H * W)
    up = jnp.einsum('nm,ab->namb', jnp.eye(N, dtype=jnp.float32),
                    m_img).reshape(N * H2 * W2, N * H * W)

    # Per-tap zero-padding masks for the folded (n, h, w) lane axis: a tap is
    # valid iff its source stays inside the SAME image's HxW window.
    idx = jnp.arange(N * H * W)
    wp = idx % W
    hp = (idx // W) % H
    rows = []
    for dy, dx in _NB_TAPS:
        ok = ((hp + dy >= 0) & (hp + dy <= H - 1) &
              (wp + dx >= 0) & (wp + dx <= W - 1))
        rows.append(ok.astype(jnp.float32))
    msk = jnp.stack(rows)                            # (8, N*H*W)
    return dict(dws=dws, pws=pws, up=up, msk=msk)


# ----------------------------- params (deterministic) -----------------------------

def make_dsconv_params(key, cin, cout, eps=1e-5):
    ks = jax.random.split(key, 12)
    w_dw = 0.3 * jax.random.normal(ks[0], (3, 3, cin), jnp.float32)
    g1 = 1.0 + 0.1 * jax.random.normal(ks[1], (cin,), jnp.float32)
    be1 = 0.1 * jax.random.normal(ks[2], (cin,), jnp.float32)
    m1 = 0.1 * jax.random.normal(ks[3], (cin,), jnp.float32)
    v1 = 1.0 + 0.1 * jnp.abs(jax.random.normal(ks[4], (cin,), jnp.float32))
    a1 = 0.25 + 0.05 * jax.random.normal(ks[5], (cin,), jnp.float32)
    w_pw = 0.3 * jax.random.normal(ks[6], (cin, cout), jnp.float32)
    g2 = 1.0 + 0.1 * jax.random.normal(ks[7], (cout,), jnp.float32)
    be2 = 0.1 * jax.random.normal(ks[8], (cout,), jnp.float32)
    m2 = 0.1 * jax.random.normal(ks[9], (cout,), jnp.float32)
    v2 = 1.0 + 0.1 * jnp.abs(jax.random.normal(ks[10], (cout,), jnp.float32))
    a2 = 0.25 + 0.05 * jax.random.normal(ks[11], (cout,), jnp.float32)
    s1 = g1 / jnp.sqrt(v1 + eps)
    s2 = g2 / jnp.sqrt(v2 + eps)
    return dict(w_dw=w_dw, s1=s1, b1=be1 - m1 * s1, a1=a1,
                w_pw=w_pw, s2=s2, b2=be2 - m2 * s2, a2=a2)


# ----------------------------- pure-JAX reference -----------------------------

def dsconv3x3_ref(x, p):
    cin = x.shape[-1]
    cout = p['w_pw'].shape[1]
    y = lax.conv_general_dilated(
        x, p['w_dw'].reshape(3, 3, 1, cin), (1, 1), ((1, 1), (1, 1)),
        dimension_numbers=('NHWC', 'HWIO', 'NHWC'), feature_group_count=cin)
    y = y * p['s1'] + p['b1']
    y = jnp.where(y >= 0, y, p['a1'] * y)
    z = lax.conv_general_dilated(
        y, p['w_pw'].reshape(1, 1, cin, cout), (1, 1), 'VALID',
        dimension_numbers=('NHWC', 'HWIO', 'NHWC'))
    z = z * p['s2'] + p['b2']
    z = jnp.where(z >= 0, z, p['a2'] * z)
    return z


def upsample2x_ref(x, H, W):
    _, H2, W2, _ = x.shape
    mh = _interp_matrix(H2, H)
    mw = _interp_matrix(W2, W)
    x = jnp.einsum('oh,nhwc->nowc', mh, x)
    x = jnp.einsum('pw,nhwc->nhpc', mw, x)
    return x


def seam_aba_ref(x1, x2, params):
    _, H, W, _ = x1.shape
    x11 = dsconv3x3_ref(x1, params['smooth_1'])
    x22 = dsconv3x3_ref(upsample2x_ref(x2, H, W), params['smooth_2'])
    return dsconv3x3_ref(x11 + x22, params['conv_all'])


# ----------------------------- main -----------------------------

if __name__ == "__main__":
    key = jax.random.PRNGKey(0)
    k1, k2, k3, kx1, kx2 = jax.random.split(key, 5)
    C1, C2 = 16, 24          # channel1, channel2 (module defaults)
    N, H, W = 2, 16, 16

    params = {
        'smooth_1': make_dsconv_params(k1, C1, C2),
        'smooth_2': make_dsconv_params(k2, C2, C2),
        'conv_all': make_dsconv_params(k3, C2, C2),
    }
    x1 = jax.random.normal(kx1, (N, H, W, C1), jnp.float32)            # NHWC
    x2 = jax.random.normal(kx2, (N, H // 2, W // 2, C2), jnp.float32)  # NHWC

    packed = prepare_seam_params(params, N, H, W, H // 2, W // 2)
    fwd = jax.jit(seam_aba_forward)
    out = jax.block_until_ready(fwd(x1, x2, packed))

    ref = seam_aba_ref(x1, x2, params)
    assert out.shape == (N, H, W, C2), out.shape
    err = float(jnp.max(jnp.abs(out - ref)))
    assert err < 1e-3, f"max abs error {err}"
    print("KERNEL_OK")
</pallas_src>

<mosaic_0001>
module attributes {stable_mosaic.version = 11 : i64} {
  func.func @_seam_kernel(%arg0: i32, %arg1: memref<16x512xf32, #tpu.memory_space<vmem>>, %arg2: memref<24x128xf32, #tpu.memory_space<vmem>>, %arg3: memref<128x512xf32, #tpu.memory_space<vmem>>, %arg4: memref<8x512xf32, #tpu.memory_space<vmem>>, %arg5: memref<3x24x11xf32, #tpu.memory_space<vmem>>, %arg6: memref<3x24x26xf32, #tpu.memory_space<vmem>>, %arg7: memref<24x512xf32, #tpu.memory_space<vmem>>) attributes {dimension_semantics = [#tpu.dimension_semantics<arbitrary>], iteration_bounds = array<i64: 1>, scalar_prefetch = 0 : i64, scratch_operands = 0 : i64, tpu.core_type = #tpu.core_type<tc>, window_params = [{pipeline_mode = #tpu.pipeline_mode<synchronous>, transform_indices = @transform_0, window_bounds = array<i64: 16, 512>}, {pipeline_mode = #tpu.pipeline_mode<synchronous>, transform_indices = @transform_1, window_bounds = array<i64: 24, 128>}, {pipeline_mode = #tpu.pipeline_mode<synchronous>, transform_indices = @transform_2, window_bounds = array<i64: 128, 512>}, {pipeline_mode = #tpu.pipeline_mode<synchronous>, transform_indices = @transform_3, window_bounds = array<i64: 8, 512>}, {pipeline_mode = #tpu.pipeline_mode<synchronous>, transform_indices = @transform_4, window_bounds = array<i64: 3, 24, 11>}, {pipeline_mode = #tpu.pipeline_mode<synchronous>, transform_indices = @transform_5, window_bounds = array<i64: 3, 24, 26>}, {pipeline_mode = #tpu.pipeline_mode<synchronous>, transform_indices = @transform_6, window_bounds = array<i64: 24, 512>}]} {
    %c0 = arith.constant 0 : index
    %c0_0 = arith.constant 0 : index
    %0 = vector.load %arg4[%c0, %c0_0] : memref<8x512xf32, #tpu.memory_space<vmem>>, vector<8x512xf32>
    %c0_1 = arith.constant 0 : index
    %c0_2 = arith.constant 0 : index
    %1 = vector.load %arg1[%c0_1, %c0_2] : memref<16x512xf32, #tpu.memory_space<vmem>>, vector<16x512xf32>
    %c0_3 = arith.constant 0 : index
    %c0_4 = arith.constant 0 : index
    %c0_5 = arith.constant 0 : index
    %2 = vector.load %arg5[%c0_3, %c0_4, %c0_5] : memref<3x24x11xf32, #tpu.memory_space<vmem>>, vector<1x24x11xf32>
    %3 = vector.shape_cast %2 : vector<1x24x11xf32> to vector<24x11xf32>
    %4 = vector.extract_strided_slice %3 {offsets = [0, 0], sizes = [16, 11], strides = [1, 1]} : vector<24x11xf32> to vector<16x11xf32>
    %c0_6 = arith.constant 0 : index
    %c0_7 = arith.constant 0 : index
    %c0_8 = arith.constant 0 : index
    %5 = vector.load %arg6[%c0_6, %c0_7, %c0_8] : memref<3x24x26xf32, #tpu.memory_space<vmem>>, vector<1x24x26xf32>
    %6 = vector.shape_cast %5 : vector<1x24x26xf32> to vector<24x26xf32>
    %7 = vector.extract_strided_slice %4 {offsets = [0, 4], sizes = [16, 1], strides = [1, 1]} : vector<16x11xf32> to vector<16x1xf32>
    %8 = vector.broadcast %7 : vector<16x1xf32> to vector<16x512xf32>
    %9 = arith.mulf %1, %8 : vector<16x512xf32>
    %c17_i32 = arith.constant 17 : i32
    %10 = tpu.dynamic_rotate %1 by %c17_i32 dim 1 : vector<16x512xf32>, i32 -> vector<16x512xf32>
    %11 = vector.extract_strided_slice %0 {offsets = [0, 0], sizes = [1, 512], strides = [1, 1]} : vector<8x512xf32> to vector<1x512xf32>
    %12 = vector.broadcast %11 : vector<1x512xf32> to vector<16x512xf32>
    %13 = arith.mulf %10, %12 : vector<16x512xf32>
    %14 = vector.extract_strided_slice %4 {offsets = [0, 0], sizes = [16, 1], strides = [1, 1]} : vector<16x11xf32> to vector<16x1xf32>
    %15 = vector.broadcast %14 : vector<16x1xf32> to vector<16x512xf32>
    %16 = arith.mulf %13, %15 : vector<16x512xf32>
    %17 = arith.addf %9, %16 : vector<16x512xf32>
    %c16_i32 = arith.constant 16 : i32
    %18 = tpu.dynamic_rotate %1 by %c16_i32 dim 1 : vector<16x512xf32>, i32 -> vector<16x512xf32>
    %19 = vector.extract_strided_slice %0 {offsets = [1, 0], sizes = [1, 512], strides = [1, 1]} : vector<8x512xf32> to vector<1x512xf32>
    %20 = vector.broadcast %19 : vector<1x512xf32> to vector<16x512xf32>
    %21 = arith.mulf %18, %20 : vector<16x512xf32>
    %22 = vector.extract_strided_slice %4 {offsets = [0, 1], sizes = [16, 1], strides = [1, 1]} : vector<16x11xf32> to vector<16x1xf32>
    %23 = vector.broadcast %22 : vector<16x1xf32> to vector<16x512xf32>
    %24 = arith.mulf %21, %23 : vector<16x512xf32>
    %25 = arith.addf %17, %24 : vector<16x512xf32>
    %c15_i32 = arith.constant 15 : i32
    %26 = tpu.dynamic_rotate %1 by %c15_i32 dim 1 : vector<16x512xf32>, i32 -> vector<16x512xf32>
    %27 = vector.extract_strided_slice %0 {offsets = [2, 0], sizes = [1, 512], strides = [1, 1]} : vector<8x512xf32> to vector<1x512xf32>
    %28 = vector.broadcast %27 : vector<1x512xf32> to vector<16x512xf32>
    %29 = arith.mulf %26, %28 : vector<16x512xf32>
    %30 = vector.extract_strided_slice %4 {offsets = [0, 2], sizes = [16, 1], strides = [1, 1]} : vector<16x11xf32> to vector<16x1xf32>
    %31 = vector.broadcast %30 : vector<16x1xf32> to vector<16x512xf32>
    %32 = arith.mulf %29, %31 : vector<16x512xf32>
    %33 = arith.addf %25, %32 : vector<16x512xf32>
    %c1_i32 = arith.constant 1 : i32
    %34 = tpu.dynamic_rotate %1 by %c1_i32 dim 1 : vector<16x512xf32>, i32 -> vector<16x512xf32>
    %35 = vector.extract_strided_slice %0 {offsets = [3, 0], sizes = [1, 512], strides = [1, 1]} : vector<8x512xf32> to vector<1x512xf32>
    %36 = vector.broadcast %35 : vector<1x512xf32> to vector<16x512xf32>
    %37 = arith.mulf %34, %36 : vector<16x512xf32>
    %38 = vector.extract_strided_slice %4 {offsets = [0, 3], sizes = [16, 1], strides = [1, 1]} : vector<16x11xf32> to vector<16x1xf32>
    %39 = vector.broadcast %38 : vector<16x1xf32> to vector<16x512xf32>
    %40 = arith.mulf %37, %39 : vector<16x512xf32>
    %41 = arith.addf %33, %40 : vector<16x512xf32>
    %c511_i32 = arith.constant 511 : i32
    %42 = tpu.dynamic_rotate %1 by %c511_i32 dim 1 : vector<16x512xf32>, i32 -> vector<16x512xf32>
    %43 = vector.extract_strided_slice %0 {offsets = [4, 0], sizes = [1, 512], strides = [1, 1]} : vector<8x512xf32> to vector<1x512xf32>
    %44 = vector.broadcast %43 : vector<1x512xf32> to vector<16x512xf32>
    %45 = arith.mulf %42, %44 : vector<16x512xf32>
    %46 = vector.extract_strided_slice %4 {offsets = [0, 5], sizes = [16, 1], strides = [1, 1]} : vector<16x11xf32> to vector<16x1xf32>
    %47 = vector.broadcast %46 : vector<16x1xf32> to vector<16x512xf32>
    %48 = arith.mulf %45, %47 : vector<16x512xf32>
    %49 = arith.addf %41, %48 : vector<16x512xf32>
    %c497_i32 = arith.constant 497 : i32
    %50 = tpu.dynamic_rotate %1 by %c497_i32 dim 1 : vector<16x512xf32>, i32 -> vector<16x512xf32>
    %51 = vector.extract_strided_slice %0 {offsets = [5, 0], sizes = [1, 512], strides = [1, 1]} : vector<8x512xf32> to vector<1x512xf32>
    %52 = vector.broadcast %51 : vector<1x512xf32> to vector<16x512xf32>
    %53 = arith.mulf %50, %52 : vector<16x512xf32>
    %54 = vector.extract_strided_slice %4 {offsets = [0, 6], sizes = [16, 1], strides = [1, 1]} : vector<16x11xf32> to vector<16x1xf32>
    %55 = vector.broadcast %54 : vector<16x1xf32> to vector<16x512xf32>
    %56 = arith.mulf %53, %55 : vector<16x512xf32>
    %57 = arith.addf %49, %56 : vector<16x512xf32>
    %c496_i32 = arith.constant 496 : i32
    %58 = tpu.dynamic_rotate %1 by %c496_i32 dim 1 : vector<16x512xf32>, i32 -> vector<16x512xf32>
    %59 = vector.extract_strided_slice %0 {offsets = [6, 0], sizes = [1, 512], strides = [1, 1]} : vector<8x512xf32> to vector<1x512xf32>
    %60 = vector.broadcast %59 : vector<1x512xf32> to vector<16x512xf32>
    %61 = arith.mulf %58, %60 : vector<16x512xf32>
    %62 = vector.extract_strided_slice %4 {offsets = [0, 7], sizes = [16, 1], strides = [1, 1]} : vector<16x11xf32> to vector<16x1xf32>
    %63 = vector.broadcast %62 : vector<16x1xf32> to vector<16x512xf32>
    %64 = arith.mulf %61, %63 : vector<16x512xf32>
    %65 = arith.addf %57, %64 : vector<16x512xf32>
    %c495_i32 = arith.constant 495 : i32
    %66 = tpu.dynamic_rotate %1 by %c495_i32 dim 1 : vector<16x512xf32>, i32 -> vector<16x512xf32>
    %67 = vector.extract_strided_slice %0 {offsets = [7, 0], sizes = [1, 512], strides = [1, 1]} : vector<8x512xf32> to vector<1x512xf32>
    %68 = vector.broadcast %67 : vector<1x512xf32> to vector<16x512xf32>
    %69 = arith.mulf %66, %68 : vector<16x512xf32>
    %70 = vector.extract_strided_slice %4 {offsets = [0, 8], sizes = [16, 1], strides = [1, 1]} : vector<16x11xf32> to vector<16x1xf32>
    %71 = vector.broadcast %70 : vector<16x1xf32> to vector<16x512xf32>
    %72 = arith.mulf %69, %71 : vector<16x512xf32>
    %73 = arith.addf %65, %72 : vector<16x512xf32>
    %74 = vector.extract_strided_slice %4 {offsets = [0, 9], sizes = [16, 1], strides = [1, 1]} : vector<16x11xf32> to vector<16x1xf32>
    %75 = vector.broadcast %74 : vector<16x1xf32> to vector<16x512xf32>
    %76 = arith.addf %73, %75 : vector<16x512xf32>
    %cst = arith.constant 0.000000e+00 : f32
    %77 = vector.broadcast %cst : f32 to vector<16x512xf32>
    %78 = arith.cmpf oge, %76, %77 : vector<16x512xf32>
    %79 = vector.extract_strided_slice %4 {offsets = [0, 10], sizes = [16, 1], strides = [1, 1]} : vector<16x11xf32> to vector<16x1xf32>
    %80 = vector.broadcast %79 : vector<16x1xf32> to vector<16x512xf32>
    %81 = arith.mulf %80, %76 : vector<16x512xf32>
    %82 = arith.select %78, %76, %81 : vector<16x512xi1>, vector<16x512xf32>
    %83 = vector.extract_strided_slice %6 {offsets = [0, 0], sizes = [24, 16], strides = [1, 1]} : vector<24x26xf32> to vector<24x16xf32>
    %cst_9 = arith.constant dense<0.000000e+00> : vector<24x512xf32>
    %84 = tpu.matmul %83, %82, %cst_9 {dimension_numbers = #tpu.dot_dimension_numbers<[1], [0], [0], [1], [0, 0, 1, 1], [], []>} : vector<24x16xf32>, vector<16x512xf32>, vector<24x512xf32> -> vector<24x512xf32>
    %85 = vector.extract_strided_slice %6 {offsets = [0, 16], sizes = [24, 1], strides = [1, 1]} : vector<24x26xf32> to vector<24x1xf32>
    %86 = vector.broadcast %85 : vector<24x1xf32> to vector<24x512xf32>
    %87 = arith.addf %84, %86 : vector<24x512xf32>
    %cst_10 = arith.constant 0.000000e+00 : f32
    %88 = vector.broadcast %cst_10 : f32 to vector<24x512xf32>
    %89 = arith.cmpf oge, %87, %88 : vector<24x512xf32>
    %90 = vector.extract_strided_slice %6 {offsets = [0, 17], sizes = [24, 1], strides = [1, 1]} : vector<24x26xf32> to vector<24x1xf32>
    %91 = vector.broadcast %90 : vector<24x1xf32> to vector<24x512xf32>
    %92 = arith.mulf %91, %87 : vector<24x512xf32>
    %93 = arith.select %89, %87, %92 : vector<24x512xi1>, vector<24x512xf32>
    %c0_11 = arith.constant 0 : index
    %c0_12 = arith.constant 0 : index
    %94 = vector.load %arg2[%c0_11, %c0_12] : memref<24x128xf32, #tpu.memory_space<vmem>>, vector<24x128xf32>
    %c0_13 = arith.constant 0 : index
    %c0_14 = arith.constant 0 : index
    %95 = vector.load %arg3[%c0_13, %c0_14] : memref<128x512xf32, #tpu.memory_space<vmem>>, vector<128x512xf32>
    %cst_15 = arith.constant dense<0.000000e+00> : vector<24x512xf32>
    %96 = tpu.matmul %94, %95, %cst_15 {dimension_numbers = #tpu.dot_dimension_numbers<[1], [0], [0], [1], [0, 0, 1, 1], [], []>} : vector<24x128xf32>, vector<128x512xf32>, vector<24x512xf32> -> vector<24x512xf32>
    %c1 = arith.constant 1 : index
    %c0_16 = arith.constant 0 : index
    %c0_17 = arith.constant 0 : index
    %97 = vector.load %arg5[%c1, %c0_16, %c0_17] : memref<3x24x11xf32, #tpu.memory_space<vmem>>, vector<1x24x11xf32>
    %98 = vector.shape_cast %97 : vector<1x24x11xf32> to vector<24x11xf32>
    %c1_18 = arith.constant 1 : index
    %c0_19 = arith.constant 0 : index
    %c0_20 = arith.constant 0 : index
    %99 = vector.load %arg6[%c1_18, %c0_19, %c0_20] : memref<3x24x26xf32, #tpu.memory_space<vmem>>, vector<1x24x26xf32>
    %100 = vector.shape_cast %99 : vector<1x24x26xf32> to vector<24x26xf32>
    %101 = vector.extract_strided_slice %98 {offsets = [0, 4], sizes = [24, 1], strides = [1, 1]} : vector<24x11xf32> to vector<24x1xf32>
    %102 = vector.broadcast %101 : vector<24x1xf32> to vector<24x512xf32>
    %103 = arith.mulf %96, %102 : vector<24x512xf32>
    %c17_i32_21 = arith.constant 17 : i32
    %104 = tpu.dynamic_rotate %96 by %c17_i32_21 dim 1 : vector<24x512xf32>, i32 -> vector<24x512xf32>
    %105 = vector.extract_strided_slice %0 {offsets = [0, 0], sizes = [1, 512], strides = [1, 1]} : vector<8x512xf32> to vector<1x512xf32>
    %106 = vector.broadcast %105 : vector<1x512xf32> to vector<24x512xf32>
    %107 = arith.mulf %104, %106 : vector<24x512xf32>
    %108 = vector.extract_strided_slice %98 {offsets = [0, 0], sizes = [24, 1], strides = [1, 1]} : vector<24x11xf32> to vector<24x1xf32>
    %109 = vector.broadcast %108 : vector<24x1xf32> to vector<24x512xf32>
    %110 = arith.mulf %107, %109 : vector<24x512xf32>
    %111 = arith.addf %103, %110 : vector<24x512xf32>
    %c16_i32_22 = arith.constant 16 : i32
    %112 = tpu.dynamic_rotate %96 by %c16_i32_22 dim 1 : vector<24x512xf32>, i32 -> vector<24x512xf32>
    %113 = vector.extract_strided_slice %0 {offsets = [1, 0], sizes = [1, 512], strides = [1, 1]} : vector<8x512xf32> to vector<1x512xf32>
    %114 = vector.broadcast %113 : vector<1x512xf32> to vector<24x512xf32>
    %115 = arith.mulf %112, %114 : vector<24x512xf32>
    %116 = vector.extract_strided_slice %98 {offsets = [0, 1], sizes = [24, 1], strides = [1, 1]} : vector<24x11xf32> to vector<24x1xf32>
    %117 = vector.broadcast %116 : vector<24x1xf32> to vector<24x512xf32>
    %118 = arith.mulf %115, %117 : vector<24x512xf32>
    %119 = arith.addf %111, %118 : vector<24x512xf32>
    %c15_i32_23 = arith.constant 15 : i32
    %120 = tpu.dynamic_rotate %96 by %c15_i32_23 dim 1 : vector<24x512xf32>, i32 -> vector<24x512xf32>
    %121 = vector.extract_strided_slice %0 {offsets = [2, 0], sizes = [1, 512], strides = [1, 1]} : vector<8x512xf32> to vector<1x512xf32>
    %122 = vector.broadcast %121 : vector<1x512xf32> to vector<24x512xf32>
    %123 = arith.mulf %120, %122 : vector<24x512xf32>
    %124 = vector.extract_strided_slice %98 {offsets = [0, 2], sizes = [24, 1], strides = [1, 1]} : vector<24x11xf32> to vector<24x1xf32>
    %125 = vector.broadcast %124 : vector<24x1xf32> to vector<24x512xf32>
    %126 = arith.mulf %123, %125 : vector<24x512xf32>
    %127 = arith.addf %119, %126 : vector<24x512xf32>
    %c1_i32_24 = arith.constant 1 : i32
    %128 = tpu.dynamic_rotate %96 by %c1_i32_24 dim 1 : vector<24x512xf32>, i32 -> vector<24x512xf32>
    %129 = vector.extract_strided_slice %0 {offsets = [3, 0], sizes = [1, 512], strides = [1, 1]} : vector<8x512xf32> to vector<1x512xf32>
    %130 = vector.broadcast %129 : vector<1x512xf32> to vector<24x512xf32>
    %131 = arith.mulf %128, %130 : vector<24x512xf32>
    %132 = vector.extract_strided_slice %98 {offsets = [0, 3], sizes = [24, 1], strides = [1, 1]} : vector<24x11xf32> to vector<24x1xf32>
    %133 = vector.broadcast %132 : vector<24x1xf32> to vector<24x512xf32>
    %134 = arith.mulf %131, %133 : vector<24x512xf32>
    %135 = arith.addf %127, %134 : vector<24x512xf32>
    %c511_i32_25 = arith.constant 511 : i32
    %136 = tpu.dynamic_rotate %96 by %c511_i32_25 dim 1 : vector<24x512xf32>, i32 -> vector<24x512xf32>
    %137 = vector.extract_strided_slice %0 {offsets = [4, 0], sizes = [1, 512], strides = [1, 1]} : vector<8x512xf32> to vector<1x512xf32>
    %138 = vector.broadcast %137 : vector<1x512xf32> to vector<24x512xf32>
    %139 = arith.mulf %136, %138 : vector<24x512xf32>
    %140 = vector.extract_strided_slice %98 {offsets = [0, 5], sizes = [24, 1], strides = [1, 1]} : vector<24x11xf32> to vector<24x1xf32>
    %141 = vector.broadcast %140 : vector<24x1xf32> to vector<24x512xf32>
    %142 = arith.mulf %139, %141 : vector<24x512xf32>
    %143 = arith.addf %135, %142 : vector<24x512xf32>
    %c497_i32_26 = arith.constant 497 : i32
    %144 = tpu.dynamic_rotate %96 by %c497_i32_26 dim 1 : vector<24x512xf32>, i32 -> vector<24x512xf32>
    %145 = vector.extract_strided_slice %0 {offsets = [5, 0], sizes = [1, 512], strides = [1, 1]} : vector<8x512xf32> to vector<1x512xf32>
    %146 = vector.broadcast %145 : vector<1x512xf32> to vector<24x512xf32>
    %147 = arith.mulf %144, %146 : vector<24x512xf32>
    %148 = vector.extract_strided_slice %98 {offsets = [0, 6], sizes = [24, 1], strides = [1, 1]} : vector<24x11xf32> to vector<24x1xf32>
    %149 = vector.broadcast %148 : vector<24x1xf32> to vector<24x512xf32>
    %150 = arith.mulf %147, %149 : vector<24x512xf32>
    %151 = arith.addf %143, %150 : vector<24x512xf32>
    %c496_i32_27 = arith.constant 496 : i32
    %152 = tpu.dynamic_rotate %96 by %c496_i32_27 dim 1 : vector<24x512xf32>, i32 -> vector<24x512xf32>
    %153 = vector.extract_strided_slice %0 {offsets = [6, 0], sizes = [1, 512], strides = [1, 1]} : vector<8x512xf32> to vector<1x512xf32>
    %154 = vector.broadcast %153 : vector<1x512xf32> to vector<24x512xf32>
    %155 = arith.mulf %152, %154 : vector<24x512xf32>
    %156 = vector.extract_strided_slice %98 {offsets = [0, 7], sizes = [24, 1], strides = [1, 1]} : vector<24x11xf32> to vector<24x1xf32>
    %157 = vector.broadcast %156 : vector<24x1xf32> to vector<24x512xf32>
    %158 = arith.mulf %155, %157 : vector<24x512xf32>
    %159 = arith.addf %151, %158 : vector<24x512xf32>
    %c495_i32_28 = arith.constant 495 : i32
    %160 = tpu.dynamic_rotate %96 by %c495_i32_28 dim 1 : vector<24x512xf32>, i32 -> vector<24x512xf32>
    %161 = vector.extract_strided_slice %0 {offsets = [7, 0], sizes = [1, 512], strides = [1, 1]} : vector<8x512xf32> to vector<1x512xf32>
    %162 = vector.broadcast %161 : vector<1x512xf32> to vector<24x512xf32>
    %163 = arith.mulf %160, %162 : vector<24x512xf32>
    %164 = vector.extract_strided_slice %98 {offsets = [0, 8], sizes = [24, 1], strides = [1, 1]} : vector<24x11xf32> to vector<24x1xf32>
    %165 = vector.broadcast %164 : vector<24x1xf32> to vector<24x512xf32>
    %166 = arith.mulf %163, %165 : vector<24x512xf32>
    %167 = arith.addf %159, %166 : vector<24x512xf32>
    %168 = vector.extract_strided_slice %98 {offsets = [0, 9], sizes = [24, 1], strides = [1, 1]} : vector<24x11xf32> to vector<24x1xf32>
    %169 = vector.broadcast %168 : vector<24x1xf32> to vector<24x512xf32>
    %170 = arith.addf %167, %169 : vector<24x512xf32>
    %cst_29 = arith.constant 0.000000e+00 : f32
    %171 = vector.broadcast %cst_29 : f32 to vector<24x512xf32>
    %172 = arith.cmpf oge, %170, %171 : vector<24x512xf32>
    %173 = vector.extract_strided_slice %98 {offsets = [0, 10], sizes = [24, 1], strides = [1, 1]} : vector<24x11xf32> to vector<24x1xf32>
    %174 = vector.broadcast %173 : vector<24x1xf32> to vector<24x512xf32>
    %175 = arith.mulf %174, %170 : vector<24x512xf32>
    %176 = arith.select %172, %170, %175 : vector<24x512xi1>, vector<24x512xf32>
    %177 = vector.extract_strided_slice %100 {offsets = [0, 0], sizes = [24, 24], strides = [1, 1]} : vector<24x26xf32> to vector<24x24xf32>
    %cst_30 = arith.constant dense<0.000000e+00> : vector<24x512xf32>
    %178 = tpu.matmul %177, %176, %cst_30 {dimension_numbers = #tpu.dot_dimension_numbers<[1], [0], [0], [1], [0, 0, 1, 1], [], []>} : vector<24x24xf32>, vector<24x512xf32>, vector<24x512xf32> -> vector<24x512xf32>
    %179 = vector.extract_strided_slice %100 {offsets = [0, 24], sizes = [24, 1], strides = [1, 1]} : vector<24x26xf32> to vector<24x1xf32>
    %180 = vector.broadcast %179 : vector<24x1xf32> to vector<24x512xf32>
    %181 = arith.addf %178, %180 : vector<24x512xf32>
    %cst_31 = arith.constant 0.000000e+00 : f32
    %182 = vector.broadcast %cst_31 : f32 to vector<24x512xf32>
    %183 = arith.cmpf oge, %181, %182 : vector<24x512xf32>
    %184 = vector.extract_strided_slice %100 {offsets = [0, 25], sizes = [24, 1], strides = [1, 1]} : vector<24x26xf32> to vector<24x1xf32>
    %185 = vector.broadcast %184 : vector<24x1xf32> to vector<24x512xf32>
    %186 = arith.mulf %185, %181 : vector<24x512xf32>
    %187 = arith.select %183, %181, %186 : vector<24x512xi1>, vector<24x512xf32>
    %188 = arith.addf %93, %187 : vector<24x512xf32>
    %c2 = arith.constant 2 : index
    %c0_32 = arith.constant 0 : index
    %c0_33 = arith.constant 0 : index
    %189 = vector.load %arg5[%c2, %c0_32, %c0_33] : memref<3x24x11xf32, #tpu.memory_space<vmem>>, vector<1x24x11xf32>
    %190 = vector.shape_cast %189 : vector<1x24x11xf32> to vector<24x11xf32>
    %c2_34 = arith.constant 2 : index
    %c0_35 = arith.constant 0 : index
    %c0_36 = arith.constant 0 : index
    %191 = vector.load %arg6[%c2_34, %c0_35, %c0_36] : memref<3x24x26xf32, #tpu.memory_space<vmem>>, vector<1x24x26xf32>
    %192 = vector.shape_cast %191 : vector<1x24x26xf32> to vector<24x26xf32>
    %193 = vector.extract_strided_slice %190 {offsets = [0, 4], sizes = [24, 1], strides = [1, 1]} : vector<24x11xf32> to vector<24x1xf32>
    %194 = vector.broadcast %193 : vector<24x1xf32> to vector<24x512xf32>
    %195 = arith.mulf %188, %194 : vector<24x512xf32>
    %c17_i32_37 = arith.constant 17 : i32
    %196 = tpu.dynamic_rotate %188 by %c17_i32_37 dim 1 : vector<24x512xf32>, i32 -> vector<24x512xf32>
    %197 = vector.extract_strided_slice %0 {offsets = [0, 0], sizes = [1, 512], strides = [1, 1]} : vector<8x512xf32> to vector<1x512xf32>
    %198 = vector.broadcast %197 : vector<1x512xf32> to vector<24x512xf32>
    %199 = arith.mulf %196, %198 : vector<24x512xf32>
    %200 = vector.extract_strided_slice %190 {offsets = [0, 0], sizes = [24, 1], strides = [1, 1]} : vector<24x11xf32> to vector<24x1xf32>
    %201 = vector.broadcast %200 : vector<24x1xf32> to vector<24x512xf32>
    %202 = arith.mulf %199, %201 : vector<24x512xf32>
    %203 = arith.addf %195, %202 : vector<24x512xf32>
    %c16_i32_38 = arith.constant 16 : i32
    %204 = tpu.dynamic_rotate %188 by %c16_i32_38 dim 1 : vector<24x512xf32>, i32 -> vector<24x512xf32>
    %205 = vector.extract_strided_slice %0 {offsets = [1, 0], sizes = [1, 512], strides = [1, 1]} : vector<8x512xf32> to vector<1x512xf32>
    %206 = vector.broadcast %205 : vector<1x512xf32> to vector<24x512xf32>
    %207 = arith.mulf %204, %206 : vector<24x512xf32>
    %208 = vector.extract_strided_slice %190 {offsets = [0, 1], sizes = [24, 1], strides = [1, 1]} : vector<24x11xf32> to vector<24x1xf32>
    %209 = vector.broadcast %208 : vector<24x1xf32> to vector<24x512xf32>
    %210 = arith.mulf %207, %209 : vector<24x512xf32>
    %211 = arith.addf %203, %210 : vector<24x512xf32>
    %c15_i32_39 = arith.constant 15 : i32
    %212 = tpu.dynamic_rotate %188 by %c15_i32_39 dim 1 : vector<24x512xf32>, i32 -> vector<24x512xf32>
    %213 = vector.extract_strided_slice %0 {offsets = [2, 0], sizes = [1, 512], strides = [1, 1]} : vector<8x512xf32> to vector<1x512xf32>
    %214 = vector.broadcast %213 : vector<1x512xf32> to vector<24x512xf32>
    %215 = arith.mulf %212, %214 : vector<24x512xf32>
    %216 = vector.extract_strided_slice %190 {offsets = [0, 2], sizes = [24, 1], strides = [1, 1]} : vector<24x11xf32> to vector<24x1xf32>
    %217 = vector.broadcast %216 : vector<24x1xf32> to vector<24x512xf32>
    %218 = arith.mulf %215, %217 : vector<24x512xf32>
    %219 = arith.addf %211, %218 : vector<24x512xf32>
    %c1_i32_40 = arith.constant 1 : i32
    %220 = tpu.dynamic_rotate %188 by %c1_i32_40 dim 1 : vector<24x512xf32>, i32 -> vector<24x512xf32>
    %221 = vector.extract_strided_slice %0 {offsets = [3, 0], sizes = [1, 512], strides = [1, 1]} : vector<8x512xf32> to vector<1x512xf32>
    %222 = vector.broadcast %221 : vector<1x512xf32> to vector<24x512xf32>
    %223 = arith.mulf %220, %222 : vector<24x512xf32>
    %224 = vector.extract_strided_slice %190 {offsets = [0, 3], sizes = [24, 1], strides = [1, 1]} : vector<24x11xf32> to vector<24x1xf32>
    %225 = vector.broadcast %224 : vector<24x1xf32> to vector<24x512xf32>
    %226 = arith.mulf %223, %225 : vector<24x512xf32>
    %227 = arith.addf %219, %226 : vector<24x512xf32>
    %c511_i32_41 = arith.constant 511 : i32
    %228 = tpu.dynamic_rotate %188 by %c511_i32_41 dim 1 : vector<24x512xf32>, i32 -> vector<24x512xf32>
    %229 = vector.extract_strided_slice %0 {offsets = [4, 0], sizes = [1, 512], strides = [1, 1]} : vector<8x512xf32> to vector<1x512xf32>
    %230 = vector.broadcast %229 : vector<1x512xf32> to vector<24x512xf32>
    %231 = arith.mulf %228, %230 : vector<24x512xf32>
    %232 = vector.extract_strided_slice %190 {offsets = [0, 5], sizes = [24, 1], strides = [1, 1]} : vector<24x11xf32> to vector<24x1xf32>
    %233 = vector.broadcast %232 : vector<24x1xf32> to vector<24x512xf32>
    %234 = arith.mulf %231, %233 : vector<24x512xf32>
    %235 = arith.addf %227, %234 : vector<24x512xf32>
    %c497_i32_42 = arith.constant 497 : i32
    %236 = tpu.dynamic_rotate %188 by %c497_i32_42 dim 1 : vector<24x512xf32>, i32 -> vector<24x512xf32>
    %237 = vector.extract_strided_slice %0 {offsets = [5, 0], sizes = [1, 512], strides = [1, 1]} : vector<8x512xf32> to vector<1x512xf32>
    %238 = vector.broadcast %237 : vector<1x512xf32> to vector<24x512xf32>
    %239 = arith.mulf %236, %238 : vector<24x512xf32>
    %240 = vector.extract_strided_slice %190 {offsets = [0, 6], sizes = [24, 1], strides = [1, 1]} : vector<24x11xf32> to vector<24x1xf32>
    %241 = vector.broadcast %240 : vector<24x1xf32> to vector<24x512xf32>
    %242 = arith.mulf %239, %241 : vector<24x512xf32>
    %243 = arith.addf %235, %242 : vector<24x512xf32>
    %c496_i32_43 = arith.constant 496 : i32
    %244 = tpu.dynamic_rotate %188 by %c496_i32_43 dim 1 : vector<24x512xf32>, i32 -> vector<24x512xf32>
    %245 = vector.extract_strided_slice %0 {offsets = [6, 0], sizes = [1, 512], strides = [1, 1]} : vector<8x512xf32> to vector<1x512xf32>
    %246 = vector.broadcast %245 : vector<1x512xf32> to vector<24x512xf32>
    %247 = arith.mulf %244, %246 : vector<24x512xf32>
    %248 = vector.extract_strided_slice %190 {offsets = [0, 7], sizes = [24, 1], strides = [1, 1]} : vector<24x11xf32> to vector<24x1xf32>
    %249 = vector.broadcast %248 : vector<24x1xf32> to vector<24x512xf32>
    %250 = arith.mulf %247, %249 : vector<24x512xf32>
    %251 = arith.addf %243, %250 : vector<24x512xf32>
    %c495_i32_44 = arith.constant 495 : i32
    %252 = tpu.dynamic_rotate %188 by %c495_i32_44 dim 1 : vector<24x512xf32>, i32 -> vector<24x512xf32>
    %253 = vector.extract_strided_slice %0 {offsets = [7, 0], sizes = [1, 512], strides = [1, 1]} : vector<8x512xf32> to vector<1x512xf32>
    %254 = vector.broadcast %253 : vector<1x512xf32> to vector<24x512xf32>
    %255 = arith.mulf %252, %254 : vector<24x512xf32>
    %256 = vector.extract_strided_slice %190 {offsets = [0, 8], sizes = [24, 1], strides = [1, 1]} : vector<24x11xf32> to vector<24x1xf32>
    %257 = vector.broadcast %256 : vector<24x1xf32> to vector<24x512xf32>
    %258 = arith.mulf %255, %257 : vector<24x512xf32>
    %259 = arith.addf %251, %258 : vector<24x512xf32>
    %260 = vector.extract_strided_slice %190 {offsets = [0, 9], sizes = [24, 1], strides = [1, 1]} : vector<24x11xf32> to vector<24x1xf32>
    %261 = vector.broadcast %260 : vector<24x1xf32> to vector<24x512xf32>
    %262 = arith.addf %259, %261 : vector<24x512xf32>
    %cst_45 = arith.constant 0.000000e+00 : f32
    %263 = vector.broadcast %cst_45 : f32 to vector<24x512xf32>
    %264 = arith.cmpf oge, %262, %263 : vector<24x512xf32>
    %265 = vector.extract_strided_slice %190 {offsets = [0, 10], sizes = [24, 1], strides = [1, 1]} : vector<24x11xf32> to vector<24x1xf32>
    %266 = vector.broadcast %265 : vector<24x1xf32> to vector<24x512xf32>
    %267 = arith.mulf %266, %262 : vector<24x512xf32>
    %268 = arith.select %264, %262, %267 : vector<24x512xi1>, vector<24x512xf32>
    %269 = vector.extract_strided_slice %192 {offsets = [0, 0], sizes = [24, 24], strides = [1, 1]} : vector<24x26xf32> to vector<24x24xf32>
    %cst_46 = arith.constant dense<0.000000e+00> : vector<24x512xf32>
    %270 = tpu.matmul %269, %268, %cst_46 {dimension_numbers = #tpu.dot_dimension_numbers<[1], [0], [0], [1], [0, 0, 1, 1], [], []>} : vector<24x24xf32>, vector<24x512xf32>, vector<24x512xf32> -> vector<24x512xf32>
    %271 = vector.extract_strided_slice %192 {offsets = [0, 24], sizes = [24, 1], strides = [1, 1]} : vector<24x26xf32> to vector<24x1xf32>
    %272 = vector.broadcast %271 : vector<24x1xf32> to vector<24x512xf32>
    %273 = arith.addf %270, %272 : vector<24x512xf32>
    %cst_47 = arith.constant 0.000000e+00 : f32
    %274 = vector.broadcast %cst_47 : f32 to vector<24x512xf32>
    %275 = arith.cmpf oge, %273, %274 : vector<24x512xf32>
    %276 = vector.extract_strided_slice %192 {offsets = [0, 25], sizes = [24, 1], strides = [1, 1]} : vector<24x26xf32> to vector<24x1xf32>
    %277 = vector.broadcast %276 : vector<24x1xf32> to vector<24x512xf32>
    %278 = arith.mulf %277, %273 : vector<24x512xf32>
    %279 = arith.select %275, %273, %278 : vector<24x512xi1>, vector<24x512xf32>
    %c0_48 = arith.constant 0 : index
    %c0_49 = arith.constant 0 : index
    %280 = vector.load %arg7[%c0_48, %c0_49] : memref<24x512xf32, #tpu.memory_space<vmem>>, vector<24x512xf32>
    tpu.vector_store %arg7[%c0_48, %c0_49], %279 {strides = array<i32>} : memref<24x512xf32, #tpu.memory_space<vmem>>, vector<24x512xf32>,
    return
  }
  func.func @transform_0(%arg0: i32) -> (i32, i32) {
    %c0_i32 = arith.constant 0 : i32
    %c0_i32_0 = arith.constant 0 : i32
    %c0_i32_1 = arith.constant 0 : i32
    return %c0_i32, %c0_i32_0 : i32, i32
  }
  func.func @transform_1(%arg0: i32) -> (i32, i32) {
    %c0_i32 = arith.constant 0 : i32
    %c0_i32_0 = arith.constant 0 : i32
    %c0_i32_1 = arith.constant 0 : i32
    return %c0_i32, %c0_i32_0 : i32, i32
  }
  func.func @transform_2(%arg0: i32) -> (i32, i32) {
    %c0_i32 = arith.constant 0 : i32
    %c0_i32_0 = arith.constant 0 : i32
    %c0_i32_1 = arith.constant 0 : i32
    return %c0_i32, %c0_i32_0 : i32, i32
  }
  func.func @transform_3(%arg0: i32) -> (i32, i32) {
    %c0_i32 = arith.constant 0 : i32
    %c0_i32_0 = arith.constant 0 : i32
    %c0_i32_1 = arith.constant 0 : i32
    return %c0_i32, %c0_i32_0 : i32, i32
  }
  func.func @transform_4(%arg0: i32) -> (i32, i32, i32) {
    %c0_i32 = arith.constant 0 : i32
    %c0_i32_0 = arith.constant 0 : i32
    %c0_i32_1 = arith.constant 0 : i32
    %c0_i32_2 = arith.constant 0 : i32
    return %c0_i32, %c0_i32_0, %c0_i32_1 : i32, i32, i32
  }
  func.func @transform_5(%arg0: i32) -> (i32, i32, i32) {
    %c0_i32 = arith.constant 0 : i32
    %c0_i32_0 = arith.constant 0 : i32
    %c0_i32_1 = arith.constant 0 : i32
    %c0_i32_2 = arith.constant 0 : i32
    return %c0_i32, %c0_i32_0, %c0_i32_1 : i32, i32, i32
  }
  func.func @transform_6(%arg0: i32) -> (i32, i32) {
    %c0_i32 = arith.constant 0 : i32
    %c0_i32_0 = arith.constant 0 : i32
    %c0_i32_1 = arith.constant 0 : i32
    return %c0_i32, %c0_i32_0 : i32, i32
  }
}

</mosaic_0001>

<bundles_post_ra>
// kernel: seam_aba_forward.1
= control target key start
LH: loop header
LB: loop body
LE: loop exit
PB: predicated region body
PF: predicated region fallthrough
CT: control target
= control target key end

     0   :  { %v7011_v0 = vmov 4   ;;  %v7009_v3 = vmov 0   ;;  %s3358_s25 = smov 17   ;;  %v7007_v9 = vmov 1   ;;  %v7005_v13 = vmov 2   ;;  %s3361_s18 = smov 16   ;;  %s6982_s4 = inlined_call_operand.vmem [shape: f32[3,24,11], index: 4, kind: input, shape index: {}]   ;;  %s6983_s0 = inlined_call_operand.vmem [shape: f32[16,512], index: 0, kind: input, shape index: {}]   ;;  %s6984_s3 = inlined_call_operand.vmem [shape: f32[8,512], index: 3, kind: input, shape index: {}]   ;;  %s6985_s5 = inlined_call_operand.vmem [shape: f32[3,24,26], index: 5, kind: input, shape index: {}]   ;;  %s6986_s2 = inlined_call_operand.vmem [shape: f32[128,512], index: 2, kind: input, shape index: {}]   ;;  %s6987_s1 = inlined_call_operand.vmem [shape: f32[24,128], index: 1, kind: input, shape index: {}]   ;;  %s6988_s6 = inlined_call_operand.vmem [shape: f32[24,512], index: 6, kind: output, shape index: {}]  }
   0x1   :  { %3272 = vset.pattern.permute.xlu0 %v7011_v0  ;;  %v3419_v1 = vld [vmem:[%s6982_s4] sm:$0xff]  ;;  %3273 = vset.pattern.permute.xlu1 %v7009_v3  ;;  %v3433_v4 = vld [vmem:[%s6982_s4 + $0x8] sm:$0xff]  ;;  %v3459_v8 = vld [vmem:[%s6983_s0 + $0x30] sm:$0xff]  ;;  %v7003_v14 = vmov 3   ;;  %v7001_v15 = vmov 5   ;;  %s3365_s19 = smov 1  }
   0x2   :  { %v3424_v2 = vld [vmem:[%s6983_s0] sm:$0xff]  ;;  %42 = vperm.xlu0 %3272, %v3419_v1   ;;  %v3446_v6 = vld [vmem:[%s6983_s0 + $0x8] sm:$0xff]  ;;  %v3469_v10 = vld [vmem:[%s6983_s0 + $0x38] sm:$0xff]  ;;  %s3366_s20 = smov 127   ;;  %v6999_v16 = vmov 6   ;;  %s3368_s21 = smov 113  }
   0x3   :  { %58 = vrot.lane.b32.xlu1 %v3424_v2, %s3358_s25  ;;  %v3438_v5 = vld [vmem:[%s6983_s0 + $0x20] sm:$0xff]  ;;  %v3454_v7 = vld [vmem:[%s6983_s0 + $0x28] sm:$0xff]  ;;  %v3477_v11 = vld [vmem:[%s6983_s0 + $0x10] sm:$0xff]  ;;  %v6997_v17 = vmov 7   ;;  %v6993_v18 = vmov 8   ;;  %s3371_s22 = smov 112  }
   0x4   :  { %v3485_v12 = vld [vmem:[%s6983_s0 + $0x18] sm:$0xff]  ;;  %s3363_s0 = smov 15   ;;  %s3372_s23 = smov 111   ;;  %v6991_v31 = vmov 9   ;;  %v6989_v48 = vmov 10   ;;  %v6995_v51 = vmov 0.0  }
   0x5   :  { %778 = vmatprep.mubr.f32.mxu0 %v6995_v51  ;;  %861 = vmatprep.mubr.f32.mxu1 %v6995_v51  ;;  %v3750_v3 = vld [vmem:[%s6984_s3 + $0x18] sm:$0xff]  ;;  %vm707_vm12 = vcmask 130048  }
   0x6   :  { %47 = vperm.xlu0 %3272, %v3433_v4  }
   0x7   :  { %60 = vrot.lane.b32.xlu1 %v3438_v5, %s3358_s25 }
   0xa   :  { %62 = vrot.lane.b32.xlu0 %v3446_v6, %s3358_s25 }
   0xb   :  { %114 = vperm.xlu1 %3273, %v3433_v4   ;;  %3274 = vset.pattern.permute.xlu0 %v7007_v9  ;;  %v3740_v9 = vld [vmem:[%s6984_s3 + $0x10] sm:$0xff] }
   0xe   :  { %64 = vrot.lane.b32.xlu0 %v3454_v7, %s3358_s25 }
   0xf   :  { %68 = vrot.lane.b32.xlu1 %v3459_v8, %s3358_s25 }
  0x12   :  { %72 = vrot.lane.b32.xlu0 %v3469_v10, %s3358_s25 }
  0x13   :  { %110 = vperm.xlu1 %3273, %v3419_v1  }
  0x16   :  { %187 = vperm.xlu0 %3274, %v3433_v4  }
  0x17   :  { %66 = vrot.lane.b32.xlu1 %v3477_v11, %s3358_s25 }
  0x18   :  { %3275 = vset.pattern.permute.xlu1 %v7005_v13 }
  0x1a   :  { %135 = vrot.lane.b32.xlu0 %v3438_v5, %s3361_s18 }
  0x1b   :  { %70 = vrot.lane.b32.xlu1 %v3485_v12, %s3358_s25 }
  0x1e   :  { %143 = vrot.lane.b32.xlu0 %v3459_v8, %s3361_s18 }
  0x1f   :  { %139 = vrot.lane.b32.xlu1 %v3454_v7, %s3361_s18 }
  0x22   :  { %183 = vperm.xlu0 %3274, %v3419_v1  }
  0x23   :  { %147 = vrot.lane.b32.xlu1 %v3469_v10, %s3361_s18 }
  0x26   :  { %133 = vrot.lane.b32.xlu0 %v3424_v2, %s3361_s18 }
  0x27   :  { %260 = vperm.xlu1 %3275, %v3433_v4   ;;  %3276 = vset.pattern.permute.xlu0 %v7005_v13 }
  0x2a   :  { %141 = vrot.lane.b32.xlu0 %v3477_v11, %s3361_s18 }
  0x2b   :  { %137 = vrot.lane.b32.xlu1 %v3446_v6, %s3361_s18 }
  0x2c   :  { %3277 = vset.pattern.permute.xlu1 %v7003_v14  ;;  %v3734_v14 = vld [vmem:[%s6984_s3 + $0x8] sm:$0xff] }
  0x2e   :  { %208 = vrot.lane.b32.xlu0 %v3438_v5, %s3363_s0 }
  0x2f   :  { %145 = vrot.lane.b32.xlu1 %v3485_v12, %s3361_s18 }
  0x32   :  { %216 = vrot.lane.b32.xlu0 %v3459_v8, %s3363_s0 }
  0x33   :  { %212 = vrot.lane.b32.xlu1 %v3454_v7, %s3363_s0 }
  0x36   :  { %256 = vperm.xlu0 %3276, %v3419_v1  }
  0x37   :  { %220 = vrot.lane.b32.xlu1 %v3469_v10, %s3363_s0 }
  0x3a   :  { %210 = vrot.lane.b32.xlu0 %v3446_v6, %s3363_s0 }
  0x3b   :  { %333 = vperm.xlu1 %3277, %v3433_v4   ;;  %3278 = vset.pattern.permute.xlu0 %v7001_v15 }
  0x3e   :  { %218 = vrot.lane.b32.xlu0 %v3485_v12, %s3363_s0 }
  0x3f   :  { %206 = vrot.lane.b32.xlu1 %v3424_v2, %s3363_s0 }
  0x42   :  { %285 = vrot.lane.b32.xlu0 %v3454_v7, %s3365_s19 }
  0x43   :  { %214 = vrot.lane.b32.xlu1 %v3477_v11, %s3363_s0 }
  0x46   :  { %293 = vrot.lane.b32.xlu0 %v3469_v10, %s3365_s19 }
  0x47   :  { %281 = vrot.lane.b32.xlu1 %v3438_v5, %s3365_s19 }
  0x4a   :  { %406 = vperm.xlu0 %3278, %v3433_v4  }
  0x4b   :  { %289 = vrot.lane.b32.xlu1 %v3459_v8, %s3365_s19 }
  0x4e   :  { %287 = vrot.lane.b32.xlu0 %v3477_v11, %s3365_s19 }
  0x4f   :  { %329 = vperm.xlu1 %3277, %v3419_v1  }
  0x52   :  { %354 = vrot.lane.b32.xlu0 %v3438_v5, %s3366_s20 }
  0x53   :  { %279 = vrot.lane.b32.xlu1 %v3424_v2, %s3365_s19 }
  0x54   :  { %3279 = vset.pattern.permute.xlu1 %v6999_v16 }
  0x56   :  { %362 = vrot.lane.b32.xlu0 %v3459_v8, %s3366_s20 }
  0x57   :  { %283 = vrot.lane.b32.xlu1 %v3446_v6, %s3365_s19 }
  0x5a   :  { %402 = vperm.xlu0 %3278, %v3419_v1  }
  0x5b   :  { %291 = vrot.lane.b32.xlu1 %v3485_v12, %s3365_s19 }
  0x5e   :  { %352 = vrot.lane.b32.xlu0 %v3424_v2, %s3366_s20 }
  0x5f   :  { %358 = vrot.lane.b32.xlu1 %v3454_v7, %s3366_s20  ;;  %3280 = vset.pattern.permute.xlu0 %v6999_v16 }
  0x62   :  { %360 = vrot.lane.b32.xlu0 %v3477_v11, %s3366_s20 }
  0x63   :  { %366 = vrot.lane.b32.xlu1 %v3469_v10, %s3366_s20 }
  0x66   :  { %427 = vrot.lane.b32.xlu0 %v3438_v5, %s3368_s21 }
  0x67   :  { %479 = vperm.xlu1 %3279, %v3433_v4  }
  0x6a   :  { %435 = vrot.lane.b32.xlu0 %v3459_v8, %s3368_s21 }
  0x6b   :  { %356 = vrot.lane.b32.xlu1 %v3446_v6, %s3366_s20 }
  0x6c   :  { %3281 = vset.pattern.permute.xlu1 %v6997_v17 }
  0x6e   :  { %475 = vperm.xlu0 %3280, %v3419_v1  }
  0x6f   :  { %364 = vrot.lane.b32.xlu1 %v3485_v12, %s3366_s20 }
  0x72   :  { %429 = vrot.lane.b32.xlu0 %v3446_v6, %s3368_s21 }
  0x73   :  { %431 = vrot.lane.b32.xlu1 %v3454_v7, %s3368_s21  ;;  %3282 = vset.pattern.permute.xlu0 %v6993_v18 }
  0x75   :  { %v3585_v19 = vpop.permute.xlu1 %58 }
  0x76   :  { %437 = vrot.lane.b32.xlu0 %v3485_v12, %s3368_s21 }
  0x77   :  { %439 = vrot.lane.b32.xlu1 %v3469_v10, %s3368_s21 }
  0x79   :  { %v3593_v21 = vpop.permute.xlu1 %60 }
  0x7a   :  { %504 = vrot.lane.b32.xlu0 %v3454_v7, %s3371_s22 }
  0x7b   :  { %552 = vperm.xlu1 %3281, %v3433_v4  }
  0x7d   :  { %v3587_v20 = vpop.permute.xlu0 %42 }
  0x7e   :  { %512 = vrot.lane.b32.xlu0 %v3469_v10, %s3371_s22 }
  0x7f   :  { %425 = vrot.lane.b32.xlu1 %v3424_v2, %s3368_s21 }
  0x81   :  { %v3595_v22 = vpop.permute.xlu0 %47 }
  0x82   :  { %625 = vperm.xlu0 %3282, %v3433_v4  }
  0x83   :  { %433 = vrot.lane.b32.xlu1 %v3477_v11, %s3368_s21 }
  0x85   :  { %v3600_v23 = vpop.permute.xlu0 %62 }
  0x86   :  { %v3602_v24 = vpop.permute.xlu1 %114  ;;  %506 = vrot.lane.b32.xlu0 %v3477_v11, %s3371_s22 }
  0x87   :  { %500 = vrot.lane.b32.xlu1 %v3438_v5, %s3371_s22 }
  0x89   :  { %v3608_v25 = vpop.permute.xlu0 %64 }
  0x8a   :  { %v3610_v26 = vpop.permute.xlu1 %68  ;;  %573 = vrot.lane.b32.xlu0 %v3438_v5, %s3372_s23 }
  0x8b   :  { %508 = vrot.lane.b32.xlu1 %v3459_v8, %s3371_s22 }
  0x8d   :  { %v3616_v27 = vpop.permute.xlu0 %72 }
  0x8e   :  { %v3618_v28 = vpop.permute.xlu1 %110  ;;  %581 = vrot.lane.b32.xlu0 %v3459_v8, %s3372_s23 }
  0x8f   :  { %548 = vperm.xlu1 %3281, %v3419_v1  }
  0x91   :  { %v3623_v29 = vpop.permute.xlu0 %187 }
  0x92   :  { %v3625_v30 = vpop.permute.xlu1 %66  ;;  %621 = vperm.xlu0 %3282, %v3419_v1  }
  0x93   :  { %498 = vrot.lane.b32.xlu1 %v3424_v2, %s3371_s22 }
  0x94   :  { %3283 = vset.pattern.permute.xlu1 %v6991_v31 }
  0x95   :  { %v3631_v32 = vpop.permute.xlu0 %135 }
  0x96   :  { %v3633_v33 = vpop.permute.xlu1 %70  ;;  %575 = vrot.lane.b32.xlu0 %v3446_v6, %s3372_s23 }
  0x97   :  { %502 = vrot.lane.b32.xlu1 %v3446_v6, %s3371_s22  ;;  %3284 = vset.pattern.permute.xlu0 %v6991_v31 }
  0x99   :  { %v3640_v34 = vpop.permute.xlu0 %143 }
  0x9a   :  { %v3642_v35 = vpop.permute.xlu1 %139  ;;  %583 = vrot.lane.b32.xlu0 %v3485_v12, %s3372_s23 }
  0x9b   :  { %510 = vrot.lane.b32.xlu1 %v3485_v12, %s3371_s22 }
  0x9d   :  { %v3648_v36 = vpop.permute.xlu0 %183 }
  0x9e   :  { %v3650_v37 = vpop.permute.xlu1 %147  ;;  %645 = vperm.xlu0 %3284, %v3419_v1  }
  0x9f   :  { %577 = vrot.lane.b32.xlu1 %v3454_v7, %s3372_s23 }
  0xa1   :  { %v3655_v38 = vpop.permute.xlu0 %133 }
  0xa2   :  { %v3657_v39 = vpop.permute.xlu1 %260 }
  0xa3   :  { %585 = vrot.lane.b32.xlu1 %v3469_v10, %s3372_s23 }
  0xa5   :  { %v3661_v40 = vpop.permute.xlu0 %141 }
  0xa6   :  { %v3663_v41 = vpop.permute.xlu1 %137 }
  0xa7   :  { %571 = vrot.lane.b32.xlu1 %v3424_v2, %s3372_s23 }
  0xa9   :  { %v3667_v42 = vpop.permute.xlu0 %208 }
  0xaa   :  { %v3669_v43 = vpop.permute.xlu1 %145 }
  0xab   :  { %579 = vrot.lane.b32.xlu1 %v3477_v11, %s3372_s23 }
  0xad   :  { %v3673_v44 = vpop.permute.xlu0 %216 }
  0xae   :  { %v3675_v45 = vpop.permute.xlu1 %212 }
  0xaf   :  { %649 = vperm.xlu1 %3283, %v3433_v4  }
  0xb1   :  { %v3678_v46 = vpop.permute.xlu0 %256 }
  0xb2   :  { %7266 = vst [vmem:[#allocation2_spill] sm:$0xff] %v3678_v46  ;;  %v3680_v47 = vpop.permute.xlu1 %220 }
  0xb3   :  { %3285 = vset.pattern.permute.xlu1 %v6989_v48  ;;  %v74_v48 = vlaneseq }
  0xb4   :  { %673 = vperm.xlu1 %3285, %v3433_v4  }
  0xb5   :  { %v3684_v49 = vpop.permute.xlu0 %210  ;;  %v3723_v51 = vshrl.u32 %v74_v48, 7  ;;  %v3725_v17 = vand.u32 127, %v74_v48  ;;  %v3745_v48 = vld [vmem:[%s6984_s3] sm:$0xff] }
  0xb6   :  { %7267 = vst [vmem:[#allocation3_spill] sm:$0xff] %v3684_v49  ;;  %v3686_v50 = vpop.permute.xlu1 %333 }
  0xb7   :  { %7268 = vst [vmem:[#allocation4_spill] sm:$0xff] %v3686_v50  ;;  %v87_v13 = vsub.s32 0, %v3723_v51  ;;  %v160_v0 = vsub.s32 1, %v3723_v51  ;;  %vm76_vm0 = vcmp.lt.s32.totalorder %v3725_v17, 17  ;;  %vm149_vm1 = vcmp.lt.s32.totalorder %v3725_v17, 16 }
  0xb8   :  { %669 = vperm.xlu1 %3285, %v3419_v1   ;;  %vm222_vm2 = vcmp.lt.s32.totalorder %v3725_v17, 15  ;;  %vm295_vm3 = vcmp.lt.s32.totalorder %v3725_v17, 1  ;;  %vm368_vm4 = vcmp.lt.s32.totalorder %v3725_v17, 127  ;;  %vm441_vm5 = vcmp.lt.s32.totalorder %v3725_v17, 113 }
  0xb9   :  { %v3691_v52 = vpop.permute.xlu0 %218  ;;  %v3761_v50 = vrot.slane %v3734_v14, %v87_v13  ;;  %v3773_v46 = vrot.slane %v3734_v14, %v160_v0  ;;  %vm514_vm6 = vcmp.lt.s32.totalorder %v3725_v17, 112  ;;  %vm587_vm7 = vcmp.lt.s32.totalorder %v3725_v17, 111 }
  0xba   :  { %7269 = vst [vmem:[#allocation5_spill] sm:$0xff] %v3691_v52  ;;  %v3693_v53 = vpop.permute.xlu1 %206  ;;  %v3813_v52 = vld [vmem:[%s6985_s5 + $0x8] sm:$0xff] }
  0xbb   :  { %7270 = vst [vmem:[#allocation6_spill] sm:$0xff] %v3693_v53  ;;  %7289 = vst [vmem:[#allocation25_spill] sm:$0xff] %v3761_v50  ;;  %v84_v53 = vsel %vm76_vm0, %v3616_v27, %v3593_v21 }
  0xbc   :  { %7293 = vst [vmem:[#allocation29_spill] sm:$0xff] %v3773_v46  ;;  %7305 = vst [vmem:[#allocation41_spill] sm:$0xff] %v3813_v52 }
  0xbd   :  { %v3695_v54 = vpop.permute.xlu0 %285 }
  0xbe   :  { %7271 = vst [vmem:[#allocation7_spill] sm:$0xff] %v3695_v54  ;;  %v3697_v55 = vpop.permute.xlu1 %214  ;;  %v452_v54 = vsub.s32 5, %v3723_v51 }
  0xbf   :  { %7272 = vst [vmem:[#allocation8_spill] sm:$0xff] %v3697_v55  ;;  %v3808_v55 = vld [vmem:[%s6985_s5] sm:$0xff] }
  0xc0   :  { %7304 = vst [vmem:[#allocation40_spill] sm:$0xff] %v3808_v55 }
  0xc1   :  { %v3699_v56 = vpop.permute.xlu0 %293 }
  0xc2   :  { %7273 = vst [vmem:[#allocation9_spill] sm:$0xff] %v3699_v56  ;;  %v3701_v57 = vpop.permute.xlu1 %281 }
  0xc3   :  { %7274 = vst [vmem:[#allocation10_spill] sm:$0xff] %v3701_v57 }
  0xc5   :  { %v3705_v59 = vpop.permute.xlu0 %406 }
  0xc6   :  { %v3703_v58 = vpop.permute.xlu1 %289  ;;  %7276 = vst [vmem:[#allocation12_spill] sm:$0xff] %v3705_v59 }
  0xc7   :  { %7275 = vst [vmem:[#allocation11_spill] sm:$0xff] %v3703_v58 }
  0xc9   :  { %v3709_v61 = vpop.permute.xlu0 %287 }
  0xca   :  { %v3707_v60 = vpop.permute.xlu1 %329  ;;  %7278 = vst [vmem:[#allocation14_spill] sm:$0xff] %v3709_v61 }
  0xcb   :  { %7277 = vst [vmem:[#allocation13_spill] sm:$0xff] %v3707_v60 }
  0xcd   :  { %v3713_v63 = vpop.permute.xlu0 %354 }
  0xce   :  { %v3711_v62 = vpop.permute.xlu1 %279  ;;  %7280 = vst [vmem:[#allocation16_spill] sm:$0xff] %v3713_v63  ;;  %v3764_v63 = vrot.slane %v3740_v9, %v87_v13 }
  0xcf   :  { %7279 = vst [vmem:[#allocation15_spill] sm:$0xff] %v3711_v62 }
  0xd0   :  { %7290 = vst [vmem:[#allocation26_spill] sm:$0xff] %v3764_v63 }
  0xd1   :  { %v3717_v4 = vpop.permute.xlu0 %362 }
  0xd2   :  { %v3715_v1 = vpop.permute.xlu1 %283  ;;  %7282 = vst [vmem:[#allocation18_spill] sm:$0xff] %v3717_v4  ;;  %v3770_v4 = vrot.slane %v3750_v3, %v87_v13 }
  0xd3   :  { %7281 = vst [vmem:[#allocation17_spill] sm:$0xff] %v3715_v1 }
  0xd4   :  { %7292 = vst [vmem:[#allocation28_spill] sm:$0xff] %v3770_v4 }
  0xd5   :  { %v3721_v18 = vpop.permute.xlu0 %402 }
  0xd6   :  { %v3719_v31 = vpop.permute.xlu1 %291  ;;  %7284 = vst [vmem:[#allocation20_spill] sm:$0xff] %v3721_v18  ;;  %v233_v18 = vsub.s32 2, %v3723_v51 }
  0xd7   :  { %7283 = vst [vmem:[#allocation19_spill] sm:$0xff] %v3719_v31  ;;  %v3776_v31 = vrot.slane %v3740_v9, %v160_v0 }
  0xd8   :  { %v3785_v62 = vrot.slane %v3734_v14, %v233_v18  ;;  %v3788_v1 = vrot.slane %v3740_v9, %v233_v18  ;;  %v3792_v61 = vrot.slane %v3745_v48, %v233_v18  ;;  %v3795_v58 = vrot.slane %v3750_v3, %v233_v18 }
  0xd9   :  { %v3729_v15 = vpop.permute.xlu0 %352  ;;  %7294 = vst [vmem:[#allocation30_spill] sm:$0xff] %v3776_v31  ;;  %v3376_v18 = vmov 16  }
  0xda   :  { %v3727_v16 = vpop.permute.xlu1 %358  ;;  %7286 = vst [vmem:[#allocation22_spill] sm:$0xff] %v3729_v15  ;;  %v306_v15 = vsub.s32 3, %v3723_v51  ;;  %7297 = vst [vmem:[#allocation33_spill] sm:$0xff] %v3785_v62  ;;  %3286 = vset.pattern.permute.xlu0 %v3376_v18  ;;  %3287 = vset.pattern.permute.xlu1 %v3376_v18  ;;  %v80_v18 = vsel %vm76_vm0, %v3608_v25, %v3610_v26 }
  0xdb   :  { %7285 = vst [vmem:[#allocation21_spill] sm:$0xff] %v3727_v16  ;;  %v3767_v16 = vrot.slane %v3745_v48, %v87_v13  ;;  %7298 = vst [vmem:[#allocation34_spill] sm:$0xff] %v3788_v1  ;;  %v379_v13 = vsub.s32 4, %v3723_v51  ;;  %694 = vperm.xlu0 %3286, %v3808_v55   ;;  %699 = vperm.xlu1 %3287, %v3813_v52  }
  0xdc   :  { %7299 = vst [vmem:[#allocation35_spill] sm:$0xff] %v3792_v61  ;;  %7300 = vst [vmem:[#allocation36_spill] sm:$0xff] %v3795_v58  ;;  %v3798_v56 = vrot.slane %v3745_v48, %v306_v15  ;;  %v3836_v49 = vrot.slane %v3750_v3, %v306_v15 }
  0xdd   :  { %v3758_v60 = vpop.permute.xlu0 %360  ;;  %7291 = vst [vmem:[#allocation27_spill] sm:$0xff] %v3767_v16  ;;  %v3845_v58 = vrot.slane %v3740_v9, %v379_v13  ;;  %v3848_v61 = vrot.slane %v3750_v3, %v379_v13 }
  0xde   :  { %v3756_v59 = vpop.permute.xlu1 %366  ;;  %7288 = vst [vmem:[#allocation24_spill] sm:$0xff] %v3758_v60  ;;  %v3779_v60 = vrot.slane %v3745_v48, %v160_v0  ;;  %7301 = vst [vmem:[#allocation37_spill] sm:$0xff] %v3798_v56  ;;  %v3823_v56 = vrot.slane %v3740_v9, %v306_v15 }
  0xdf   :  { %7287 = vst [vmem:[#allocation23_spill] sm:$0xff] %v3756_v59  ;;  %v3782_v59 = vrot.slane %v3750_v3, %v160_v0  ;;  %7308 = vst [vmem:[#allocation44_spill] sm:$0xff] %v3836_v49  ;;  %v79_v49 = vsel %vm76_vm0, %v3600_v23, %v3625_v30 }
  0xe0   :  { %7295 = vst [vmem:[#allocation31_spill] sm:$0xff] %v3779_v60  ;;  %7307 = vst [vmem:[#allocation43_spill] sm:$0xff] %v3823_v56  ;;  %v3842_v56 = vrot.slane %v3734_v14, %v379_v13 }
  0xe1   :  { %7296 = vst [vmem:[#allocation32_spill] sm:$0xff] %v3782_v59  ;;  %v3802_v0 = vpop.permute.xlu0 %427  ;;  %7311 = vst [vmem:[#allocation47_spill] sm:$0xff] %v3845_v58  ;;  %v3864_v58 = vrot.slane %v3745_v48, %v452_v54 }
  0xe2   :  { %v3800_v57 = vpop.permute.xlu1 %479  ;;  %7303 = vst [vmem:[#allocation39_spill] sm:$0xff] %v3802_v0  ;;  %v3820_v0 = vrot.slane %v3734_v14, %v306_v15  ;;  %7310 = vst [vmem:[#allocation46_spill] sm:$0xff] %v3842_v56 }
  0xe3   :  { %7302 = vst [vmem:[#allocation38_spill] sm:$0xff] %v3800_v57  ;;  %v82_v57 = vsel %vm76_vm0, %v3593_v21, %v3608_v25  ;;  %7312 = vst [vmem:[#allocation48_spill] sm:$0xff] %v3848_v61  ;;  %v81_v21 = vsel %vm76_vm0, %v3585_v19, %v3600_v23  ;;  %v78_v25 = vsel %vm76_vm0, %v3610_v26, %v3616_v27  ;;  %v3377_v27 = vmov 17  }
  0xe4   :  { %7306 = vst [vmem:[#allocation42_spill] sm:$0xff] %v3820_v0  ;;  %v3839_v0 = vrot.slane %v3745_v48, %v379_v13  ;;  %v106_v15 = vmul.f32 %v3761_v50, %v82_v57  ;;  %7315 = vst [vmem:[#allocation51_spill] sm:$0xff] %v3864_v58  ;;  %v3869_v13 = vld [vmem:[%s6985_s5 + $0x10] sm:$0xff]  ;;  %v107_v57 = vmul.f32 %v3764_v63, %v80_v18  ;;  %3288 = vset.pattern.permute.xlu0 %v3377_v27 }
  0xe5   :  { %v3861_v56 = vpop.permute.xlu0 %435  ;;  %7316 = vst [vmem:[#allocation52_spill] sm:$0xff] %v3869_v13  ;;  %v105_v61 = vmul.f32 %v3767_v16, %v84_v53  ;;  %v3875_v26 = vrot.slane %v3734_v14, %v452_v54  ;;  %704 = vperm.xlu1 %3287, %v3869_v13   ;;  %v3880_v58 = vmul.f32 %v3587_v20, %v3424_v2  ;;  %v525_v53 = vsub.s32 6, %v3723_v51 }
  0xe6   :  { %7309 = vst [vmem:[#allocation45_spill] sm:$0xff] %v3839_v0  ;;  %v3859_v0 = vpop.permute.xlu1 %356  ;;  %7314 = vst [vmem:[#allocation50_spill] sm:$0xff] %v3861_v56  ;;  %v3884_v56 = vrot.slane %v3740_v9, %v452_v54  ;;  %v3887_v18 = vrot.slane %v3750_v3, %v452_v54  ;;  %893 = vperm.xlu0 %3288, %v3808_v55   ;;  %v108_v2 = vmul.f32 %v3770_v4, %v78_v25 }
  0xe7   :  { %7313 = vst [vmem:[#allocation49_spill] sm:$0xff] %v3859_v0  ;;  %7317 = vst [vmem:[#allocation53_spill] sm:$0xff] %v3875_v26  ;;  %v51_v26 = vmul.f32 %v3587_v20, %v3446_v6  ;;  %v102_v0 = vmul.f32 %v3761_v50, %v81_v21  ;;  %v54_v54 = vmul.f32 %v3595_v22, %v3438_v5 }
  0xe8   :  { %7318 = vst [vmem:[#allocation54_spill] sm:$0xff] %v3884_v56  ;;  %7319 = vst [vmem:[#allocation55_spill] sm:$0xff] %v3887_v18  ;;  %v55_v18 = vmul.f32 %v3595_v22, %v3454_v7  ;;  %v56_v55 = vmul.f32 %v3595_v22, %v3459_v8  ;;  %v122_v6 = vmul.f32 %v3602_v24, %v106_v15  ;;  %v3920_v7 = vld [vmem:[%s6982_s4 + $0x18] sm:$0xff] }
  0xe9   :  { %v3908_v21 = vpop.permute.xlu0 %475  ;;  %v123_v25 = vmul.f32 %v3602_v24, %v107_v57  ;;  %v121_v50 = vmul.f32 %v3602_v24, %v105_v61  ;;  %v118_v23 = vmul.f32 %v3618_v28, %v102_v0  ;;  %v83_v5 = vsel %vm76_vm0, %v3633_v33, %v3585_v19  ;;  %3289 = vset.pattern.permute.xlu1 %v3377_v27 }
  0xea   :  { %v3906_v56 = vpop.permute.xlu1 %364  ;;  %v52_v8 = vmul.f32 %v3587_v20, %v3477_v11  ;;  %v3926_v15 = vmul.f32 %v3587_v20, %v3485_v12  ;;  %v103_v61 = vmul.f32 %v3764_v63, %v79_v49  ;;  %v3930_v0 = vrot.slane %v3745_v48, %v525_v53  ;;  %897 = vperm.xlu1 %3289, %v3813_v52  }
  0xeb   :  { %v57_v19 = vmul.f32 %v3595_v22, %v3469_v10  ;;  %v124_v57 = vmul.f32 %v3602_v24, %v108_v2  ;;  %v77_v11 = vsel %vm76_vm0, %v3625_v30, %v3633_v33  ;;  %v3941_v12 = vrot.slane %v3750_v3, %v525_v53 }
  0xec   :  { %7320 = vst [vmem:[#allocation56_spill] sm:$0xff] %v3930_v0  ;;  %v7322_v20 = vmov 4   ;;  %v3944_v49 = vadd.f32 %v122_v6, %v55_v18  ;;  %v101_v27 = vmul.f32 %v3767_v16, %v83_v5  ;;  %v3952_v10 = vrot.slane %v3734_v14, %v525_v53 }
  0xed   :  { %7321 = vst [vmem:[#allocation57_spill] sm:$0xff] %v3941_v12  ;;  %3290 = vset.pattern.permute.xlu0 %v7322_v20  ;;  %v3949_v52 = vpop.permute.xlu0 %429  ;;  %v3955_v22 = vrot.slane %v3740_v9, %v525_v53  ;;  %v3958_v24 = vadd.f32 %v123_v25, %v56_v55  ;;  %v3960_v30 = vadd.f32 %v121_v50, %v54_v54 }
  0xee   :  { %v3947_v63 = vpop.permute.xlu1 %431  ;;  %7323 = vst [vmem:[#allocation58_spill] sm:$0xff] %v3952_v10  ;;  %1171 = vperm.xlu0 %3290, %v3920_v7   ;;  %v155_v33 = vsel %vm149_vm1, %v3631_v32, %v3642_v35  ;;  %v3966_v18 = vadd.f32 %v118_v23, %v51_v26  ;;  %v119_v2 = vmul.f32 %v3618_v28, %v103_v61  ;;  %v7325_v61 = vmov 0  }
  0xef   :  { %7324 = vst [vmem:[#allocation59_spill] sm:$0xff] %v3955_v22  ;;  %v104_v6 = vmul.f32 %v3770_v4, %v77_v11  ;;  %v153_v53 = vsel %vm149_vm1, %v3642_v35, %v3640_v34  ;;  %v157_v50 = vsel %vm149_vm1, %v3650_v37, %v3631_v32  ;;  %901 = vperm.xlu1 %3289, %v3869_v13   ;;  %v598_v35 = vsub.s32 7, %v3723_v51  ;;  %v4005_v51 = vld [vmem:[%s6982_s4 + $0x20] sm:$0xff]  ;;  %v7361_v22 = vld [vmem:[#allocation47_spill] sm:$0xff] }
  0xf0   :  { %v132_v55 = vadd.f32 %v124_v57, %v57_v19  ;;  %v151_v26 = vsel %vm149_vm1, %v3640_v34, %v3650_v37  ;;  %v154_v54 = vsel %vm149_vm1, %v3655_v38, %v3663_v41  ;;  %v117_v25 = vmul.f32 %v3618_v28, %v101_v27 }
  0xf1   :  { %v179_v23 = vmul.f32 %v3773_v46, %v155_v33  ;;  %v152_v32 = vsel %vm149_vm1, %v3663_v41, %v3661_v40  ;;  %v156_v34 = vsel %vm149_vm1, %v3669_v43, %v3655_v38  ;;  %v4000_v5 = vpop.permute.xlu0 %437  ;;  %v180_v19 = vmul.f32 %v3776_v31, %v153_v53 }
  0xf2   :  { %v3998_v37 = vpop.permute.xlu1 %439  ;;  %3292 = vset.pattern.permute.xlu0 %v7325_v61  ;;  %v178_v41 = vmul.f32 %v3779_v60, %v157_v50  ;;  %v150_v38 = vsel %vm149_vm1, %v3661_v40, %v3669_v43  ;;  %v228_v57 = vsel %vm222_vm2, %v3667_v42, %v3675_v45  ;;  %v127_v11 = vadd.f32 %v119_v2, %v52_v8 }
  0xf3   :  { %1245 = vperm.xlu0 %3292, %v3920_v7   ;;  %v120_v27 = vmul.f32 %v3618_v28, %v104_v6  ;;  %v181_v33 = vmul.f32 %v3782_v59, %v151_v26  ;;  %v175_v53 = vmul.f32 %v3773_v46, %v154_v54  ;;  %3291 = vset.pattern.permute.xlu1 %v7322_v20  ;;  %v7349_v46 = vld [vmem:[#allocation43_spill] sm:$0xff] }
  0xf4   :  { %v176_v40 = vmul.f32 %v3776_v31, %v152_v32  ;;  %v174_v43 = vmul.f32 %v3779_v60, %v156_v34  ;;  %v4027_v50 = vrot.slane %v3745_v48, %v598_v35  ;;  %v4030_v4 = vrot.slane %v3734_v14, %v598_v35  ;;  %1176 = vperm.xlu1 %3291, %v4005_v51   ;;  %v4044_v48 = vld [vmem:[%s6982_s4 + $0x28] sm:$0xff]  ;;  %v7348_v31 = vld [vmem:[#allocation42_spill] sm:$0xff] }
  0xf5   :  { %v125_v28 = vadd.f32 %v117_v25, %v3880_v58  ;;  %v195_v8 = vmul.f32 %v3623_v29, %v179_v23  ;;  %v177_v2 = vmul.f32 %v3782_v59, %v150_v38  ;;  %v252_v6 = vmul.f32 %v3785_v62, %v228_v57  ;;  %v4039_v54 = vpop.permute.xlu0 %504 }
  0xf6   :  { %7326 = vst [vmem:[#allocation60_spill] sm:$0xff] %v4027_v50  ;;  %7327 = vst [vmem:[#allocation61_spill] sm:$0xff] %v4030_v4  ;;  %v4037_v26 = vpop.permute.xlu1 %552  ;;  %v196_v14 = vmul.f32 %v3623_v29, %v180_v19  ;;  %v194_v32 = vmul.f32 %v3623_v29, %v178_v41  ;;  %v226_v58 = vsel %vm222_vm2, %v3675_v45, %v3673_v44  ;;  %v7328_v23 = vmov 1  }
  0xf7   :  { %v230_v25 = vsel %vm222_vm2, %v3680_v47, %v3667_v42  ;;  %3294 = vset.pattern.permute.xlu0 %v7328_v23  ;;  %v128_v34 = vadd.f32 %v120_v27, %v3926_v15  ;;  %v197_v38 = vmul.f32 %v3623_v29, %v181_v33  ;;  %v191_v19 = vmul.f32 %v3648_v36, %v175_v53 }
  0xf8   :  { %v224_v41 = vsel %vm222_vm2, %v3673_v44, %v3680_v47  ;;  %1329 = vperm.xlu0 %3294, %v3920_v7   ;;  %v192_v45 = vmul.f32 %v3648_v36, %v176_v40  ;;  %v190_v57 = vmul.f32 %v3648_v36, %v174_v43  ;;  %v4068_v42 = vrot.slane %v3740_v9, %v598_v35  ;;  %v7331_v47 = vld [vmem:[#allocation35_spill] sm:$0xff] }
  0xf9   :  { %v4071_v15 = vrot.slane %v3750_v3, %v598_v35  ;;  %1181 = vperm.xlu1 %3291, %v4044_v48   ;;  %v193_v29 = vmul.f32 %v3648_v36, %v177_v2  ;;  %v253_v27 = vmul.f32 %v3788_v1, %v226_v58  ;;  %v268_v44 = vmul.f32 %v3657_v39, %v252_v6  ;;  %v4080_v40 = vpop.permute.xlu0 %512  ;;  %v7332_v35 = vld [vmem:[#allocation36_spill] sm:$0xff]  ;;  %v7333_v2 = vld [vmem:[#allocation3_spill] sm:$0xff]  ;;  %v7334_v6 = vld [vmem:[#allocation6_spill] sm:$0xff] }
  0xfa   :  { %7329 = vst [vmem:[#allocation62_spill] sm:$0xff] %v4068_v42  ;;  %v251_v33 = vmul.f32 %v7331_v47, %v230_v25  ;;  %v4078_v53 = vpop.permute.xlu1 %425  ;;  %v203_v9 = vadd.f32 %v195_v8, %v3944_v49  ;;  %v204_v43 = vadd.f32 %v196_v14, %v3958_v24  ;;  %v202_v3 = vadd.f32 %v194_v32, %v3960_v30  ;;  %v7335_v25 = vld [vmem:[#allocation5_spill] sm:$0xff]  ;;  %v7360_v42 = vld [vmem:[#allocation46_spill] sm:$0xff] }
  0xfb   :  { %7330 = vst [vmem:[#allocation63_spill] sm:$0xff] %v4071_v15  ;;  %v254_v20 = vmul.f32 %v7332_v35, %v224_v41  ;;  %v205_v59 = vadd.f32 %v197_v38, %v132_v55  ;;  %v4087_v36 = vadd.f32 %v191_v19, %v3966_v18  ;;  %v227_v58 = vsel %vm222_vm2, %v7334_v6, %v7333_v2  ;;  %v7337_v55 = vld [vmem:[#allocation8_spill] sm:$0xff] }
  0xfc   :  { %v229_v49 = vsel %vm222_vm2, %v7335_v25, %v7334_v6  ;;  %v7336_v8 = vmov 2   ;;  %v4099_v24 = vadd.f32 %v192_v45, %v127_v11  ;;  %v198_v30 = vadd.f32 %v190_v57, %v125_v28 }
  0xfd   :  { %3296 = vset.pattern.permute.xlu0 %v7336_v8  ;;  %v225_v18 = vsel %vm222_vm2, %v7333_v2, %v7337_v55  ;;  %3293 = vset.pattern.permute.xlu1 %v7325_v61  ;;  %v201_v14 = vadd.f32 %v193_v29, %v128_v34  ;;  %v269_v32 = vmul.f32 %v3657_v39, %v253_v27  ;;  %v4121_v57 = vpop.permute.xlu0 %625  ;;  %v7339_v27 = vld [vmem:[#allocation7_spill] sm:$0xff] }
  0xfe   :  { %1421 = vperm.xlu0 %3296, %v4044_v48   ;;  %v4108_v38 = vadd.f32 %v268_v44, %v203_v9  ;;  %v267_v19 = vmul.f32 %v3657_v39, %v251_v33  ;;  %v4111_v41 = vpop.permute.xlu1 %433  ;;  %1249 = vperm.xlu1 %3293, %v4005_v51   ;;  %v270_v11 = vmul.f32 %v3657_v39, %v254_v20  ;;  %v7340_v44 = vld [vmem:[#allocation10_spill] sm:$0xff]  ;;  %v7341_v39 = vld [vmem:[#allocation9_spill] sm:$0xff]  ;;  %v7342_v9 = vld [vmem:[#allocation11_spill] sm:$0xff] }
  0xff   :  { %v247_v28 = vmul.f32 %v7331_v47, %v229_v49  ;;  %v248_v45 = vmul.f32 %v3785_v62, %v227_v58  ;;  %v223_v34 = vsel %vm222_vm2, %v7337_v55, %v7335_v25  ;;  %7338 = vst [vmem:[#allocation3_spill] sm:$0xff] %v4121_v57  ;;  %v249_v29 = vmul.f32 %v3788_v1, %v225_v18  ;;  %v7343_v58 = vld [vmem:[#allocation14_spill] sm:$0xff]  ;;  %v7344_v25 = vld [vmem:[#allocation17_spill] sm:$0xff]  ;;  %v7345_v55 = vld [vmem:[#allocation15_spill] sm:$0xff] }
 0x100   :  { %v301_v33 = vsel %vm295_vm3, %v7340_v44, %v7339_v27  ;;  %v303_v20 = vsel %vm295_vm3, %v7341_v39, %v7340_v44  ;;  %v299_v2 = vsel %vm295_vm3, %v7339_v27, %v7342_v9  ;;  %v297_v6 = vsel %vm295_vm3, %v7342_v9, %v7341_v39  ;;  %v7346_v44 = vld [vmem:[#allocation19_spill] sm:$0xff]  ;;  %v7347_v62 = vld [vmem:[#allocation37_spill] sm:$0xff] }
 0x101   :  { %v298_v49 = vsel %vm295_vm3, %v7344_v25, %v7343_v58  ;;  %v300_v18 = vsel %vm295_vm3, %v7345_v55, %v7344_v25  ;;  %v302_v27 = vsel %vm295_vm3, %v7346_v44, %v7345_v55  ;;  %v277_v61 = vadd.f32 %v269_v32, %v204_v43  ;;  %v7350_v43 = vld [vmem:[#allocation44_spill] sm:$0xff]  ;;  %v7359_v57 = vld [vmem:[#allocation45_spill] sm:$0xff] }
 0x102   :  { %1417 = vperm.xlu0 %3296, %v4005_v51   ;;  %v275_v47 = vadd.f32 %v267_v19, %v202_v3  ;;  %v250_v39 = vmul.f32 %v7332_v35, %v223_v34  ;;  %v296_v9 = vsel %vm295_vm3, %v7343_v58, %v7346_v44  ;;  %v4158_v1 = vpop.permute.xlu1 %500  ;;  %1253 = vperm.xlu1 %3293, %v4044_v48   ;;  %v4168_v58 = vpop.permute.xlu0 %506  ;;  %v7351_v44 = vld [vmem:[#allocation2_spill] sm:$0xff] }
 0x103   :  { %v278_v25 = vadd.f32 %v270_v11, %v205_v59  ;;  %v324_v60 = vmul.f32 %v7347_v62, %v303_v20  ;;  %v325_v55 = vmul.f32 %v7348_v31, %v301_v33  ;;  %v326_v16 = vmul.f32 %v7349_v46, %v299_v2 }
 0x104   :  { %v327_v3 = vmul.f32 %v7350_v43, %v297_v6  ;;  %v321_v32 = vmul.f32 %v7348_v31, %v300_v18  ;;  %v322_v19 = vmul.f32 %v7349_v46, %v298_v49  ;;  %v320_v34 = vmul.f32 %v7347_v62, %v302_v27  ;;  %v7353_v6 = vld [vmem:[#allocation18_spill] sm:$0xff]  ;;  %v7354_v49 = vld [vmem:[#allocation21_spill] sm:$0xff]  ;;  %v7355_v27 = vld [vmem:[#allocation16_spill] sm:$0xff] }
 0x105   :  { %v263_v35 = vmul.f32 %v7351_v44, %v247_v28  ;;  %v264_v59 = vmul.f32 %v7351_v44, %v248_v45  ;;  %v265_v11 = vmul.f32 %v7351_v44, %v249_v29  ;;  %v323_v33 = vmul.f32 %v7350_v43, %v296_v9  ;;  %v7356_v29 = vld [vmem:[#allocation4_spill] sm:$0xff]  ;;  %v7357_v43 = vld [vmem:[#allocation23_spill] sm:$0xff]  ;;  %v7358_v46 = vld [vmem:[#allocation13_spill] sm:$0xff] }
 0x106   :  { %v7352_v20 = vmov 3   ;;  %v266_v2 = vmul.f32 %v7351_v44, %v250_v39  ;;  %v372_v18 = vsel %vm368_vm4, %v7354_v49, %v7353_v6  ;;  %v374_v28 = vsel %vm368_vm4, %v7355_v27, %v7354_v49  ;;  %v4185_v45 = vpop.permute.xlu1 %508  ;;  %3295 = vset.pattern.permute.xlu1 %v7328_v23 }
 0x107   :  { %3299 = vset.pattern.permute.xlu0 %v7352_v20  ;;  %v340_v9 = vmul.f32 %v7356_v29, %v324_v60  ;;  %v341_v39 = vmul.f32 %v7356_v29, %v325_v55  ;;  %v342_v44 = vmul.f32 %v7356_v29, %v326_v16  ;;  %v370_v62 = vsel %vm368_vm4, %v7353_v6, %v7357_v43 }
 0x108   :  { %1501 = vperm.xlu0 %3299, %v4005_v51   ;;  %1333 = vperm.xlu1 %3295, %v4005_v51   ;;  %v343_v49 = vmul.f32 %v7356_v29, %v327_v3  ;;  %v337_v31 = vmul.f32 %v7358_v46, %v321_v32  ;;  %v338_v23 = vmul.f32 %v7358_v46, %v322_v19  ;;  %v4209_v32 = vpop.permute.xlu0 %573 }
 0x109   :  { %v336_v13 = vmul.f32 %v7358_v46, %v320_v34  ;;  %v271_v60 = vadd.f32 %v263_v35, %v198_v30  ;;  %v339_v55 = vmul.f32 %v7358_v46, %v323_v33  ;;  %v397_v16 = vmul.f32 %v7359_v57, %v374_v28  ;;  %v7365_v33 = vld [vmem:[#allocation48_spill] sm:$0xff]  ;;  %v7369_v28 = vld [vmem:[#allocation39_spill] sm:$0xff] }
 0x10a   :  { %v398_v50 = vmul.f32 %v7360_v42, %v372_v18  ;;  %v272_v15 = vadd.f32 %v264_v59, %v4087_v36  ;;  %v273_v6 = vadd.f32 %v265_v11, %v4099_v24  ;;  %v274_v4 = vadd.f32 %v266_v2, %v201_v14  ;;  %v4207_v29 = vpop.permute.xlu1 %548  ;;  %v7364_v11 = vld [vmem:[#allocation22_spill] sm:$0xff] }
 0x10b   :  { %v399_v3 = vmul.f32 %v7361_v22, %v370_v62  ;;  %v348_v35 = vadd.f32 %v340_v9, %v275_v47  ;;  %v349_v46 = vadd.f32 %v341_v39, %v4108_v38  ;;  %v350_v30 = vadd.f32 %v342_v44, %v277_v61  ;;  %v7362_v47 = vld [vmem:[#allocation12_spill] sm:$0xff]  ;;  %v7363_v38 = vld [vmem:[#allocation49_spill] sm:$0xff]  ;;  %v7368_v18 = vld [vmem:[#allocation50_spill] sm:$0xff] }
 0x10c   :  { %1497 = vperm.xlu0 %3299, %v3920_v7   ;;  %v376_v36 = vsel %vm368_vm4, %v7357_v43, %v7355_v27  ;;  %1337 = vperm.xlu1 %3295, %v4044_v48   ;;  %v351_v24 = vadd.f32 %v343_v49, %v278_v25  ;;  %v4218_v14 = vadd.f32 %v337_v31, %v272_v15  ;;  %v7366_v15 = vld [vmem:[#allocation24_spill] sm:$0xff]  ;;  %v4273_v49 = vpop.permute.xlu0 %581 }
 0x10d   :  { %v4220_v62 = vadd.f32 %v338_v23, %v273_v6  ;;  %v4222_v19 = vadd.f32 %v336_v13, %v271_v60  ;;  %v4224_v34 = vadd.f32 %v339_v55, %v274_v4  ;;  %v413_v59 = vmul.f32 %v7362_v47, %v397_v16 }
 0x10e   :  { %v414_v61 = vmul.f32 %v7362_v47, %v398_v50  ;;  %v373_v43 = vsel %vm368_vm4, %v7364_v11, %v7363_v38  ;;  %v400_v2 = vmul.f32 %v7365_v33, %v376_v36  ;;  %v415_v31 = vmul.f32 %v7362_v47, %v399_v3  ;;  %v4242_v50 = vpop.permute.xlu1 %498  ;;  %v7370_v36 = vld [vmem:[#allocation51_spill] sm:$0xff] }
 0x10f   :  { %v371_v13 = vsel %vm368_vm4, %v7363_v38, %v7366_v15  ;;  %v369_v4 = vsel %vm368_vm4, %v7366_v15, %v3906_v56  ;;  %v7367_v23 = vmov 5   ;;  %v375_v25 = vsel %vm368_vm4, %v3906_v56, %v7364_v11  ;;  %v7371_v11 = vld [vmem:[#allocation53_spill] sm:$0xff] }
 0x110   :  { %3301 = vset.pattern.permute.xlu0 %v7367_v23  ;;  %v445_v27 = vsel %vm441_vm5, %v3947_v63, %v7368_v18  ;;  %v447_v9 = vsel %vm441_vm5, %v7369_v28, %v3947_v63  ;;  %3297 = vset.pattern.permute.xlu1 %v7352_v20  ;;  %v393_v39 = vmul.f32 %v7359_v57, %v373_v43  ;;  %v7374_v20 = vmov 6  }
 0x111   :  { %1581 = vperm.xlu0 %3301, %v3920_v7   ;;  %v443_v56 = vsel %vm441_vm5, %v7368_v18, %v3998_v37  ;;  %v449_v44 = vsel %vm441_vm5, %v3998_v37, %v7369_v28  ;;  %v446_v63 = vsel %vm441_vm5, %v4078_v53, %v3949_v52  ;;  %1505 = vperm.xlu1 %3297, %v4044_v48  }
 0x112   :  { %v421_v60 = vadd.f32 %v413_v59, %v348_v35  ;;  %v394_v55 = vmul.f32 %v7360_v42, %v371_v13  ;;  %v395_v16 = vmul.f32 %v7361_v22, %v369_v4  ;;  %v448_v6 = vsel %vm441_vm5, %v4000_v5, %v4078_v53  ;;  %v503_v15 = vpop.permute.xlu1 %502  ;;  %v7372_v35 = vld [vmem:[#allocation54_spill] sm:$0xff]  ;;  %v7373_v13 = vld [vmem:[#allocation55_spill] sm:$0xff] }
 0x113   :  { %v422_v37 = vadd.f32 %v414_v61, %v349_v46  ;;  %v396_v3 = vmul.f32 %v7365_v33, %v375_v25  ;;  %v470_v38 = vmul.f32 %v7370_v36, %v447_v9  ;;  %v471_v43 = vmul.f32 %v7371_v11, %v445_v27  ;;  %v7375_v46 = vld [vmem:[#allocation20_spill] sm:$0xff]  ;;  %v7376_v9 = vld [vmem:[#allocation38_spill] sm:$0xff] }
 0x114   :  { %v416_v18 = vmul.f32 %v7362_v47, %v400_v2  ;;  %v472_v59 = vmul.f32 %v7372_v35, %v443_v56  ;;  %v473_v28 = vmul.f32 %v7373_v13, %v449_v44  ;;  %v466_v4 = vmul.f32 %v7370_v36, %v446_v63  ;;  %v4313_v63 = vpop.permute.xlu0 %621 }
 0x115   :  { %3302 = vset.pattern.permute.xlu0 %v7374_v20  ;;  %v423_v53 = vadd.f32 %v415_v31, %v350_v30  ;;  %v409_v61 = vmul.f32 %v7375_v46, %v393_v39  ;;  %v469_v25 = vmul.f32 %v7373_v13, %v448_v6  ;;  %3298 = vset.pattern.permute.xlu1 %v7336_v8  ;;  %v4934_v13 = vld [vmem:[%s6982_s4 + $0x18] sm:$0xff] }
 0x116   :  { %1673 = vperm.xlu0 %3302, %v4044_v48   ;;  %v410_v47 = vmul.f32 %v7375_v46, %v394_v55  ;;  %v411_v2 = vmul.f32 %v7375_v46, %v395_v16  ;;  %v442_v27 = vsel %vm441_vm5, %v4111_v41, %v4000_v5  ;;  %v444_v30 = vsel %vm441_vm5, %v3949_v52, %v4111_v41  ;;  %v511_v5 = vpop.permute.xlu1 %510 }
 0x117   :  { %1413 = vperm.xlu1 %3298, %v3920_v7   ;;  %v412_v31 = vmul.f32 %v7375_v46, %v396_v3  ;;  %v486_v39 = vmul.f32 %v7376_v9, %v470_v38  ;;  %v487_v56 = vmul.f32 %v7376_v9, %v471_v43  ;;  %v520_v44 = vsel %vm514_vm6, %v4158_v1, %v4039_v54 }
 0x118   :  { %v424_v55 = vadd.f32 %v416_v18, %v351_v24  ;;  %v488_v16 = vmul.f32 %v7376_v9, %v472_v59  ;;  %v489_v52 = vmul.f32 %v7376_v9, %v473_v28  ;;  %v482_v7 = vmul.f32 %v3908_v21, %v466_v4 }
 0x119   :  { %v485_v41 = vmul.f32 %v3908_v21, %v469_v25  ;;  %v467_v6 = vmul.f32 %v7371_v11, %v444_v30  ;;  %v468_v3 = vmul.f32 %v7372_v35, %v442_v27  ;;  %v522_v38 = vsel %vm514_vm6, %v4080_v40, %v4158_v1  ;;  %v576_v27 = vpop.permute.xlu0 %575 }
 0x11a   :  { %1669 = vperm.xlu0 %3302, %v4005_v51   ;;  %v417_v24 = vadd.f32 %v409_v61, %v4222_v19  ;;  %v418_v43 = vadd.f32 %v410_v47, %v4218_v14  ;;  %v419_v18 = vadd.f32 %v411_v2, %v4220_v62  ;;  %v543_v59 = vmul.f32 %v3930_v0, %v520_v44  ;;  %v578_v25 = vpop.permute.xlu1 %577 }
 0x11b   :  { %3300 = vset.pattern.permute.xlu1 %v7367_v23  ;;  %v420_v28 = vadd.f32 %v412_v31, %v4224_v34  ;;  %v494_v4 = vadd.f32 %v486_v39, %v421_v60  ;;  %v495_v46 = vadd.f32 %v487_v56, %v422_v37  ;;  %v518_v1 = vsel %vm514_vm6, %v4039_v54, %v4185_v45  ;;  %v3349_v23 = vld [vmem:[%s6982_s4 + $0x28] sm:$0xff] }
 0x11c   :  { %1589 = vperm.xlu1 %3300, %v4044_v48   ;;  %v496_v14 = vadd.f32 %v488_v16, %v423_v53  ;;  %v497_v19 = vadd.f32 %v489_v52, %v424_v55  ;;  %v546_v62 = vmul.f32 %v3941_v12, %v522_v38  ;;  %v516_v34 = vsel %vm514_vm6, %v4185_v45, %v4080_v40  ;;  %v7378_v45 = vld [vmem:[#allocation59_spill] sm:$0xff] }
 0x11d   :  { %v490_v60 = vadd.f32 %v482_v7, %v417_v24  ;;  %v493_v37 = vadd.f32 %v485_v41, %v420_v28  ;;  %v483_v61 = vmul.f32 %v3908_v21, %v467_v6  ;;  %v484_v47 = vmul.f32 %v3908_v21, %v468_v3  ;;  %v584_v52 = vpop.permute.xlu0 %583  ;;  %v7379_v6 = vld [vmem:[#allocation61_spill] sm:$0xff]  ;;  %v7380_v38 = vld [vmem:[#allocation63_spill] sm:$0xff] }
 0x11e   :  { %v7377_v54 = vmov 7   ;;  %v559_v2 = vmul.f32 %v4037_v26, %v543_v59  ;;  %v544_v53 = vmul.f32 %v3952_v10, %v518_v1  ;;  %v517_v30 = vsel %vm514_vm6, %v503_v15, %v4168_v58  ;;  %v586_v56 = vpop.permute.xlu1 %585 }
 0x11f   :  { %3305 = vset.pattern.permute.xlu0 %v7377_v54  ;;  %v519_v40 = vsel %vm514_vm6, %v4242_v50, %v503_v15  ;;  %v545_v31 = vmul.f32 %v7378_v45, %v516_v34  ;;  %v515_v21 = vsel %vm514_vm6, %v4168_v58, %v511_v5  ;;  %v521_v9 = vsel %vm514_vm6, %v511_v5, %v4242_v50 }
 0x120   :  { %v591_v39 = vsel %vm587_vm7, %v578_v25, %v4273_v49  ;;  %1585 = vperm.xlu1 %3300, %v4005_v51   ;;  %v562_v44 = vmul.f32 %v4037_v26, %v546_v62  ;;  %v593_v15 = vsel %vm587_vm7, %v4209_v32, %v578_v25  ;;  %v589_v58 = vsel %vm587_vm7, %v4273_v49, %v586_v56 }
 0x121   :  { %v595_v50 = vsel %vm587_vm7, %v586_v56, %v4209_v32  ;;  %v491_v5 = vadd.f32 %v483_v61, %v418_v43  ;;  %v492_v55 = vadd.f32 %v484_v47, %v419_v18  ;;  %v539_v16 = vmul.f32 %v3930_v0, %v519_v40  ;;  %v7381_v32 = vld [vmem:[#allocation60_spill] sm:$0xff]  ;;  %v7382_v18 = vld [vmem:[#allocation62_spill] sm:$0xff] }
 0x122   :  { %v540_v51 = vmul.f32 %v3952_v10, %v517_v30  ;;  %v541_v7 = vmul.f32 %v7378_v45, %v515_v21  ;;  %v542_v41 = vmul.f32 %v3941_v12, %v521_v9  ;;  %v617_v3 = vmul.f32 %v7379_v6, %v591_v39  ;;  %v572_v1 = vpop.permute.xlu1 %571 }
 0x123   :  { %v619_v24 = vmul.f32 %v7380_v38, %v595_v50  ;;  %v560_v49 = vmul.f32 %v4037_v26, %v544_v53  ;;  %v561_v59 = vmul.f32 %v4037_v26, %v545_v31  ;;  %v616_v43 = vmul.f32 %v7381_v32, %v593_v15 }
 0x124   :  { %v618_v28 = vmul.f32 %v7382_v18, %v589_v58  ;;  %3303 = vset.pattern.permute.xlu1 %v7377_v54  ;;  %v567_v25 = vadd.f32 %v559_v2, %v494_v4  ;;  %v592_v62 = vsel %vm587_vm7, %v572_v1, %v576_v27  ;;  %v594_v34 = vsel %vm587_vm7, %v584_v52, %v572_v1  ;;  %v7383_v2 = vld [vmem:[#allocation3_spill] sm:$0xff] }
 0x125   :  { %v570_v61 = vadd.f32 %v562_v44, %v497_v19  ;;  %1757 = vperm.xlu1 %3303, %v4044_v48   ;;  %v555_v47 = vmul.f32 %v4207_v29, %v539_v16  ;;  %v556_v26 = vmul.f32 %v4207_v29, %v540_v51  ;;  %v612_v53 = vmul.f32 %v7381_v32, %v592_v62 }
 0x126   :  { %v615_v30 = vmul.f32 %v7380_v38, %v594_v34  ;;  %v557_v40 = vmul.f32 %v4207_v29, %v541_v7  ;;  %v558_v4 = vmul.f32 %v4207_v29, %v542_v41  ;;  %v633_v31 = vmul.f32 %v7383_v2, %v617_v3  ;;  %v580_v39 = vpop.permute.xlu1 %579 }
 0x127   :  { %v635_v21 = vmul.f32 %v7383_v2, %v619_v24  ;;  %v569_v9 = vadd.f32 %v561_v59, %v496_v14  ;;  %v632_v19 = vmul.f32 %v7383_v2, %v616_v43  ;;  %v634_v48 = vmul.f32 %v7383_v2, %v618_v28 }
 0x128   :  { %v568_v56 = vadd.f32 %v560_v49, %v495_v46  ;;  %v628_v44 = vmul.f32 %v4313_v63, %v612_v53  ;;  %v631_v15 = vmul.f32 %v4313_v63, %v615_v30  ;;  %v588_v58 = vsel %vm587_vm7, %v580_v39, %v584_v52 }
 0x129   :  { %v590_v29 = vsel %vm587_vm7, %v576_v27, %v580_v39  ;;  %3304 = vset.pattern.permute.xlu1 %v7374_v20  ;;  %v563_v50 = vadd.f32 %v555_v47, %v490_v60  ;;  %v564_v14 = vadd.f32 %v556_v26, %v491_v5  ;;  %v614_v51 = vmul.f32 %v7382_v18, %v588_v58  ;;  %v646_v5 = vpop.permute.xlu0 %645  ;;  %v4899_v18 = vld [vmem:[%s6982_s4 + $0x20] sm:$0xff] }
 0x12a   :  { %v613_v16 = vmul.f32 %v7379_v6, %v590_v29  ;;  %v565_v7 = vadd.f32 %v557_v40, %v492_v55  ;;  %v566_v46 = vadd.f32 %v558_v4, %v493_v37  ;;  %v641_v41 = vadd.f32 %v633_v31, %v568_v56  ;;  %v650_v52 = vpop.permute.xlu1 %649 }
 0x12b   :  { %v643_v3 = vadd.f32 %v635_v21, %v570_v61  ;;  %v630_v49 = vmul.f32 %v4313_v63, %v614_v51  ;;  %v640_v59 = vadd.f32 %v632_v19, %v567_v25  ;;  %v642_v43 = vadd.f32 %v634_v48, %v569_v9  ;;  %v994_v51 = vld [vmem:[%s6986_s2 + $0x1f8] sm:$0xff] }
 0x12c   :  { %v629_v24 = vmul.f32 %v4313_v63, %v613_v16  ;;  %v657_v27 = vadd.f32 %v650_v52, %v641_v41  ;;  %v639_v1 = vadd.f32 %v631_v15, %v566_v46  ;;  %v636_v60 = vadd.f32 %v628_v44, %v563_v50  ;;  %v992_v50 = vld [vmem:[%s6986_s2 + $0x1e8] sm:$0xff]  ;;  %v991_v16 = vld [vmem:[%s6986_s2 + $0x1e0] sm:$0xff]  ;;  %v7384_v46 = vld [vmem:[#allocation40_spill] sm:$0xff] }
 0x12d   :  { %v659_v28 = vadd.f32 %v650_v52, %v643_v3  ;;  %v656_v62 = vadd.f32 %v650_v52, %v640_v59  ;;  %v658_v34 = vadd.f32 %v650_v52, %v642_v43  ;;  %v638_v26 = vadd.f32 %v630_v49, %v565_v7  ;;  %v988_v7 = vld [vmem:[%s6986_s2 + $0x1c8] sm:$0xff]  ;;  %v987_v41 = vld [vmem:[%s6986_s2 + $0x1c0] sm:$0xff]  ;;  %v993_v3 = vld [vmem:[%s6986_s2 + $0x1f0] sm:$0xff] }
 0x12e   :  { %v637_v47 = vadd.f32 %v629_v24, %v564_v14  ;;  %vm665_vm8 = vcmp.ge.f32.partialorder %v657_v27, 0.0  ;;  %v655_v37 = vadd.f32 %v646_v5, %v639_v1  ;;  %v652_v61 = vadd.f32 %v646_v5, %v636_v60  ;;  %v984_v24 = vld [vmem:[%s6986_s2 + $0x1a8] sm:$0xff]  ;;  %v990_v49 = vld [vmem:[%s6986_s2 + $0x1d8] sm:$0xff]  ;;  %v983_v52 = vld [vmem:[%s6986_s2 + $0x1a0] sm:$0xff] }
 0x12f   :  { %v674_v55 = vpop.permute.xlu1 %673  ;;  %vm667_vm9 = vcmp.ge.f32.partialorder %v659_v28, 0.0  ;;  %vm664_vm10 = vcmp.ge.f32.partialorder %v656_v62, 0.0  ;;  %vm666_vm11 = vcmp.ge.f32.partialorder %v658_v34, 0.0  ;;  %v654_v4 = vadd.f32 %v646_v5, %v638_v26  ;;  %v989_v59 = vld [vmem:[%s6986_s2 + $0x1d0] sm:$0xff]  ;;  %v980_v43 = vld [vmem:[%s6986_s2 + $0x188] sm:$0xff]  ;;  %v978_v26 = vld [vmem:[%s6986_s2 + $0x178] sm:$0xff] }
 0x130   :  { %v681_v53 = vmul.f32 %v674_v55, %v657_v27  ;;  %v683_v30 = vmul.f32 %v674_v55, %v659_v28  ;;  %v680_v63 = vmul.f32 %v674_v55, %v656_v62  ;;  %v682_v40 = vmul.f32 %v674_v55, %v658_v34  ;;  %v985_v1 = vld [vmem:[%s6986_s2 + $0x1b0] sm:$0xff]  ;;  %v976_v60 = vld [vmem:[%s6986_s2 + $0x168] sm:$0xff]  ;;  %v971_v55 = vld [vmem:[%s6986_s2 + $0x140] sm:$0xff] }
 0x131   :  { %v653_v25 = vadd.f32 %v646_v5, %v637_v47  ;;  %vm663_vm14 = vcmp.ge.f32.partialorder %v655_v37, 0.0  ;;  %vm660_vm15 = vcmp.ge.f32.partialorder %v652_v61, 0.0  ;;  %v982_v5 = vld [vmem:[%s6986_s2 + $0x198] sm:$0xff]  ;;  %v972_v47 = vld [vmem:[%s6986_s2 + $0x148] sm:$0xff] }
 0x132   :  { %v689_v2 = vsel %vm665_vm8, %v657_v27, %v681_v53  ;;  %v691_v31 = vsel %vm667_vm9, %v659_v28, %v683_v30  ;;  %v688_v21 = vsel %vm664_vm10, %v656_v62, %v680_v63  ;;  %v690_v9 = vsel %vm666_vm11, %v658_v34, %v682_v40  ;;  %v986_v27 = vld [vmem:[%s6986_s2 + $0x1b8] sm:$0xff]  ;;  %v979_v28 = vld [vmem:[%s6986_s2 + $0x180] sm:$0xff]  ;;  %v981_v34 = vld [vmem:[%s6986_s2 + $0x190] sm:$0xff] }
 0x133   :  { %742 = vmatprep.subr.mxu0 %v689_v2  ;;  %825 = vmatprep.subr.mxu1 %v691_v31  ;;  %v670_v19 = vpop.permute.xlu1 %669  ;;  %vm661_vm13 = vcmp.ge.f32.partialorder %v653_v25, 0.0  ;;  %vm662_vm8 = vcmp.ge.f32.partialorder %v654_v4, 0.0  ;;  %v975_v62 = vld [vmem:[%s6986_s2 + $0x160] sm:$0xff]  ;;  %v974_v53 = vld [vmem:[%s6986_s2 + $0x158] sm:$0xff]  ;;  %v973_v63 = vld [vmem:[%s6986_s2 + $0x150] sm:$0xff] }
 0x134   :  { %743 = vmatpush1.msra.mxu0 %v688_v21  ;;  %826 = vmatpush1.msra.mxu1 %v690_v9  ;;  %v677_v48 = vmul.f32 %v670_v19, %v653_v25  ;;  %v679_v39 = vmul.f32 %v670_v19, %v655_v37  ;;  %v676_v56 = vmul.f32 %v670_v19, %v652_v61  ;;  %v967_v30 = vld [vmem:[%s6986_s2 + $0x120] sm:$0xff]  ;;  %v964_v40 = vld [vmem:[%s6986_s2 + $0x108] sm:$0xff]  ;;  %v969_v2 = vld [vmem:[%s6986_s2 + $0x130] sm:$0xff] }
 0x135   :  { %v678_v44 = vmul.f32 %v670_v19, %v654_v4  ;;  %v960_v31 = vld [vmem:[%s6986_s2 + $0xe8] sm:$0xff]  ;;  %v966_v21 = vld [vmem:[%s6986_s2 + $0x118] sm:$0xff]  ;;  %v959_v9 = vld [vmem:[%s6986_s2 + $0xe0] sm:$0xff] }
 0x136   :  { %v685_v15 = vsel %vm661_vm13, %v653_v25, %v677_v48  ;;  %v687_v58 = vsel %vm663_vm14, %v655_v37, %v679_v39  ;;  %v684_v29 = vsel %vm660_vm15, %v652_v61, %v676_v56  ;;  %v977_v37 = vld [vmem:[%s6986_s2 + $0x170] sm:$0xff]  ;;  %v968_v61 = vld [vmem:[%s6986_s2 + $0x128] sm:$0xff]  ;;  %v970_v25 = vld [vmem:[%s6986_s2 + $0x138] sm:$0xff] }
 0x137   :  { %744 = vmatprep.subr.mxu0 %v685_v15  ;;  %827 = vmatprep.subr.mxu1 %v687_v58  ;;  %v686_v14 = vsel %vm662_vm8, %v654_v4, %v678_v44  ;;  %v963_v4 = vld [vmem:[%s6986_s2 + $0x100] sm:$0xff]  ;;  %v956_v19 = vld [vmem:[%s6986_s2 + $0xc8] sm:$0xff]  ;;  %v965_v48 = vld [vmem:[%s6986_s2 + $0x110] sm:$0xff]  ;;  %v7385_v44 = vmov 0.0  }
 0x138   :  { %745 = vmatpush1.msra.mxu0 %v684_v29  ;;  %828 = vmatpush1.msra.mxu1 %v686_v14  ;;  %v955_v39 = vld [vmem:[%s6986_s2 + $0xc0] sm:$0xff]  ;;  %v962_v56 = vld [vmem:[%s6986_s2 + $0xf8] sm:$0xff]  ;;  %v952_v15 = vld [vmem:[%s6986_s2 + $0xa8] sm:$0xff] }
 0x139   :  { %3218 = vmatmul.mubr.msk.f32.vlgmr.msra.gmra.mxu0 %vm707_vm12, %v7384_v46  ;;  %995 = vmatprep.subr.mxu0 %v992_v50  ;;  %v951_v58 = vld [vmem:[%s6986_s2 + $0xa0] sm:$0xff]  ;;  %v961_v29 = vld [vmem:[%s6986_s2 + $0xf0] sm:$0xff]  ;;  %v948_v50 = vld [vmem:[%s6986_s2 + $0x88] sm:$0xff] }
 0x13a   :  { %996 = vmatpush1.msra.mxu0 %v991_v16  ;;  %1078 = vmatprep.subr.mxu1 %v994_v51  ;;  %v958_v14 = vld [vmem:[%s6986_s2 + $0xd8] sm:$0xff]  ;;  %v947_v51 = vld [vmem:[%s6986_s2 + $0x80] sm:$0xff] }
 0x13b   :  { %997 = vmatprep.subr.mxu0 %v988_v7  ;;  %3221 = vmatmul.mubr.msk.f32.vlgmr.msra.gmra.mxu1 %vm707_vm12, %v7384_v46  ;;  %v7386_v16 = vld [vmem:[#allocation41_spill] sm:$0xff]  ;;  %v957_v7 = vld [vmem:[%s6986_s2 + $0xd0] sm:$0xff]  ;;  %v944_v46 = vld [vmem:[%s6986_s2 + $0x68] sm:$0xff] }
 0x13c   :  { %998 = vmatpush1.msra.mxu0 %v987_v41  ;;  %1079 = vmatpush1.msra.mxu1 %v993_v3  ;;  %v954_v41 = vld [vmem:[%s6986_s2 + $0xb8] sm:$0xff]  ;;  %v943_v3 = vld [vmem:[%s6986_s2 + $0x60] sm:$0xff] }
 0x13d   :  { %999 = vmatprep.subr.mxu0 %v984_v24  ;;  %1080 = vmatprep.subr.mxu1 %v990_v49  ;;  %v953_v24 = vld [vmem:[%s6986_s2 + $0xb0] sm:$0xff] }
 0x13e   :  { %1000 = vmatpush1.msra.mxu0 %v983_v52  ;;  %1081 = vmatpush1.msra.mxu1 %v989_v59  ;;  %v7387_v49 = vld [vmem:[#allocation52_spill] sm:$0xff]  ;;  %v940_v52 = vld [vmem:[%s6986_s2 + $0x48] sm:$0xff]  ;;  %v950_v59 = vld [vmem:[%s6986_s2 + $0x98] sm:$0xff] }
 0x13f   :  { %1001 = vmatprep.subr.mxu0 %v980_v43  ;;  %1082 = vmatprep.subr.mxu1 %v986_v27  ;;  %v939_v43 = vld [vmem:[%s6986_s2 + $0x40] sm:$0xff]  ;;  %v949_v27 = vld [vmem:[%s6986_s2 + $0x90] sm:$0xff] }
 0x140   :  { %1002 = vmatpush1.msra.mxu0 %v979_v28  ;;  %1083 = vmatpush1.msra.mxu1 %v985_v1  ;;  %v936_v28 = vld [vmem:[%s6986_s2 + $0x28] sm:$0xff]  ;;  %v946_v1 = vld [vmem:[%s6986_s2 + $0x78] sm:$0xff] }
 0x141   :  { %1003 = vmatprep.subr.mxu0 %v976_v60  ;;  %1084 = vmatprep.subr.mxu1 %v982_v5  ;;  %v935_v60 = vld [vmem:[%s6986_s2 + $0x20] sm:$0xff]  ;;  %v945_v5 = vld [vmem:[%s6986_s2 + $0x70] sm:$0xff] }
 0x142   :  { %1004 = vmatpush1.msra.mxu0 %v975_v62  ;;  %1085 = vmatpush1.msra.mxu1 %v981_v34  ;;  %v932_v62 = vld [vmem:[%s6986_s2 + $0x8] sm:$0xff]  ;;  %v942_v34 = vld [vmem:[%s6986_s2 + $0x58] sm:$0xff] }
 0x143   :  { %1005 = vmatprep.subr.mxu0 %v972_v47  ;;  %1086 = vmatprep.subr.mxu1 %v978_v26  ;;  %v3345_v47 = vld [vmem:[%s6985_s5 + $0x8] sm:$0xff]  ;;  %v931_v26 = vld [vmem:[%s6986_s2] sm:$0xff] }
 0x144   :  { %1006 = vmatpush1.msra.mxu0 %v971_v55  ;;  %1087 = vmatpush1.msra.mxu1 %v977_v37  ;;  %v941_v55 = vld [vmem:[%s6986_s2 + $0x50] sm:$0xff]  ;;  %v928_v37 = vld [vmem:[%s6987_s1] sm:$0xff] }
 0x145   :  { %1007 = vmatprep.subr.mxu0 %v968_v61  ;;  %1088 = vmatprep.subr.mxu1 %v974_v53  ;;  %v938_v61 = vld [vmem:[%s6986_s2 + $0x38] sm:$0xff]  ;;  %v937_v53 = vld [vmem:[%s6986_s2 + $0x30] sm:$0xff] }
 0x146   :  { %1008 = vmatpush1.msra.mxu0 %v967_v30  ;;  %1089 = vmatpush1.msra.mxu1 %v973_v63  ;;  %v3346_v30 = vld [vmem:[%s6985_s5 + $0x10] sm:$0xff]  ;;  %v934_v63 = vld [vmem:[%s6986_s2 + $0x18] sm:$0xff] }
 0x147   :  { %1009 = vmatprep.subr.mxu0 %v964_v40  ;;  %1090 = vmatprep.subr.mxu1 %v970_v25  ;;  %v933_v40 = vld [vmem:[%s6986_s2 + $0x10] sm:$0xff]  ;;  %v929_v25 = vld [vmem:[%s6987_s1 + $0x8] sm:$0xff] }
 0x148   :  { %1010 = vmatpush1.msra.mxu0 %v963_v4  ;;  %1091 = vmatpush1.msra.mxu1 %v969_v2  ;;  %v930_v4 = vld [vmem:[%s6987_s1 + $0x10] sm:$0xff] }
 0x149   :  { %1011 = vmatprep.subr.mxu0 %v960_v31  ;;  %1092 = vmatprep.subr.mxu1 %v966_v21 }
 0x14a   :  { %1012 = vmatpush1.msra.mxu0 %v959_v9  ;;  %784 = vmatprep.mubr.f32.mxu0 %v7385_v44 }
 0x14b   :  { %1013 = vmatprep.subr.mxu0 %v956_v19  ;;  %1093 = vmatpush1.msra.mxu1 %v965_v48 }
 0x14c   :  { %1014 = vmatpush1.msra.mxu0 %v955_v39  ;;  %1094 = vmatprep.subr.mxu1 %v962_v56 }
 0x14d   :  { %3219 = vmatmul.mubr.msk.f32.gmra.mxu0 %vm707_vm12, %v7386_v16  ;;  %1015 = vmatprep.subr.mxu0 %v952_v15 }
 0x14e   :  { %1016 = vmatpush1.msra.mxu0 %v951_v58  ;;  %1095 = vmatpush1.msra.mxu1 %v961_v29 }
 0x14f   :  { %1017 = vmatprep.subr.mxu0 %v948_v50  ;;  %1096 = vmatprep.subr.mxu1 %v958_v14 }
 0x150   :  { %790 = vmatprep.mubr.f32.mxu0 %v7385_v44  ;;  %1018 = vmatpush1.msra.mxu0 %v947_v51 }
 0x151   :  { %1097 = vmatpush1.msra.mxu1 %v957_v7  ;;  %3220 = vmatmul.mubr.msk.f32.gmra.mxu0 %vm707_vm12, %v7387_v49 }
 0x152   :  { %1019 = vmatprep.subr.mxu0 %v944_v46  ;;  %1098 = vmatprep.subr.mxu1 %v954_v41 }
 0x153   :  { %1020 = vmatpush1.msra.mxu0 %v943_v3  ;;  %1099 = vmatpush1.msra.mxu1 %v953_v24 }
 0x154   :  { %1021 = vmatprep.subr.mxu0 %v940_v52  ;;  %1100 = vmatprep.subr.mxu1 %v950_v59 }
 0x155   :  { %867 = vmatprep.mubr.f32.mxu1 %v7385_v44  ;;  %1022 = vmatpush1.msra.mxu0 %v939_v43 }
 0x156   :  { %1101 = vmatpush1.msra.mxu1 %v949_v27  ;;  %1023 = vmatprep.subr.mxu0 %v936_v28  ;;  %v4700_v46 = vpop.permute.xlu1 %699  ;;  %v4728_v52 = vpop.permute.xlu0 %694 }
 0x157   :  { %3222 = vmatmul.mubr.msk.f32.gmra.mxu1 %vm707_vm12, %v3345_v47  ;;  %1102 = vmatprep.subr.mxu1 %v946_v1  ;;  %7400 = vst [vmem:[#allocation18_spill] sm:$0xff] %v4700_v46  ;;  %7403 = vst [vmem:[#allocation4_spill] sm:$0xff] %v4728_v52 }
 0x158   :  { %1024 = vmatpush1.msra.mxu0 %v935_v60  ;;  %1103 = vmatpush1.msra.mxu1 %v945_v5 }
 0x159   :  { %1025 = vmatprep.subr.mxu0 %v932_v62  ;;  %1104 = vmatprep.subr.mxu1 %v942_v34 }
 0x15a   :  { %873 = vmatprep.mubr.f32.mxu1 %v7385_v44  ;;  %1026 = vmatpush1.msra.mxu0 %v931_v26 }
 0x15b   :  { %1059 = vmatprep.mubr.f32.mxu0 %v7385_v44  ;;  %1105 = vmatpush1.msra.mxu1 %v941_v55 }
 0x15c   :  { %3223 = vmatmul.mubr.msk.f32.gmra.mxu1 %vm707_vm12, %v3346_v30  ;;  %1060 = vmatmul.mubr.f32.vlgmr.msra.gmra.mxu0 %v928_v37 }
 0x15d   :  { %1106 = vmatprep.subr.mxu1 %v938_v61  ;;  %1142 = vmatprep.mubr.f32.mxu1 %v7385_v44 }
 0x15e   :  { %1107 = vmatpush1.msra.mxu1 %v937_v53  ;;  %1065 = vmatprep.mubr.f32.mxu0 %v7385_v44 }
 0x15f   :  { %1108 = vmatprep.subr.mxu1 %v934_v63 }
 0x160   :  { %1109 = vmatpush1.msra.mxu1 %v933_v40  ;;  %1066 = vmatmul.mubr.f32.gmra.mxu0 %v929_v25  ;;  %v4710_v41 = vpop.permute.xlu1 %704 }
 0x161   :  { %1143 = vmatmul.mubr.f32.vlgmr.msra.gmra.mxu1 %v928_v37  ;;  %1071 = vmatprep.mubr.f32.mxu0 %v7385_v44  ;;  %7401 = vst [vmem:[#allocation21_spill] sm:$0xff] %v4710_v41  ;;  %v4740_v27 = vpop.permute.xlu0 %893 }
 0x162   :  { %1148 = vmatprep.mubr.f32.mxu1 %v7385_v44  ;;  %7405 = vst [vmem:[#allocation13_spill] sm:$0xff] %v4740_v27 }
 0x164   :  { %1072 = vmatmul.mubr.f32.gmra.mxu0 %v930_v4 }
 0x165   :  { %1149 = vmatmul.mubr.f32.gmra.mxu1 %v929_v25  ;;  %2026 = vmatprep.mubr.f32.mxu0 %v7385_v44  ;;  %v4720_v49 = vpop.permute.xlu1 %897 }
 0x166   :  { %1154 = vmatprep.mubr.f32.mxu1 %v7385_v44  ;;  %7402 = vst [vmem:[#allocation16_spill] sm:$0xff] %v4720_v49 }
 0x169   :  { %1155 = vmatmul.mubr.f32.gmra.mxu1 %v930_v4  ;;  %v4750_v60 = vpop.permute.xlu0 %1171 }
 0x16a   :  { %2109 = vmatprep.mubr.f32.mxu1 %v7385_v44  ;;  %v4732_v59 = vpop.permute.xlu1 %901 }
 0x16b   :  { %7404 = vst [vmem:[#allocation23_spill] sm:$0xff] %v4732_v59 }
 0x16e   :  { %v4758_v62 = vpop.permute.xlu0 %1245 }
 0x16f   :  { %v4738_v43 = vpop.permute.xlu1 %1176 }
 0x173   :  { %v4770_v47 = vpop.permute.xlu0 %1329 }
 0x174   :  { %v4748_v1 = vpop.permute.xlu1 %1181 }
 0x179   :  { %v4762_v34 = vpop.permute.xlu1 %1249  ;;  %v4778_v55 = vpop.permute.xlu0 %1421 }
 0x17a   :  { %7406 = vst [vmem:[#allocation12_spill] sm:$0xff] %v4762_v34  ;;  %7408 = vst [vmem:[#allocation22_spill] sm:$0xff] %v4778_v55 }
 0x17d   :  { %v4772_v26 = vpop.permute.xlu1 %1253  ;;  %v4790_v61 = vpop.permute.xlu0 %1417 }
 0x17e   :  { %7407 = vst [vmem:[#allocation49_spill] sm:$0xff] %v4772_v26  ;;  %7410 = vst [vmem:[#allocation24_spill] sm:$0xff] %v4790_v61 }
 0x183   :  { %v4782_v37 = vpop.permute.xlu1 %1333  ;;  %v4800_v63 = vpop.permute.xlu0 %1501 }
 0x184   :  { %7409 = vst [vmem:[#allocation48_spill] sm:$0xff] %v4782_v37  ;;  %7412 = vst [vmem:[#allocation39_spill] sm:$0xff] %v4800_v63 }
 0x187   :  { %v4792_v53 = vpop.permute.xlu1 %1337  ;;  %v4814_v4 = vpop.permute.xlu0 %1497 }
 0x188   :  { %7411 = vst [vmem:[#allocation50_spill] sm:$0xff] %v4792_v53 }
 0x18c   :  { %v4806_v25 = vpop.permute.xlu1 %1505 }
 0x18d   :  { %7413 = vst [vmem:[#allocation20_spill] sm:$0xff] %v4806_v25 }
 0x1f9   :  { %v4640_v2 = vpop.f32.mrf.mxu0 }
 0x1fa   :  { %7388 = vst [vmem:[#allocation6_spill] sm:$0xff] %v4640_v2 }
 0x1fb   :  { %v4642_v31 = vpop.f32.mrf.mxu0  ;;  %v4646_v9 = vpop.f32.mrf.mxu1 }
 0x1fc   :  { %7389 = vst [vmem:[#allocation5_spill] sm:$0xff] %v4642_v31  ;;  %7391 = vst [vmem:[#allocation7_spill] sm:$0xff] %v4646_v9 }
 0x1fd   :  { %v4650_v48 = vpop.f32.mrf.mxu1 }
 0x1fe   :  { %7393 = vst [vmem:[#allocation9_spill] sm:$0xff] %v4650_v48 }
 0x20d   :  { %v4644_v21 = vpop.f32.mrf.mxu0 }
 0x20e   :  { %7390 = vst [vmem:[#allocation8_spill] sm:$0xff] %v4644_v21 }
 0x20f   :  { %v4648_v19 = vpop.f32.mrf.mxu0 }
 0x210   :  { %7392 = vst [vmem:[#allocation10_spill] sm:$0xff] %v4648_v19 }
 0x211   :  { %v4652_v39 = vpop.f32.mrf.mxu0 }
 0x212   :  { %7394 = vst [vmem:[#allocation11_spill] sm:$0xff] %v4652_v39 }
 0x213   :  { %v4658_v58 = vpop.f32.mrf.mxu0 }
 0x214   :  { %7397 = vst [vmem:[#allocation15_spill] sm:$0xff] %v4658_v58  ;;  %v4824_v58 = vpop.permute.xlu0 %1581 }
 0x217   :  { %v4654_v56 = vpop.f32.mrf.mxu1 }
 0x218   :  { %7395 = vst [vmem:[#allocation14_spill] sm:$0xff] %v4654_v56  ;;  %v4834_v39 = vpop.permute.xlu0 %1673 }
 0x219   :  { %v4656_v15 = vpop.f32.mrf.mxu1  ;;  %7415 = vst [vmem:[#allocation3_spill] sm:$0xff] %v4834_v39 }
 0x21a   :  { %7396 = vst [vmem:[#allocation17_spill] sm:$0xff] %v4656_v15 }
 0x21c   :  { %v4660_v29 = vpop.f32.mrf.mxu1  ;;  %v4662_v50 = vpop.f32.mrf.mxu0 }
 0x21d   :  { %7398 = vst [vmem:[#allocation19_spill] sm:$0xff] %v4660_v29  ;;  %1448 = vrot.lane.b32.xlu1 %v4662_v50, %s3365_s19  ;;  %1196 = vrot.lane.b32.xlu0 %v4662_v50, %s3358_s25  ;;  %v4846_v15 = vpop.permute.xlu0 %1669 }
 0x21e   :  { %v4668_v14 = vpop.f32.mrf.mxu1  ;;  %v4680_v51 = vpop.f32.mrf.mxu0  ;;  %7417 = vst [vmem:[#allocation41_spill] sm:$0xff] %v4846_v15 }
 0x21f   :  { %7399 = vst [vmem:[#allocation2_spill] sm:$0xff] %v4668_v14  ;;  %v4816_v14 = vpop.permute.xlu1 %1413 }
 0x220   :  { %v4712_v3 = vpop.f32.mrf.mxu0 }
 0x221   :  { %v4670_v16 = vpop.f32.mrf.mxu1  ;;  %1532 = vrot.lane.b32.xlu1 %v4662_v50, %s3366_s20 }
 0x222   :  { %1208 = vrot.lane.b32.xlu0 %v4670_v16, %s3358_s25  ;;  %v4742_v28 = vpop.f32.mrf.mxu0 }
 0x223   :  { %v4686_v7 = vpop.f32.mrf.mxu1  ;;  %v4826_v59 = vpop.permute.xlu1 %1589 }
 0x224   :  { %v4794_v30 = vpop.f32.mrf.mxu0  ;;  %7414 = vst [vmem:[#allocation38_spill] sm:$0xff] %v4826_v59 }
 0x225   :  { %1544 = vrot.lane.b32.xlu1 %v4670_v16, %s3366_s20  ;;  %v4718_v24 = vpop.f32.mrf.mxu1 }
 0x226   :  { %1280 = vrot.lane.b32.xlu0 %v4662_v50, %s3361_s18  ;;  %v4842_v41 = vpop.f32.mrf.mxu0 }
 0x227   :  { %v4752_v5 = vpop.f32.mrf.mxu1  ;;  %v4836_v29 = vpop.permute.xlu1 %1585 }
 0x228   :  { %7416 = vst [vmem:[#allocation40_spill] sm:$0xff] %v4836_v29 }
 0x229   :  { %1202 = vrot.lane.b32.xlu1 %v4680_v51, %s3358_s25  ;;  %v4802_v40 = vpop.f32.mrf.mxu1 }
 0x22a   :  { %1292 = vrot.lane.b32.xlu0 %v4670_v16, %s3361_s18 }
 0x22b   :  { %v4848_v19 = vpop.permute.xlu1 %1757  ;;  %v4852_v56 = vpop.f32.mrf.mxu1 }
 0x22c   :  { %7418 = vst [vmem:[#allocation52_spill] sm:$0xff] %v4848_v19  ;;  %v7419_v19 = vmov 8  }
 0x22d   :  { %1214 = vrot.lane.b32.xlu1 %v4686_v7, %s3358_s25 }
 0x22e   :  { %1364 = vrot.lane.b32.xlu0 %v4662_v50, %s3363_s0 }
 0x231   :  { %1286 = vrot.lane.b32.xlu1 %v4680_v51, %s3361_s18 }
 0x232   :  { %1376 = vrot.lane.b32.xlu0 %v4670_v16, %s3363_s0 }
 0x235   :  { %1298 = vrot.lane.b32.xlu1 %v4686_v7, %s3361_s18 }
 0x236   :  { %1460 = vrot.lane.b32.xlu0 %v4670_v16, %s3365_s19 }
 0x239   :  { %1370 = vrot.lane.b32.xlu1 %v4680_v51, %s3363_s0 }
 0x23a   :  { %1538 = vrot.lane.b32.xlu0 %v4680_v51, %s3366_s20 }
 0x23d   :  { %1382 = vrot.lane.b32.xlu1 %v4686_v7, %s3363_s0 }
 0x23e   :  { %1550 = vrot.lane.b32.xlu0 %v4686_v7, %s3366_s20 }
 0x241   :  { %1454 = vrot.lane.b32.xlu1 %v4680_v51, %s3365_s19 }
 0x242   :  { %1450 = vrot.lane.b32.xlu0 %v4712_v3, %s3365_s19 }
 0x245   :  { %1466 = vrot.lane.b32.xlu1 %v4686_v7, %s3365_s19 }
 0x246   :  { %1462 = vrot.lane.b32.xlu0 %v4718_v24, %s3365_s19 }
 0x249   :  { %1198 = vrot.lane.b32.xlu1 %v4712_v3, %s3358_s25 }
 0x24a   :  { %1534 = vrot.lane.b32.xlu0 %v4712_v3, %s3366_s20 }
 0x24d   :  { %1210 = vrot.lane.b32.xlu1 %v4718_v24, %s3358_s25 }
 0x24e   :  { %1546 = vrot.lane.b32.xlu0 %v4718_v24, %s3366_s20 }
 0x251   :  { %1282 = vrot.lane.b32.xlu1 %v4712_v3, %s3361_s18 }
 0x252   :  { %1204 = vrot.lane.b32.xlu0 %v4742_v28, %s3358_s25 }
 0x255   :  { %1294 = vrot.lane.b32.xlu1 %v4718_v24, %s3361_s18 }
 0x256   :  { %1216 = vrot.lane.b32.xlu0 %v4752_v5, %s3358_s25 }
 0x259   :  { %1366 = vrot.lane.b32.xlu1 %v4712_v3, %s3363_s0 }
 0x25a   :  { %1288 = vrot.lane.b32.xlu0 %v4742_v28, %s3361_s18 }
 0x25d   :  { %1378 = vrot.lane.b32.xlu1 %v4718_v24, %s3363_s0 }
 0x25e   :  { %1300 = vrot.lane.b32.xlu0 %v4752_v5, %s3361_s18 }
 0x261   :  { %1618 = vrot.lane.b32.xlu1 %v4712_v3, %s3368_s21 }
 0x262   :  { %1372 = vrot.lane.b32.xlu0 %v4742_v28, %s3363_s0 }
 0x265   :  { %1630 = vrot.lane.b32.xlu1 %v4718_v24, %s3368_s21 }
 0x266   :  { %1384 = vrot.lane.b32.xlu0 %v4752_v5, %s3363_s0 }
 0x269   :  { %1456 = vrot.lane.b32.xlu1 %v4742_v28, %s3365_s19 }
 0x26a   :  { %1624 = vrot.lane.b32.xlu0 %v4742_v28, %s3368_s21 }
 0x26d   :  { %1468 = vrot.lane.b32.xlu1 %v4752_v5, %s3365_s19 }
 0x26e   :  { %1200 = vrot.lane.b32.xlu0 %v4794_v30, %s3358_s25 }
 0x271   :  { %1540 = vrot.lane.b32.xlu1 %v4742_v28, %s3366_s20 }
 0x272   :  { %1212 = vrot.lane.b32.xlu0 %v4802_v40, %s3358_s25 }
 0x275   :  { %1552 = vrot.lane.b32.xlu1 %v4752_v5, %s3366_s20 }
 0x276   :  { %1284 = vrot.lane.b32.xlu0 %v4794_v30, %s3361_s18 }
 0x279   :  { %1380 = vrot.lane.b32.xlu1 %v4802_v40, %s3363_s0 }
 0x27a   :  { %1296 = vrot.lane.b32.xlu0 %v4802_v40, %s3361_s18 }
 0x27d   :  { %1536 = vrot.lane.b32.xlu1 %v4794_v30, %s3366_s20 }
 0x27e   :  { %1368 = vrot.lane.b32.xlu0 %v4794_v30, %s3363_s0 }
 0x281   :  { %1548 = vrot.lane.b32.xlu1 %v4802_v40, %s3366_s20 }
 0x282   :  { %1452 = vrot.lane.b32.xlu0 %v4794_v30, %s3365_s19 }
 0x285   :  { %1620 = vrot.lane.b32.xlu1 %v4794_v30, %s3368_s21 }
 0x286   :  { %1464 = vrot.lane.b32.xlu0 %v4802_v40, %s3365_s19 }
 0x289   :  { %1206 = vrot.lane.b32.xlu1 %v4842_v41, %s3358_s25 }
 0x28a   :  { %1632 = vrot.lane.b32.xlu0 %v4802_v40, %s3368_s21 }
 0x28d   :  { %1218 = vrot.lane.b32.xlu1 %v4852_v56, %s3358_s25 }
 0x28e   :  { %1542 = vrot.lane.b32.xlu0 %v4842_v41, %s3366_s20 }
 0x28f   :  { %v4858_v49 = vpop.permute.xlu1 %1448  ;;  %v4860_v21 = vpop.permute.xlu0 %1196 }
 0x291   :  { %1290 = vrot.lane.b32.xlu1 %v4842_v41, %s3361_s18 }
 0x292   :  { %1554 = vrot.lane.b32.xlu0 %v4852_v56, %s3366_s20 }
 0x293   :  { %v4866_v46 = vpop.permute.xlu1 %1532 }
 0x294   :  { %v4868_v48 = vpop.permute.xlu0 %1208 }
 0x295   :  { %1302 = vrot.lane.b32.xlu1 %v4852_v56, %s3361_s18 }
 0x296   :  { %1636 = vrot.lane.b32.xlu0 %v4752_v5, %s3368_s21 }
 0x297   :  { %v4874_v31 = vpop.permute.xlu1 %1544 }
 0x298   :  { %v4876_v9 = vpop.permute.xlu0 %1280 }
 0x299   :  { %1374 = vrot.lane.b32.xlu1 %v4842_v41, %s3363_s0 }
 0x29a   :  { %1704 = vrot.lane.b32.xlu0 %v4794_v30, %s3371_s22 }
 0x29b   :  { %v4882_v27 = vpop.permute.xlu1 %1202 }
 0x29c   :  { %v4884_v2 = vpop.permute.xlu0 %1292 }
 0x29d   :  { %1386 = vrot.lane.b32.xlu1 %v4852_v56, %s3363_s0 }
 0x29e   :  { %1716 = vrot.lane.b32.xlu0 %v4802_v40, %s3371_s22 }
 0x29f   :  { %v4890_v52 = vpop.permute.xlu1 %1214 }
 0x2a0   :  { %v4892_v44 = vpop.permute.xlu0 %1364 }
 0x2a1   :  { %1458 = vrot.lane.b32.xlu1 %v4842_v41, %s3365_s19 }
 0x2a2   :  { %1753 = vperm.xlu0 %3305, %v4899_v18  }
 0x2a3   :  { %v4902_v38 = vpop.permute.xlu1 %1286 }
 0x2a4   :  { %v4904_v6 = vpop.permute.xlu0 %1376 }
 0x2a5   :  { %1470 = vrot.lane.b32.xlu1 %v4852_v56, %s3365_s19 }
 0x2a6   :  { %1622 = vrot.lane.b32.xlu0 %v4680_v51, %s3368_s21 }
 0x2a7   :  { %v4910_v32 = vpop.permute.xlu1 %1298  ;;  %3308 = vset.pattern.permute.xlu0 %v7419_v19 }
 0x2a8   :  { %v4913_v12 = vpop.permute.xlu0 %1460 }
 0x2a9   :  { %1626 = vrot.lane.b32.xlu1 %v4842_v41, %s3368_s21 }
 0x2aa   :  { %1634 = vrot.lane.b32.xlu0 %v4686_v7, %s3368_s21 }
 0x2ab   :  { %v4919_v45 = vpop.permute.xlu1 %1370 }
 0x2ac   :  { %v4921_v10 = vpop.permute.xlu0 %1538 }
 0x2ad   :  { %1638 = vrot.lane.b32.xlu1 %v4852_v56, %s3368_s21 }
 0x2ae   :  { %1708 = vrot.lane.b32.xlu0 %v4742_v28, %s3371_s22 }
 0x2af   :  { %v4927_v0 = vpop.permute.xlu1 %1382 }
 0x2b0   :  { %v4929_v39 = vpop.permute.xlu0 %1550 }
 0x2b1   :  { %1665 = vperm.xlu1 %3304, %v4934_v13  }
 0x2b2   :  { %1720 = vrot.lane.b32.xlu0 %v4752_v5, %s3371_s22 }
 0x2b3   :  { %v4939_v35 = vpop.permute.xlu1 %1454 }
 0x2b4   :  { %v4941_v25 = vpop.permute.xlu0 %1450 }
 0x2b5   :  { %7420 = vst [vmem:[#allocation64_spill] sm:$0xff] %v4941_v25  ;;  %1710 = vrot.lane.b32.xlu1 %v4842_v41, %s3371_s22 }
 0x2b6   :  { %1788 = vrot.lane.b32.xlu0 %v4794_v30, %s3372_s23  ;;  %3306 = vset.pattern.permute.xlu1 %v7419_v19 }
 0x2b7   :  { %v4948_v55 = vpop.permute.xlu1 %1466 }
 0x2b8   :  { %v4950_v53 = vpop.permute.xlu0 %1462 }
 0x2b9   :  { %7421 = vst [vmem:[#allocation65_spill] sm:$0xff] %v4950_v53  ;;  %1722 = vrot.lane.b32.xlu1 %v4852_v56, %s3371_s22 }
 0x2ba   :  { %1800 = vrot.lane.b32.xlu0 %v4802_v40, %s3372_s23 }
 0x2bb   :  { %v4956_v20 = vpop.permute.xlu1 %1198 }
 0x2bc   :  { %v4958_v59 = vpop.permute.xlu0 %1534 }
 0x2bd   :  { %7422 = vst [vmem:[#allocation66_spill] sm:$0xff] %v4958_v59  ;;  %1841 = vperm.xlu1 %3306, %v3349_v23   ;;  %v7431_v59 = vmov 9  }
 0x2be   :  { %1837 = vperm.xlu0 %3308, %v4899_v18  }
 0x2bf   :  { %v4964_v19 = vpop.permute.xlu1 %1210 }
 0x2c0   :  { %v4966_v26 = vpop.permute.xlu0 %1546 }
 0x2c1   :  { %7423 = vst [vmem:[#allocation67_spill] sm:$0xff] %v4966_v26  ;;  %1616 = vrot.lane.b32.xlu1 %v4662_v50, %s3368_s21 }
 0x2c2   :  { %1712 = vrot.lane.b32.xlu0 %v4670_v16, %s3371_s22  ;;  %3307 = vset.pattern.permute.xlu1 %v7377_v54 }
 0x2c3   :  { %v4973_v15 = vpop.permute.xlu1 %1282 }
 0x2c4   :  { %7424 = vst [vmem:[#allocation68_spill] sm:$0xff] %v4973_v15  ;;  %v4975_v11 = vpop.permute.xlu0 %1204  ;;  %v7469_v15 = vld [vmem:[#allocation29_spill] sm:$0xff] }
 0x2c5   :  { %1628 = vrot.lane.b32.xlu1 %v4670_v16, %s3368_s21 }
 0x2c6   :  { %1786 = vrot.lane.b32.xlu0 %v4712_v3, %s3372_s23 }
 0x2c7   :  { %v4981_v29 = vpop.permute.xlu1 %1294 }
 0x2c8   :  { %7425 = vst [vmem:[#allocation69_spill] sm:$0xff] %v4981_v29  ;;  %v4983_v36 = vpop.permute.xlu0 %1216  ;;  %v5129_v29 = vmul.f32 %v4738_v43, %v4712_v3 }
 0x2c9   :  { %1702 = vrot.lane.b32.xlu1 %v4712_v3, %s3371_s22  ;;  %v1307_v3 = vsel %vm149_vm1, %v4902_v38, %v4884_v2 }
 0x2ca   :  { %1798 = vrot.lane.b32.xlu0 %v4718_v24, %s3372_s23  ;;  %7466 = vst [vmem:[#allocation105_spill] sm:$0xff] %v5129_v29 }
 0x2cb   :  { %v4989_v54 = vpop.permute.xlu1 %1366 }
 0x2cc   :  { %7426 = vst [vmem:[#allocation70_spill] sm:$0xff] %v4989_v54  ;;  %v4991_v63 = vpop.permute.xlu0 %1288  ;;  %v7437_v54 = vmov 10  }
 0x2cd   :  { %7427 = vst [vmem:[#allocation71_spill] sm:$0xff] %v4991_v63  ;;  %1714 = vrot.lane.b32.xlu1 %v4718_v24, %s3371_s22 }
 0x2ce   :  { %1833 = vperm.xlu0 %3308, %v4934_v13  }
 0x2cf   :  { %v4996_v8 = vpop.permute.xlu1 %1378 }
 0x2d0   :  { %7428 = vst [vmem:[#allocation72_spill] sm:$0xff] %v4996_v8  ;;  %v4998_v26 = vpop.permute.xlu0 %1300 }
 0x2d1   :  { %7429 = vst [vmem:[#allocation73_spill] sm:$0xff] %v4998_v26  ;;  %1749 = vperm.xlu1 %3307, %v4934_v13  }
 0x2d2   :  { %1784 = vrot.lane.b32.xlu0 %v4662_v50, %s3372_s23 }
 0x2d3   :  { %v5003_v53 = vpop.permute.xlu1 %1618  ;;  %3310 = vset.pattern.permute.xlu0 %v7431_v59 }
 0x2d4   :  { %7430 = vst [vmem:[#allocation74_spill] sm:$0xff] %v5003_v53  ;;  %v5006_v61 = vpop.permute.xlu0 %1372 }
 0x2d5   :  { %7432 = vst [vmem:[#allocation75_spill] sm:$0xff] %v5006_v61  ;;  %1794 = vrot.lane.b32.xlu1 %v4842_v41, %s3372_s23 }
 0x2d6   :  { %1796 = vrot.lane.b32.xlu0 %v4670_v16, %s3372_s23  ;;  %3309 = vset.pattern.permute.xlu1 %v7431_v59 }
 0x2d7   :  { %v5012_v25 = vpop.permute.xlu1 %1630 }
 0x2d8   :  { %7433 = vst [vmem:[#allocation76_spill] sm:$0xff] %v5012_v25  ;;  %v5015_v37 = vpop.permute.xlu0 %1384 }
 0x2d9   :  { %7434 = vst [vmem:[#allocation77_spill] sm:$0xff] %v5015_v37  ;;  %1806 = vrot.lane.b32.xlu1 %v4852_v56, %s3372_s23 }
 0x2da   :  { %1873 = vperm.xlu0 %3310, %v4899_v18  }
 0x2db   :  { %v5020_v53 = vpop.permute.xlu1 %1456 }
 0x2dc   :  { %7435 = vst [vmem:[#allocation78_spill] sm:$0xff] %v5020_v53  ;;  %v5022_v8 = vpop.permute.xlu0 %1624 }
 0x2dd   :  { %7436 = vst [vmem:[#allocation79_spill] sm:$0xff] %v5022_v8  ;;  %1700 = vrot.lane.b32.xlu1 %v4662_v50, %s3371_s22 }
 0x2de   :  { %3313 = vset.pattern.permute.xlu0 %v7437_v54 }
 0x2df   :  { %v5027_v61 = vpop.permute.xlu1 %1468  ;;  %1909 = vperm.xlu0 %3313, %v4899_v18  }
 0x2e0   :  { %7438 = vst [vmem:[#allocation80_spill] sm:$0xff] %v5027_v61  ;;  %v5030_v25 = vpop.permute.xlu0 %1200 }
 0x2e1   :  { %7439 = vst [vmem:[#allocation81_spill] sm:$0xff] %v5030_v25  ;;  %1706 = vrot.lane.b32.xlu1 %v4680_v51, %s3371_s22 }
 0x2e3   :  { %v5034_v37 = vpop.permute.xlu1 %1540 }
 0x2e4   :  { %7440 = vst [vmem:[#allocation82_spill] sm:$0xff] %v5034_v37  ;;  %v5036_v34 = vpop.permute.xlu0 %1212 }
 0x2e5   :  { %7441 = vst [vmem:[#allocation83_spill] sm:$0xff] %v5036_v34  ;;  %1718 = vrot.lane.b32.xlu1 %v4686_v7, %s3371_s22 }
 0x2e7   :  { %v5040_v8 = vpop.permute.xlu1 %1552 }
 0x2e8   :  { %7442 = vst [vmem:[#allocation84_spill] sm:$0xff] %v5040_v8  ;;  %v5042_v53 = vpop.permute.xlu0 %1284 }
 0x2e9   :  { %7443 = vst [vmem:[#allocation85_spill] sm:$0xff] %v5042_v53  ;;  %1792 = vrot.lane.b32.xlu1 %v4742_v28, %s3372_s23 }
 0x2eb   :  { %v5046_v18 = vpop.permute.xlu1 %1380 }
 0x2ec   :  { %7444 = vst [vmem:[#allocation86_spill] sm:$0xff] %v5046_v18  ;;  %v5048_v25 = vpop.permute.xlu0 %1296 }
 0x2ed   :  { %7445 = vst [vmem:[#allocation87_spill] sm:$0xff] %v5048_v25  ;;  %1804 = vrot.lane.b32.xlu1 %v4752_v5, %s3372_s23 }
 0x2ef   :  { %v5052_v37 = vpop.permute.xlu1 %1536 }
 0x2f0   :  { %7446 = vst [vmem:[#allocation88_spill] sm:$0xff] %v5052_v37  ;;  %v5054_v34 = vpop.permute.xlu0 %1368 }
 0x2f1   :  { %7447 = vst [vmem:[#allocation89_spill] sm:$0xff] %v5054_v34  ;;  %1877 = vperm.xlu1 %3309, %v3349_v23  }
 0x2f3   :  { %v5056_v61 = vpop.permute.xlu1 %1548 }
 0x2f4   :  { %7448 = vst [vmem:[#allocation90_spill] sm:$0xff] %v5056_v61  ;;  %v5058_v8 = vpop.permute.xlu0 %1452 }
 0x2f5   :  { %7449 = vst [vmem:[#allocation91_spill] sm:$0xff] %v5058_v8  ;;  %1790 = vrot.lane.b32.xlu1 %v4680_v51, %s3372_s23 }
 0x2f6   :  { %3311 = vset.pattern.permute.xlu1 %v7437_v54 }
 0x2f7   :  { %v5063_v18 = vpop.permute.xlu1 %1620 }
 0x2f8   :  { %7450 = vst [vmem:[#allocation92_spill] sm:$0xff] %v5063_v18  ;;  %v5065_v25 = vpop.permute.xlu0 %1464 }
 0x2f9   :  { %7451 = vst [vmem:[#allocation93_spill] sm:$0xff] %v5065_v25  ;;  %1802 = vrot.lane.b32.xlu1 %v4686_v7, %s3372_s23 }
 0x2fb   :  { %v5069_v53 = vpop.permute.xlu1 %1206 }
 0x2fc   :  { %7452 = vst [vmem:[#allocation94_spill] sm:$0xff] %v5069_v53  ;;  %v5071_v34 = vpop.permute.xlu0 %1632  ;;  %v7465_v53 = vld [vmem:[#allocation27_spill] sm:$0xff] }
 0x2fd   :  { %7453 = vst [vmem:[#allocation95_spill] sm:$0xff] %v5071_v34  ;;  %1913 = vperm.xlu1 %3311, %v3349_v23  }
 0x2ff   :  { %v5073_v61 = vpop.permute.xlu1 %1218 }
 0x300   :  { %7454 = vst [vmem:[#allocation96_spill] sm:$0xff] %v5073_v61  ;;  %v5075_v8 = vpop.permute.xlu0 %1542  ;;  %v1184_v61 = vmul.f32 %v4750_v60, %v4662_v50  ;;  %v1310_v50 = vsel %vm149_vm1, %v4876_v9, %v4902_v38  ;;  %v5162_v38 = vmul.f32 %v4738_v43, %v4742_v28  ;;  %v7470_v28 = vld [vmem:[#allocation30_spill] sm:$0xff] }
 0x301   :  { %7455 = vst [vmem:[#allocation97_spill] sm:$0xff] %v5075_v8  ;;  %3312 = vset.pattern.permute.xlu1 %v7431_v59  ;;  %v1226_v59 = vsel %vm76_vm0, %v4860_v21, %v4882_v27  ;;  %v1317_v63 = vmul.f32 %v1310_v50, %v7469_v15  ;;  %v5186_v50 = vmul.f32 %v4748_v1, %v4802_v40  ;;  %v7475_v40 = vld [vmem:[#allocation32_spill] sm:$0xff] }
 0x302   :  { %1869 = vperm.xlu1 %3312, %v4934_v13  }
 0x303   :  { %v5079_v37 = vpop.permute.xlu1 %1290 }
 0x304   :  { %7456 = vst [vmem:[#allocation98_spill] sm:$0xff] %v5079_v37  ;;  %v5082_v18 = vpop.permute.xlu0 %1554  ;;  %v3229_v37 = vld [vmem:[%s6985_s5 + $0x28] sm:$0xff] }
 0x305   :  { %7457 = vst [vmem:[#allocation99_spill] sm:$0xff] %v5082_v18  ;;  %v7462_v18 = vld [vmem:[#allocation25_spill] sm:$0xff] }
 0x306   :  { %3314 = vset.pattern.permute.xlu1 %v7437_v54  ;;  %v1223_v54 = vsel %vm76_vm0, %v4882_v27, %v4868_v48 }
 0x307   :  { %1905 = vperm.xlu1 %3314, %v4934_v13   ;;  %v5085_v25 = vpop.permute.xlu1 %1302  ;;  %v1229_v13 = vsel %vm76_vm0, %v4890_v52, %v4860_v21  ;;  %v7464_v21 = vld [vmem:[#allocation26_spill] sm:$0xff] }
 0x308   :  { %7458 = vst [vmem:[#allocation100_spill] sm:$0xff] %v5085_v25  ;;  %v5089_v23 = vpop.permute.xlu0 %1636  ;;  %v1234_v25 = vmul.f32 %v1223_v54, %v7464_v21  ;;  %v1232_v26 = vmul.f32 %v1229_v13, %v7465_v53  ;;  %v1185_v54 = vmul.f32 %v4750_v60, %v4680_v51  ;;  %v5155_v13 = vmul.f32 %v4748_v1, %v4794_v30 }
 0x309   :  { %7460 = vst [vmem:[#allocation102_spill] sm:$0xff] %v5089_v23  ;;  %v5108_v23 = vld [vmem:[%s6985_s5 + $0x18] sm:$0xff]  ;;  %v7180_v53 = vmov 25   ;;  %v1318_v30 = vmul.f32 %v1307_v3, %v7470_v28 }
 0x30b   :  { %v5087_v34 = vpop.permute.xlu1 %1374 }
 0x30c   :  { %7459 = vst [vmem:[#allocation101_spill] sm:$0xff] %v5087_v34  ;;  %v7174_v34 = vmov 24   ;;  %v5117_v27 = vpop.permute.xlu0 %1704 }
 0x30d   :  { %3315 = vset.pattern.permute.xlu1 %v7174_v34  ;;  %3316 = vset.pattern.permute.xlu0 %v7174_v34  ;;  %7463 = vst [vmem:[#allocation104_spill] sm:$0xff] %v5117_v27  ;;  %v1186_v34 = vmul.f32 %v4750_v60, %v4670_v16  ;;  %v1313_v16 = vsel %vm149_vm1, %v4910_v32, %v4876_v9  ;;  %v7468_v27 = vld [vmem:[#allocation28_spill] sm:$0xff] }
 0x30e   :  { %1942 = vperm.xlu1 %3315, %v5108_v23   ;;  %1952 = vperm.xlu0 %3316, %v3229_v37   ;;  %v1258_v9 = vmul.f32 %v4758_v62, %v1234_v25  ;;  %v5180_v25 = vmul.f32 %v4748_v1, %v4842_v41  ;;  %v5200_v41 = vld [vmem:[%s6982_s4 + $0x38] sm:$0xff] }
 0x30f   :  { %v5095_v8 = vpop.permute.xlu1 %1386 }
 0x310   :  { %7461 = vst [vmem:[#allocation103_spill] sm:$0xff] %v5095_v8  ;;  %v1233_v8 = vmul.f32 %v1226_v59, %v7462_v18  ;;  %v1220_v59 = vsel %vm76_vm0, %v4868_v48, %v4890_v52  ;;  %v3228_v48 = vld [vmem:[%s6985_s5 + $0x20] sm:$0xff] }
 0x311   :  { %v1235_v29 = vmul.f32 %v1220_v59, %v7468_v27  ;;  %v7471_v59 = vld [vmem:[#allocation31_spill] sm:$0xff] }
 0x312   :  { %v1257_v52 = vmul.f32 %v4758_v62, %v1233_v8  ;;  %1947 = vperm.xlu1 %3315, %v3228_v48   ;;  %v1187_v8 = vmul.f32 %v4750_v60, %v4686_v7  ;;  %3318 = vset.pattern.permute.xlu0 %v7180_v53  ;;  %v1304_v7 = vsel %vm149_vm1, %v4884_v2, %v4910_v32 }
 0x313   :  { %v5151_v51 = vpop.permute.xlu1 %1458  ;;  %2145 = vperm.xlu0 %3318, %v3228_v48   ;;  %v5174_v60 = vmul.f32 %v4738_v43, %v4718_v24  ;;  %v1316_v53 = vmul.f32 %v1313_v16, %v7471_v59  ;;  %v5190_v32 = vmul.f32 %v4748_v1, %v4852_v56  ;;  %v5194_v24 = vmul.f32 %v4738_v43, %v4752_v5 }
 0x314   :  { %7467 = vst [vmem:[#allocation106_spill] sm:$0xff] %v5151_v51  ;;  %v1256_v51 = vmul.f32 %v4758_v62, %v1232_v26  ;;  %v5182_v26 = vpop.permute.xlu0 %1716  ;;  %v1269_v2 = vadd.f32 %v1257_v52, %v1185_v54  ;;  %v7474_v48 = vmov 25   ;;  %v1259_v3 = vmul.f32 %v4758_v62, %v1235_v29 }
 0x315   :  { %7472 = vst [vmem:[#allocation107_spill] sm:$0xff] %v5182_v26  ;;  %7473 = vst [vmem:[#allocation108_spill] sm:$0xff] %v5190_v32  ;;  %v1319_v16 = vmul.f32 %v1304_v7, %v7475_v40  ;;  %v1391_v56 = vsel %vm222_vm2, %v4919_v45, %v4904_v6  ;;  %v1394_v43 = vsel %vm222_vm2, %v4892_v44, %v4919_v45  ;;  %v7477_v52 = vmov 4   ;;  %v7481_v32 = vld [vmem:[#allocation35_spill] sm:$0xff] }
 0x316   :  { %3317 = vset.pattern.permute.xlu1 %v7474_v48  ;;  %v1270_v1 = vadd.f32 %v1258_v9, %v1186_v34  ;;  %v1268_v5 = vadd.f32 %v1256_v51, %v1184_v61  ;;  %v1341_v54 = vmul.f32 %v4770_v47, %v1317_v63  ;;  %v1562_v29 = vsel %vm368_vm4, %v4866_v46, %v4921_v10  ;;  %v7479_v61 = vld [vmem:[#allocation33_spill] sm:$0xff]  ;;  %v7480_v51 = vld [vmem:[#allocation34_spill] sm:$0xff] }
 0x317   :  { %2149 = vperm.xlu1 %3317, %v3229_v37   ;;  %v5217_v62 = vpop.permute.xlu1 %1470  ;;  %3320 = vset.pattern.permute.xlu0 %v7477_v52  ;;  %v1342_v7 = vmul.f32 %v4770_v47, %v1318_v30  ;;  %v1340_v48 = vmul.f32 %v4770_v47, %v1316_v53  ;;  %v1559_v45 = vsel %vm368_vm4, %v4921_v10, %v4874_v31 }
 0x318   :  { %7476 = vst [vmem:[#allocation109_spill] sm:$0xff] %v5217_v62  ;;  %v1397_v34 = vsel %vm222_vm2, %v4927_v0, %v4892_v44  ;;  %2203 = vperm.xlu0 %3320, %v5200_v41   ;;  %v1401_v63 = vmul.f32 %v1394_v43, %v7479_v61  ;;  %v1402_v9 = vmul.f32 %v1391_v56, %v7480_v51 }
 0x319   :  { %v1475_v53 = vsel %vm295_vm3, %v4939_v35, %v4913_v12  ;;  %v1478_v10 = vsel %vm295_vm3, %v4858_v49, %v4939_v35  ;;  %v1271_v30 = vadd.f32 %v1259_v3, %v1187_v8  ;;  %v1343_v44 = vmul.f32 %v4770_v47, %v1319_v16  ;;  %v7482_v3 = vld [vmem:[#allocation42_spill] sm:$0xff]  ;;  %v7483_v16 = vld [vmem:[#allocation43_spill] sm:$0xff] }
 0x31a   :  { %v1556_v56 = vsel %vm368_vm4, %v4874_v31, %v4929_v39  ;;  %v1353_v43 = vadd.f32 %v1341_v54, %v1269_v2  ;;  %v1569_v26 = vmul.f32 %v1559_v45, %v7360_v42  ;;  %v1400_v62 = vmul.f32 %v1397_v34, %v7481_v32  ;;  %v5267_v54 = vld [vmem:[%s6982_s4 + $0x30] sm:$0xff] }
 0x31b   :  { %2141 = vperm.xlu1 %3317, %v5108_v23   ;;  %v1481_v35 = vsel %vm295_vm3, %v4948_v55, %v4858_v49  ;;  %v1354_v47 = vadd.f32 %v1342_v7, %v1270_v1  ;;  %v1388_v8 = vsel %vm222_vm2, %v4904_v6, %v4927_v0  ;;  %v1485_v31 = vmul.f32 %v1478_v10, %v7482_v3  ;;  %v5273_v6 = vpop.permute.xlu1 %1626 }
 0x31c   :  { %v1486_v23 = vmul.f32 %v1475_v53, %v7483_v16  ;;  %v1352_v49 = vadd.f32 %v1340_v48, %v1268_v5  ;;  %v1425_v1 = vmul.f32 %v4816_v14, %v1401_v63  ;;  %v1426_v7 = vmul.f32 %v4816_v14, %v1402_v9  ;;  %7486 = vst [vmem:[#allocation112_spill] sm:$0xff] %v5273_v6  ;;  %v7487_v48 = vld [vmem:[#allocation37_spill] sm:$0xff]  ;;  %v7488_v9 = vld [vmem:[#allocation36_spill] sm:$0xff] }
 0x31d   :  { %v5230_v37 = vpop.permute.xlu0 %1753  ;;  %v1570_v0 = vmul.f32 %v1556_v56, %v7361_v22  ;;  %v1355_v45 = vadd.f32 %v1343_v44, %v1271_v30  ;;  %v1565_v53 = vsel %vm368_vm4, %v4929_v39, %v4866_v46  ;;  %v1484_v5 = vmul.f32 %v1481_v35, %v7487_v48 }
 0x31e   :  { %7478 = vst [vmem:[#allocation110_spill] sm:$0xff] %v5230_v37  ;;  %v1568_v37 = vmul.f32 %v1562_v29, %v7359_v57  ;;  %v7485_v29 = vmov 0   ;;  %v1593_v63 = vmul.f32 %v4824_v58, %v1569_v26  ;;  %v1403_v10 = vmul.f32 %v1388_v8, %v7488_v9 }
 0x31f   :  { %3322 = vset.pattern.permute.xlu0 %v7485_v29  ;;  %3319 = vset.pattern.permute.xlu1 %v7477_v52  ;;  %v1424_v56 = vmul.f32 %v4816_v14, %v1400_v62  ;;  %v1509_v30 = vmul.f32 %v4814_v4, %v1485_v31  ;;  %v1510_v39 = vmul.f32 %v4814_v4, %v1486_v23  ;;  %v7490_v8 = vmov 1   ;;  %v7491_v31 = vld [vmem:[#allocation44_spill] sm:$0xff] }
 0x320   :  { %2276 = vperm.xlu0 %3322, %v5200_v41   ;;  %v5277_v34 = vmul.f32 %v4824_v58, %v1568_v37  ;;  %v1472_v37 = vsel %vm295_vm3, %v4913_v12, %v4948_v55  ;;  %2198 = vperm.xlu1 %3319, %v5267_v54   ;;  %v1224_v46 = vsel %vm76_vm0, %v4975_v11, %v4964_v19  ;;  %v5306_v12 = vld [vmem:[%s6982_s4 + $0x40] sm:$0xff] }
 0x321   :  { %v5262_v2 = vpop.permute.xlu0 %1622  ;;  %v1227_v26 = vsel %vm76_vm0, %v4956_v20, %v4975_v11  ;;  %v1437_v55 = vadd.f32 %v1425_v1, %v1353_v43  ;;  %v1438_v62 = vadd.f32 %v1426_v7, %v1354_v47  ;;  %v1571_v52 = vmul.f32 %v1565_v53, %v7365_v33  ;;  %v7493_v53 = vld [vmem:[#allocation68_spill] sm:$0xff] }
 0x322   :  { %7484 = vst [vmem:[#allocation111_spill] sm:$0xff] %v5262_v2  ;;  %v1594_v44 = vmul.f32 %v4824_v58, %v1570_v0  ;;  %v1487_v23 = vmul.f32 %v1472_v37, %v7491_v31  ;;  %v1508_v2 = vmul.f32 %v4814_v4, %v1484_v5  ;;  %v1221_v11 = vsel %vm76_vm0, %v4964_v19, %v4983_v36  ;;  %v7492_v0 = vld [vmem:[#allocation71_spill] sm:$0xff]  ;;  %v5331_v37 = vpop.permute.xlu1 %1638 }
 0x323   :  { %v1230_v43 = vsel %vm76_vm0, %v4983_v36, %v4956_v20  ;;  %v1427_v47 = vmul.f32 %v4816_v14, %v1403_v10  ;;  %v1237_v1 = vmul.f32 %v1227_v26, %v7462_v18  ;;  %v1238_v7 = vmul.f32 %v1224_v46, %v7464_v21  ;;  %7494 = vst [vmem:[#allocation71_spill] sm:$0xff] %v5331_v37  ;;  %v7495_v36 = vld [vmem:[#allocation69_spill] sm:$0xff]  ;;  %v7496_v10 = vld [vmem:[#allocation27_spill] sm:$0xff]  ;;  %v7500_v37 = vld [vmem:[#allocation70_spill] sm:$0xff] }
 0x324   :  { %3323 = vset.pattern.permute.xlu0 %v7490_v8  ;;  %v1311_v5 = vsel %vm149_vm1, %v7493_v53, %v7492_v0  ;;  %2208 = vperm.xlu1 %3319, %v5306_v12   ;;  %v1436_v19 = vadd.f32 %v1424_v56, %v1352_v49  ;;  %v1521_v8 = vadd.f32 %v1509_v30, %v1437_v55 }
 0x325   :  { %v5310_v35 = vpop.permute.xlu0 %1634  ;;  %2364 = vperm.xlu0 %3323, %v5306_v12   ;;  %v1522_v20 = vadd.f32 %v1510_v39, %v1438_v62  ;;  %v1308_v14 = vsel %vm149_vm1, %v7492_v0, %v7495_v36  ;;  %v1236_v26 = vmul.f32 %v1230_v43, %v7496_v10  ;;  %v1239_v46 = vmul.f32 %v1221_v11, %v7468_v27  ;;  %v7498_v62 = vld [vmem:[#allocation12_spill] sm:$0xff] }
 0x326   :  { %7489 = vst [vmem:[#allocation113_spill] sm:$0xff] %v5310_v35  ;;  %v7497_v35 = vld [vmem:[#allocation73_spill] sm:$0xff]  ;;  %v5349_v56 = vmul.f32 %v4824_v58, %v1571_v52  ;;  %v1511_v30 = vmul.f32 %v4814_v4, %v1487_v23  ;;  %v1520_v39 = vadd.f32 %v1508_v2, %v1436_v19  ;;  %v1321_v55 = vmul.f32 %v1311_v5, %v7469_v15  ;;  %v7504_v5 = vld [vmem:[#allocation72_spill] sm:$0xff] }
 0x327   :  { %v1305_v6 = vsel %vm149_vm1, %v7495_v36, %v7497_v35  ;;  %v1314_v49 = vsel %vm149_vm1, %v7497_v35, %v7493_v53  ;;  %v1261_v11 = vmul.f32 %v7498_v62, %v1237_v1  ;;  %v1262_v43 = vmul.f32 %v7498_v62, %v1238_v7  ;;  %v7499_v36 = vld [vmem:[#allocation75_spill] sm:$0xff] }
 0x328   :  { %v1322_v0 = vmul.f32 %v1308_v14, %v7470_v28  ;;  %v1395_v35 = vsel %vm222_vm2, %v7500_v37, %v7499_v36  ;;  %3321 = vset.pattern.permute.xlu1 %v7485_v29  ;;  %v1439_v4 = vadd.f32 %v1427_v47, %v1355_v45  ;;  %v1320_v2 = vmul.f32 %v1314_v49, %v7471_v59  ;;  %v7506_v45 = vld [vmem:[#allocation48_spill] sm:$0xff] }
 0x329   :  { %2360 = vperm.xlu0 %3323, %v5200_v41   ;;  %v5361_v58 = vpop.permute.xlu0 %1708  ;;  %v1323_v23 = vmul.f32 %v1305_v6, %v7475_v40  ;;  %v5368_v1 = vadd.f32 %v1593_v63, %v1521_v8  ;;  %2272 = vperm.xlu1 %3321, %v5267_v54   ;;  %v1260_v7 = vmul.f32 %v7498_v62, %v1236_v26  ;;  %v7507_v63 = vld [vmem:[#allocation77_spill] sm:$0xff] }
 0x32a   :  { %7501 = vst [vmem:[#allocation68_spill] sm:$0xff] %v5361_v58  ;;  %v1263_v53 = vmul.f32 %v7498_v62, %v1239_v46  ;;  %v1392_v19 = vsel %vm222_vm2, %v7499_v36, %v7504_v5  ;;  %v5377_v14 = vadd.f32 %v1594_v44, %v1522_v20  ;;  %v5379_v29 = vadd.f32 %v1511_v30, %v1439_v4  ;;  %v7511_v36 = vld [vmem:[#allocation80_spill] sm:$0xff] }
 0x32b   :  { %7503 = vst [vmem:[#allocation73_spill] sm:$0xff] %v5368_v1  ;;  %v1345_v47 = vmul.f32 %v7506_v45, %v1321_v55  ;;  %v1405_v6 = vmul.f32 %v1395_v35, %v7479_v61  ;;  %v1398_v8 = vsel %vm222_vm2, %v7507_v63, %v7500_v37  ;;  %v1273_v26 = vadd.f32 %v1261_v11, %v5162_v38  ;;  %v7510_v37 = vld [vmem:[#allocation64_spill] sm:$0xff] }
 0x32c   :  { %v5363_v52 = vpop.permute.xlu1 %1665  ;;  %7505 = vst [vmem:[#allocation12_spill] sm:$0xff] %v5377_v14  ;;  %v1274_v46 = vadd.f32 %v1262_v43, %v5174_v60  ;;  %v1346_v44 = vmul.f32 %v7506_v45, %v1322_v0  ;;  %v5394_v49 = vadd.f32 %v5277_v34, %v1520_v39  ;;  %v1344_v30 = vmul.f32 %v7506_v45, %v1320_v2  ;;  %v7512_v60 = vld [vmem:[#allocation105_spill] sm:$0xff]  ;;  %v7513_v39 = vld [vmem:[#allocation78_spill] sm:$0xff]  ;;  %v7515_v2 = vld [vmem:[#allocation24_spill] sm:$0xff] }
 0x32d   :  { %7502 = vst [vmem:[#allocation69_spill] sm:$0xff] %v5363_v52  ;;  %2356 = vperm.xlu0 %3323, %v5267_v54   ;;  %v1347_v55 = vmul.f32 %v7506_v45, %v1323_v23  ;;  %v1406_v62 = vmul.f32 %v1392_v19, %v7480_v51  ;;  %v1482_v38 = vsel %vm295_vm3, %v7511_v36, %v7510_v37  ;;  %v5411_v35 = vpop.permute.xlu0 %1720  ;;  %v7517_v45 = vld [vmem:[#allocation66_spill] sm:$0xff]  ;;  %v7534_v58 = vld [vmem:[#allocation40_spill] sm:$0xff] }
 0x32e   :  { %7509 = vst [vmem:[#allocation70_spill] sm:$0xff] %v5394_v49  ;;  %2280 = vperm.xlu1 %3321, %v5306_v12   ;;  %v1272_v11 = vadd.f32 %v1260_v7, %v7512_v60  ;;  %v1275_v43 = vadd.f32 %v1263_v53, %v5194_v24  ;;  %v1404_v34 = vmul.f32 %v1398_v8, %v7481_v32  ;;  %7514 = vst [vmem:[#allocation72_spill] sm:$0xff] %v5411_v35  ;;  %v7516_v7 = vld [vmem:[#allocation82_spill] sm:$0xff]  ;;  %v7518_v53 = vmov 3   ;;  %v7519_v60 = vld [vmem:[#allocation65_spill] sm:$0xff] }
 0x32f   :  { %v1479_v0 = vsel %vm295_vm3, %v7510_v37, %v7513_v39  ;;  %v1357_v4 = vadd.f32 %v1345_v47, %v1273_v26  ;;  %v1429_v23 = vmul.f32 %v7515_v2, %v1405_v6  ;;  %v1389_v19 = vsel %vm222_vm2, %v7504_v5, %v7507_v63  ;;  %v7520_v26 = vld [vmem:[#allocation67_spill] sm:$0xff]  ;;  %v7531_v49 = vld [vmem:[#allocation94_spill] sm:$0xff]  ;;  %v7532_v35 = vld [vmem:[#allocation81_spill] sm:$0xff] }
 0x330   :  { %v5391_v20 = vpop.permute.xlu1 %1710  ;;  %v1563_v24 = vsel %vm368_vm4, %v7517_v45, %v7516_v7  ;;  %v1358_v8 = vadd.f32 %v1346_v44, %v1274_v46  ;;  %v1476_v47 = vsel %vm295_vm3, %v7513_v39, %v7519_v60  ;;  %v1488_v6 = vmul.f32 %v1482_v38, %v7487_v48 }
 0x331   :  { %7508 = vst [vmem:[#allocation75_spill] sm:$0xff] %v5391_v20  ;;  %3325 = vset.pattern.permute.xlu0 %v7518_v53  ;;  %v1560_v5 = vsel %vm368_vm4, %v7516_v7, %v7520_v26  ;;  %v1356_v37 = vadd.f32 %v1344_v30, %v1272_v11  ;;  %v1359_v14 = vadd.f32 %v1347_v55, %v1275_v43  ;;  %v7522_v53 = vmov 2   ;;  %v7524_v11 = vld [vmem:[#allocation74_spill] sm:$0xff] }
 0x332   :  { %2532 = vperm.xlu0 %3325, %v5306_v12   ;;  %v1430_v46 = vmul.f32 %v7515_v2, %v1406_v62  ;;  %v1489_v44 = vmul.f32 %v1479_v0, %v7482_v3  ;;  %3324 = vset.pattern.permute.xlu1 %v7522_v53  ;;  %v1407_v39 = vmul.f32 %v1389_v19, %v7488_v9  ;;  %v7523_v62 = vld [vmem:[#allocation79_spill] sm:$0xff] }
 0x333   :  { %v1428_v38 = vmul.f32 %v7515_v2, %v1404_v34  ;;  %v1473_v7 = vsel %vm295_vm3, %v7519_v60, %v7511_v36  ;;  %v1572_v1 = vmul.f32 %v1563_v24, %v7359_v57  ;;  %2448 = vperm.xlu1 %3324, %v5306_v12   ;;  %v1441_v30 = vadd.f32 %v1429_v23, %v1357_v4  ;;  %v7525_v34 = vld [vmem:[#allocation76_spill] sm:$0xff]  ;;  %v7526_v36 = vld [vmem:[#allocation39_spill] sm:$0xff] }
 0x334   :  { %v5432_v63 = vpop.permute.xlu1 %1722  ;;  %v1490_v55 = vmul.f32 %v1476_v47, %v7483_v16  ;;  %v1647_v43 = vsel %vm441_vm5, %v7524_v11, %v7523_v62  ;;  %v1573_v0 = vmul.f32 %v1560_v5, %v7360_v42  ;;  %v1644_v19 = vsel %vm441_vm5, %v7523_v62, %v7525_v34  ;;  %v7527_v24 = vld [vmem:[#allocation84_spill] sm:$0xff]  ;;  %v5465_v47 = vpop.permute.xlu0 %1788  ;;  %v7530_v62 = vld [vmem:[#allocation83_spill] sm:$0xff] }
 0x335   :  { %7521 = vst [vmem:[#allocation48_spill] sm:$0xff] %v5432_v63  ;;  %v1512_v60 = vmul.f32 %v7526_v36, %v1488_v6  ;;  %v1557_v4 = vsel %vm368_vm4, %v7520_v26, %v7527_v24  ;;  %v1566_v23 = vsel %vm368_vm4, %v7527_v24, %v7517_v45  ;;  %7528 = vst [vmem:[#allocation77_spill] sm:$0xff] %v5465_v47 }
 0x336   :  { %2528 = vperm.xlu0 %3325, %v5200_v41   ;;  %v1513_v53 = vmul.f32 %v7526_v36, %v1489_v44  ;;  %v1491_v6 = vmul.f32 %v1473_v7, %v7491_v31  ;;  %v1225_v26 = vsel %vm76_vm0, %v7531_v49, %v7530_v62  ;;  %v1228_v45 = vsel %vm76_vm0, %v7532_v35, %v7531_v49  ;;  %v7535_v44 = vld [vmem:[#allocation53_spill] sm:$0xff] }
 0x337   :  { %v1431_v24 = vmul.f32 %v7515_v2, %v1407_v39  ;;  %v1440_v47 = vadd.f32 %v1428_v38, %v1356_v37  ;;  %v1596_v63 = vmul.f32 %v7534_v58, %v1572_v1  ;;  %2444 = vperm.xlu1 %3324, %v5200_v41   ;;  %v1657_v7 = vmul.f32 %v1644_v19, %v7535_v44  ;;  %v7536_v37 = vld [vmem:[#allocation96_spill] sm:$0xff] }
 0x338   :  { %v5467_v5 = vpop.permute.xlu1 %1841  ;;  %v1597_v20 = vmul.f32 %v7534_v58, %v1573_v0  ;;  %v1574_v31 = vmul.f32 %v1557_v4, %v7361_v22  ;;  %v1575_v16 = vmul.f32 %v1566_v23, %v7365_v33  ;;  %v1241_v49 = vmul.f32 %v1228_v45, %v7462_v18  ;;  %v5507_v45 = vpop.permute.xlu0 %1800  ;;  %v7559_v18 = vld [vmem:[#allocation93_spill] sm:$0xff] }
 0x339   :  { %7529 = vst [vmem:[#allocation64_spill] sm:$0xff] %v5467_v5  ;;  %v7533_v5 = vld [vmem:[#allocation51_spill] sm:$0xff]  ;;  %v1524_v3 = vadd.f32 %v1512_v60, %v1440_v47  ;;  %v1242_v2 = vmul.f32 %v1225_v26, %v7464_v21  ;;  %v1231_v1 = vsel %vm76_vm0, %v7536_v37, %v7532_v35  ;;  %v1514_v38 = vmul.f32 %v7526_v36, %v1490_v55  ;;  %v7537_v47 = vld [vmem:[#allocation97_spill] sm:$0xff]  ;;  %v7538_v26 = vld [vmem:[#allocation88_spill] sm:$0xff] }
 0x33a   :  { %v1656_v52 = vmul.f32 %v1647_v43, %v7533_v5  ;;  %2524 = vperm.xlu0 %3325, %v5267_v54   ;;  %v1525_v43 = vadd.f32 %v1513_v53, %v1441_v30  ;;  %v1515_v0 = vmul.f32 %v7526_v36, %v1491_v6  ;;  %v1222_v19 = vsel %vm76_vm0, %v7530_v62, %v7536_v37  ;;  %v7539_v6 = vld [vmem:[#allocation41_spill] sm:$0xff] }
 0x33b   :  { %v1442_v60 = vadd.f32 %v1430_v46, %v1358_v8  ;;  %v1443_v4 = vadd.f32 %v1431_v24, %v1359_v14  ;;  %v1608_v23 = vadd.f32 %v1596_v63, %v1524_v3  ;;  %v1564_v35 = vsel %vm368_vm4, %v7538_v26, %v7537_v47  ;;  %2440 = vperm.xlu1 %3324, %v5267_v54   ;;  %v7540_v14 = vld [vmem:[#allocation49_spill] sm:$0xff] }
 0x33c   :  { %v5494_v39 = vpop.permute.xlu1 %1616  ;;  %v1609_v30 = vadd.f32 %v1597_v20, %v1525_v43  ;;  %v1598_v55 = vmul.f32 %v7534_v58, %v1574_v31  ;;  %v1599_v36 = vmul.f32 %v7534_v58, %v1575_v16  ;;  %v1240_v53 = vmul.f32 %v1231_v1, %v7496_v10  ;;  %v7542_v58 = vld [vmem:[#allocation90_spill] sm:$0xff] }
 0x33d   :  { %v1680_v8 = vmul.f32 %v7539_v6, %v1656_v52  ;;  %v1265_v3 = vmul.f32 %v7540_v14, %v1241_v49  ;;  %v1266_v63 = vmul.f32 %v7540_v14, %v1242_v2  ;;  %v1243_v46 = vmul.f32 %v1222_v19, %v7468_v27  ;;  %v7543_v49 = vld [vmem:[#allocation85_spill] sm:$0xff]  ;;  %v7544_v2 = vld [vmem:[#allocation100_spill] sm:$0xff] }
 0x33e   :  { %v7541_v24 = vmov 5   ;;  %v1526_v37 = vadd.f32 %v1514_v38, %v1442_v60  ;;  %v1681_v20 = vmul.f32 %v7539_v6, %v1657_v7  ;;  %v1527_v31 = vadd.f32 %v1515_v0, %v1443_v4 }
 0x33f   :  { %3327 = vset.pattern.permute.xlu0 %v7541_v24  ;;  %v1576_v16 = vmul.f32 %v1564_v35, %v7359_v57  ;;  %v1561_v52 = vsel %vm368_vm4, %v7537_v47, %v7542_v58  ;;  %v1315_v1 = vsel %vm149_vm1, %v7544_v2, %v7543_v49  ;;  %v5533_v38 = vadd.f32 %v5349_v56, %v5379_v29  ;;  %v7545_v29 = vld [vmem:[#allocation98_spill] sm:$0xff]  ;;  %v5555_v35 = vpop.permute.xlu0 %1837 }
 0x340   :  { %v5517_v62 = vpop.permute.xlu1 %1628  ;;  %2608 = vperm.xlu0 %3327, %v5267_v54   ;;  %v5535_v7 = vadd.f32 %v1680_v8, %v1608_v23  ;;  %3326 = vset.pattern.permute.xlu1 %v7541_v24  ;;  %v5538_v43 = vadd.f32 %v1598_v55, %v1526_v37  ;;  %v5540_v0 = vadd.f32 %v1599_v36, %v1527_v31  ;;  %v7546_v36 = vld [vmem:[#allocation38_spill] sm:$0xff]  ;;  %v7548_v8 = vld [vmem:[#allocation103_spill] sm:$0xff] }
 0x341   :  { %v1264_v19 = vmul.f32 %v7540_v14, %v1240_v53  ;;  %v5543_v60 = vadd.f32 %v1681_v20, %v1609_v30  ;;  %2616 = vperm.xlu1 %3326, %v5306_v12   ;;  %v1277_v4 = vadd.f32 %v1265_v3, %v5180_v25  ;;  %v5548_v47 = vadd.f32 %v1266_v63, %v5186_v50  ;;  %v7547_v50 = vld [vmem:[#allocation89_spill] sm:$0xff]  ;;  %v7550_v63 = vld [vmem:[#allocation99_spill] sm:$0xff] }
 0x342   :  { %v1267_v56 = vmul.f32 %v7540_v14, %v1243_v46  ;;  %v1312_v23 = vsel %vm149_vm1, %v7543_v49, %v7545_v29  ;;  %v5560_v30 = vmul.f32 %v1561_v52, %v7360_v42  ;;  %v5563_v53 = vmul.f32 %v7546_v36, %v1576_v16  ;;  %v7551_v37 = vld [vmem:[#allocation87_spill] sm:$0xff]  ;;  %v7552_v52 = vld [vmem:[#allocation101_spill] sm:$0xff] }
 0x343   :  { %v1324_v25 = vmul.f32 %v1315_v1, %v7471_v59  ;;  %v1399_v14 = vsel %vm222_vm2, %v7548_v8, %v7547_v50  ;;  %v7549_v3 = vmov 6   ;;  %v1558_v46 = vsel %vm368_vm4, %v7542_v58, %v7550_v63  ;;  %v7553_v49 = vld [vmem:[#allocation91_spill] sm:$0xff]  ;;  %v7554_v1 = vld [vmem:[#allocation109_spill] sm:$0xff] }
 0x344   :  { %v5557_v55 = vpop.permute.xlu1 %1702  ;;  %3328 = vset.pattern.permute.xlu0 %v7549_v3  ;;  %v1567_v24 = vsel %vm368_vm4, %v7550_v63, %v7538_v26  ;;  %v1309_v20 = vsel %vm149_vm1, %v7545_v29, %v7551_v37  ;;  %v1306_v31 = vsel %vm149_vm1, %v7551_v37, %v7544_v2  ;;  %v1276_v16 = vadd.f32 %v1264_v19, %v5155_v13  ;;  %v7555_v63 = vld [vmem:[#allocation108_spill] sm:$0xff]  ;;  %v7556_v37 = vld [vmem:[#allocation86_spill] sm:$0xff]  ;;  %v7568_v59 = vld [vmem:[#allocation55_spill] sm:$0xff] }
 0x345   :  { %2700 = vperm.xlu0 %3328, %v5306_v12   ;;  %v1325_v58 = vmul.f32 %v1312_v23, %v7469_v15  ;;  %v1396_v26 = vsel %vm222_vm2, %v7547_v50, %v7552_v52  ;;  %v1483_v29 = vsel %vm295_vm3, %v7554_v1, %v7553_v49  ;;  %2612 = vperm.xlu1 %3326, %v5200_v41   ;;  %v7557_v15 = vld [vmem:[#allocation50_spill] sm:$0xff] }
 0x346   :  { %v1279_v2 = vadd.f32 %v1267_v56, %v7555_v63  ;;  %v1393_v13 = vsel %vm222_vm2, %v7552_v52, %v7556_v37  ;;  %v1390_v19 = vsel %vm222_vm2, %v7556_v37, %v7548_v8  ;;  %v1408_v23 = vmul.f32 %v1399_v14, %v7481_v32  ;;  %v7558_v63 = vld [vmem:[#allocation106_spill] sm:$0xff] }
 0x347   :  { %v1326_v57 = vmul.f32 %v1309_v20, %v7470_v28  ;;  %v1327_v42 = vmul.f32 %v1306_v31, %v7475_v40  ;;  %v1348_v56 = vmul.f32 %v7557_v15, %v1324_v25  ;;  %v1480_v52 = vsel %vm295_vm3, %v7553_v49, %v7558_v63  ;;  %v5628_v25 = vpop.permute.xlu0 %1712  ;;  %v7561_v32 = vld [vmem:[#allocation102_spill] sm:$0xff] }
 0x348   :  { %v5609_v50 = vpop.permute.xlu1 %1714  ;;  %v1409_v21 = vmul.f32 %v1396_v26, %v7479_v61  ;;  %v1477_v8 = vsel %vm295_vm3, %v7558_v63, %v7559_v18  ;;  %v1474_v14 = vsel %vm295_vm3, %v7559_v18, %v7554_v1  ;;  %v1492_v20 = vmul.f32 %v1483_v29, %v7487_v48  ;;  %v7562_v29 = vld [vmem:[#allocation22_spill] sm:$0xff] }
 0x349   :  { %2696 = vperm.xlu0 %3328, %v5200_v41   ;;  %v1578_v31 = vmul.f32 %v1558_v46, %v7361_v22  ;;  %v1349_v26 = vmul.f32 %v7557_v15, %v1325_v58  ;;  %v1410_v49 = vmul.f32 %v1393_v13, %v7480_v51  ;;  %v1411_v37 = vmul.f32 %v1390_v19, %v7488_v9  ;;  %v7563_v48 = vld [vmem:[#allocation42_spill] sm:$0xff]  ;;  %v7564_v9 = vld [vmem:[#allocation43_spill] sm:$0xff] }
 0x34a   :  { %v7560_v63 = vmov 7   ;;  %v1641_v18 = vsel %vm441_vm5, %v7525_v34, %v7561_v32  ;;  %v1650_v1 = vsel %vm441_vm5, %v7561_v32, %v7524_v11  ;;  %v1432_v46 = vmul.f32 %v7562_v29, %v1408_v23  ;;  %v7565_v34 = vld [vmem:[#allocation44_spill] sm:$0xff] }
 0x34b   :  { %3329 = vset.pattern.permute.xlu1 %v7560_v63  ;;  %v1493_v58 = vmul.f32 %v1480_v52, %v7563_v48  ;;  %v1350_v13 = vmul.f32 %v7557_v15, %v1326_v57  ;;  %v1351_v19 = vmul.f32 %v7557_v15, %v1327_v42  ;;  %v1494_v51 = vmul.f32 %v1477_v8, %v7564_v9  ;;  %v7566_v11 = vld [vmem:[#allocation20_spill] sm:$0xff]  ;;  %v7567_v52 = vld [vmem:[#allocation54_spill] sm:$0xff] }
 0x34c   :  { %v5646_v22 = vpop.permute.xlu1 %1749  ;;  %2784 = vperm.xlu1 %3329, %v5306_v12   ;;  %v1495_v61 = vmul.f32 %v1474_v14, %v7565_v34  ;;  %v1579_v28 = vmul.f32 %v1567_v24, %v7365_v33  ;;  %v1360_v40 = vadd.f32 %v1348_v56, %v1276_v16  ;;  %v1433_v32 = vmul.f32 %v7562_v29, %v1409_v21  ;;  %v7569_v16 = vld [vmem:[#allocation112_spill] sm:$0xff]  ;;  %v5667_v14 = vpop.permute.xlu0 %1786  ;;  %v7571_v34 = vld [vmem:[#allocation95_spill] sm:$0xff] }
 0x34d   :  { %v1516_v23 = vmul.f32 %v7566_v11, %v1492_v20  ;;  %3331 = vset.pattern.permute.xlu0 %v7560_v63  ;;  %v1658_v48 = vmul.f32 %v1641_v18, %v7567_v52  ;;  %v1659_v27 = vmul.f32 %v1650_v1, %v7568_v59  ;;  %v1434_v57 = vmul.f32 %v7562_v29, %v1410_v49  ;;  %v7570_v21 = vld [vmem:[#allocation92_spill] sm:$0xff] }
 0x34e   :  { %v1435_v42 = vmul.f32 %v7562_v29, %v1411_v37  ;;  %2780 = vperm.xlu0 %3331, %v5200_v41   ;;  %v1361_v15 = vadd.f32 %v1349_v26, %v1277_v4  ;;  %v1444_v8 = vadd.f32 %v1432_v46, %v1360_v40  ;;  %v1517_v24 = vmul.f32 %v7566_v11, %v1493_v58 }
 0x34f   :  { %v1648_v56 = vsel %vm441_vm5, %v7570_v21, %v7569_v16  ;;  %v1362_v49 = vadd.f32 %v1350_v13, %v5548_v47  ;;  %v1363_v37 = vadd.f32 %v1351_v19, %v1279_v2  ;;  %v1518_v18 = vmul.f32 %v7566_v11, %v1494_v51 }
 0x350   :  { %v5669_v20 = vpop.permute.xlu1 %1794  ;;  %3330 = vset.pattern.permute.xlu1 %v7549_v3  ;;  %v1519_v40 = vmul.f32 %v7566_v11, %v1495_v61  ;;  %v1601_v4 = vmul.f32 %v7546_v36, %v5560_v30  ;;  %v1602_v26 = vmul.f32 %v7546_v36, %v1578_v31  ;;  %v1445_v1 = vadd.f32 %v1433_v32, %v1361_v15  ;;  %v7573_v11 = vld [vmem:[#allocation71_spill] sm:$0xff] }
 0x351   :  { %2692 = vperm.xlu1 %3330, %v5267_v54   ;;  %v1528_v29 = vadd.f32 %v1516_v23, %v1444_v8  ;;  %v1446_v46 = vadd.f32 %v1434_v57, %v1362_v49  ;;  %v1447_v58 = vadd.f32 %v1435_v42, %v1363_v37  ;;  %v1645_v47 = vsel %vm441_vm5, %v7569_v16, %v7571_v34  ;;  %v7576_v57 = vld [vmem:[#allocation104_spill] sm:$0xff]  ;;  %v5710_v42 = vpop.permute.xlu0 %1798  ;;  %v7577_v15 = vld [vmem:[#allocation3_spill] sm:$0xff]  ;;  %v7580_v37 = vld [vmem:[#allocation113_spill] sm:$0xff] }
 0x352   :  { %v1660_v51 = vmul.f32 %v1648_v56, %v7533_v5  ;;  %v7572_v3 = vmov 8   ;;  %v1603_v61 = vmul.f32 %v7546_v36, %v1579_v28  ;;  %v1682_v2 = vmul.f32 %v7539_v6, %v1658_v48 }
 0x353   :  { %3334 = vset.pattern.permute.xlu0 %v7572_v3  ;;  %v1683_v30 = vmul.f32 %v7539_v6, %v1659_v27  ;;  %v1529_v31 = vadd.f32 %v1517_v24, %v1445_v1  ;;  %v1530_v19 = vadd.f32 %v1518_v18, %v1446_v46  ;;  %v1531_v32 = vadd.f32 %v1519_v40, %v1447_v58  ;;  %v7574_v6 = vld [vmem:[#allocation107_spill] sm:$0xff]  ;;  %v7578_v24 = vld [vmem:[#allocation48_spill] sm:$0xff] }
 0x354   :  { %v5688_v13 = vpop.permute.xlu1 %1806  ;;  %2864 = vperm.xlu0 %3334, %v5200_v41   ;;  %v1642_v23 = vsel %vm441_vm5, %v7571_v34, %v7573_v11  ;;  %v1651_v28 = vsel %vm441_vm5, %v7573_v11, %v7570_v21  ;;  %v1612_v27 = vadd.f32 %v5563_v53, %v1528_v29  ;;  %v1661_v48 = vmul.f32 %v1645_v47, %v7535_v44  ;;  %v7575_v41 = vld [vmem:[#allocation75_spill] sm:$0xff]  ;;  %v7581_v58 = vld [vmem:[#allocation56_spill] sm:$0xff] }
 0x355   :  { %3332 = vset.pattern.permute.xlu1 %v7572_v3  ;;  %v1729_v36 = vsel %vm514_vm6, %v7575_v41, %v7574_v6  ;;  %v1732_v34 = vsel %vm514_vm6, %v7576_v57, %v7575_v41  ;;  %v1684_v8 = vmul.f32 %v7577_v15, %v1660_v51  ;;  %v1726_v53 = vsel %vm514_vm6, %v7574_v6, %v7578_v24  ;;  %v7579_v21 = vld [vmem:[#allocation111_spill] sm:$0xff]  ;;  %v7582_v51 = vld [vmem:[#allocation58_spill] sm:$0xff]  ;;  %v7584_v6 = vld [vmem:[#allocation57_spill] sm:$0xff] }
 0x356   :  { %2868 = vperm.xlu1 %3332, %v5306_v12   ;;  %v1735_v16 = vsel %vm514_vm6, %v7578_v24, %v7576_v57  ;;  %v1646_v56 = vsel %vm441_vm5, %v5494_v39, %v7579_v21  ;;  %v1662_v49 = vmul.f32 %v1642_v23, %v7567_v52  ;;  %v1663_v12 = vmul.f32 %v1651_v28, %v7568_v59  ;;  %v7583_v23 = vld [vmem:[#allocation59_spill] sm:$0xff] }
 0x357   :  { %v1649_v18 = vsel %vm441_vm5, %v7580_v37, %v5494_v39  ;;  %v1643_v40 = vsel %vm441_vm5, %v7579_v21, %v5517_v62  ;;  %v5739_v29 = vadd.f32 %v1682_v2, %v5538_v43  ;;  %v1613_v46 = vadd.f32 %v1601_v4, %v1529_v31 }
 0x358   :  { %v5736_v1 = vpop.permute.xlu1 %1700  ;;  %v1744_v47 = vmul.f32 %v1732_v34, %v7581_v58  ;;  %v1745_v3 = vmul.f32 %v1729_v36, %v7582_v51  ;;  %v1614_v11 = vadd.f32 %v1602_v26, %v1530_v19  ;;  %v1746_v28 = vmul.f32 %v1726_v53, %v7583_v23  ;;  %v7586_v34 = vld [vmem:[#allocation68_spill] sm:$0xff] }
 0x359   :  { %v1747_v39 = vmul.f32 %v1735_v16, %v7584_v6  ;;  %v1652_v41 = vmul.f32 %v1646_v56, %v7533_v5  ;;  %v1685_v57 = vmul.f32 %v7577_v15, %v1661_v48  ;;  %v1615_v24 = vadd.f32 %v1603_v61, %v1531_v32  ;;  %v7585_v61 = vld [vmem:[#allocation52_spill] sm:$0xff] }
 0x35a   :  { %3333 = vset.pattern.permute.xlu1 %v7560_v63  ;;  %v1655_v43 = vmul.f32 %v1649_v18, %v7568_v59  ;;  %v1653_v4 = vmul.f32 %v1643_v40, %v7535_v44  ;;  %v1696_v2 = vadd.f32 %v1684_v8, %v1612_v27  ;;  %v1686_v26 = vmul.f32 %v7577_v15, %v1662_v49  ;;  %v5757_v63 = vpop.permute.xlu0 %1833  ;;  %v7587_v8 = vld [vmem:[#allocation69_spill] sm:$0xff]  ;;  %v7588_v16 = vld [vmem:[#allocation72_spill] sm:$0xff] }
 0x35b   :  { %2776 = vperm.xlu1 %3333, %v5267_v54   ;;  %v1687_v31 = vmul.f32 %v7577_v15, %v1663_v12  ;;  %v1640_v19 = vsel %vm441_vm5, %v5517_v62, %v7580_v37  ;;  %v1768_v32 = vmul.f32 %v7585_v61, %v1744_v47  ;;  %v1769_v36 = vmul.f32 %v7585_v61, %v1745_v3 }
 0x35c   :  { %v1707_v48 = vpop.permute.xlu1 %1706  ;;  %v1731_v54 = vsel %vm514_vm6, %v5557_v55, %v7586_v34  ;;  %v1728_v27 = vsel %vm514_vm6, %v7586_v34, %v5609_v50  ;;  %v1770_v15 = vmul.f32 %v7585_v61, %v1746_v28  ;;  %v1771_v62 = vmul.f32 %v7585_v61, %v1747_v39 }
 0x35d   :  { %v1676_v53 = vmul.f32 %v7587_v8, %v1652_v41  ;;  %v1734_v21 = vsel %vm514_vm6, %v7588_v16, %v5557_v55  ;;  %v1697_v56 = vadd.f32 %v1685_v57, %v1613_v46  ;;  %v1679_v49 = vmul.f32 %v7587_v8, %v1655_v43 }
 0x35e   :  { %v1654_v12 = vmul.f32 %v1640_v19, %v7567_v52  ;;  %v1677_v37 = vmul.f32 %v7587_v8, %v1653_v4  ;;  %v7589_v18 = vmov 9   ;;  %v1698_v40 = vadd.f32 %v1686_v26, %v1614_v11  ;;  %v5793_v26 = vpop.permute.xlu0 %1784  ;;  %v7592_v19 = vld [vmem:[#allocation77_spill] sm:$0xff] }
 0x35f   :  { %3335 = vset.pattern.permute.xlu1 %v7589_v18  ;;  %v1699_v47 = vadd.f32 %v1687_v31, %v1615_v24  ;;  %v1740_v3 = vmul.f32 %v1731_v54, %v7581_v58  ;;  %v1741_v28 = vmul.f32 %v1728_v27, %v7582_v51  ;;  %v1695_v41 = vadd.f32 %v1683_v30, %v5540_v0  ;;  %v7590_v24 = vld [vmem:[#allocation70_spill] sm:$0xff]  ;;  %v7591_v30 = vld [vmem:[#allocation73_spill] sm:$0xff] }
 0x360   :  { %v1719_v39 = vpop.permute.xlu1 %1718  ;;  %v1780_v61 = vadd.f32 %v1768_v32, %v1696_v2  ;;  %v1743_v55 = vmul.f32 %v1734_v21, %v7584_v6  ;;  %v1725_v46 = vsel %vm514_vm6, %v5609_v50, %v7588_v16  ;;  %v1781_v57 = vadd.f32 %v1769_v36, %v1697_v56  ;;  %v7593_v32 = vld [vmem:[#allocation110_spill] sm:$0xff]  ;;  %v7594_v16 = vld [vmem:[#allocation60_spill] sm:$0xff] }
 0x361   :  { %v5788_v43 = vadd.f32 %v1770_v15, %v1698_v40  ;;  %v1783_v11 = vadd.f32 %v1771_v62, %v1699_v47  ;;  %v5791_v4 = vadd.f32 %v1676_v53, %v7590_v24  ;;  %v5796_v31 = vadd.f32 %v1679_v49, %v5533_v38  ;;  %v7595_v49 = vld [vmem:[#allocation61_spill] sm:$0xff] }
 0x362   :  { %v1678_v0 = vmul.f32 %v7587_v8, %v1654_v12  ;;  %v5800_v2 = vadd.f32 %v1677_v37, %v7591_v30  ;;  %v1816_v50 = vsel %vm587_vm7, %v7592_v19, %v5669_v20  ;;  %v1764_v36 = vmul.f32 %v7593_v32, %v1740_v3 }
 0x363   :  { %v1742_v34 = vmul.f32 %v1725_v46, %v7583_v23  ;;  %v1765_v54 = vmul.f32 %v7593_v32, %v1741_v28  ;;  %v1813_v38 = vsel %vm587_vm7, %v5669_v20, %v5507_v45  ;;  %v1767_v15 = vmul.f32 %v7593_v32, %v1743_v55  ;;  %v1797_v28 = vpop.permute.xlu0 %1796  ;;  %v7596_v55 = vld [vmem:[#allocation63_spill] sm:$0xff] }
 0x364   :  { %v1793_v27 = vpop.permute.xlu1 %1792  ;;  %v1819_v62 = vsel %vm587_vm7, %v5688_v13, %v7592_v19  ;;  %v1828_v21 = vmul.f32 %v1816_v50, %v7594_v16  ;;  %v1810_v20 = vsel %vm587_vm7, %v5507_v45, %v5688_v13  ;;  %v1730_v56 = vsel %vm514_vm6, %v5736_v1, %v1707_v48  ;;  %v7597_v19 = vld [vmem:[#allocation62_spill] sm:$0xff] }
 0x365   :  { %v1812_v8 = vsel %vm587_vm7, %v1793_v27, %v5710_v42  ;;  %v1815_v53 = vsel %vm587_vm7, %v5667_v14, %v1793_v27  ;;  %v1829_v37 = vmul.f32 %v1813_v38, %v7595_v49  ;;  %v1727_v40 = vsel %vm514_vm6, %v1707_v48, %v5628_v25  ;;  %v7598_v27 = vld [vmem:[#allocation64_spill] sm:$0xff] }
 0x366   :  { %v1825_v12 = vmul.f32 %v1812_v8, %v7595_v49  ;;  %v1724_v47 = vsel %vm514_vm6, %v5628_v25, %v1719_v39  ;;  %v1824_v3 = vmul.f32 %v1815_v53, %v7594_v16  ;;  %v1766_v45 = vmul.f32 %v7593_v32, %v1742_v34 }
 0x367   :  { %v1777_v13 = vadd.f32 %v1765_v54, %v5543_v60  ;;  %v1831_v46 = vmul.f32 %v1819_v62, %v7596_v55  ;;  %v1830_v50 = vmul.f32 %v1810_v20, %v7597_v19  ;;  %v1736_v48 = vmul.f32 %v1730_v56, %v7581_v58 }
 0x368   :  { %v1849_v24 = vmul.f32 %v5555_v35, %v1825_v12  ;;  %v1805_v30 = vpop.permute.xlu1 %1804  ;;  %v1737_v60 = vmul.f32 %v1727_v40, %v7582_v51  ;;  %v1738_v34 = vmul.f32 %v1724_v47, %v7583_v23  ;;  %v1852_v62 = vmul.f32 %v7598_v27, %v1828_v21  ;;  %v1874_v12 = vpop.permute.xlu0 %1873 }
 0x369   :  { %v1809_v25 = vsel %vm587_vm7, %v5710_v42, %v1805_v30  ;;  %v1818_v32 = vsel %vm587_vm7, %v1805_v30, %v5667_v14  ;;  %v1853_v8 = vmul.f32 %v7598_v27, %v1829_v37  ;;  %v1733_v42 = vsel %vm514_vm6, %v1719_v39, %v5736_v1 }
 0x36a   :  { %v1826_v54 = vmul.f32 %v1809_v25, %v7597_v19  ;;  %v1827_v38 = vmul.f32 %v1818_v32, %v7596_v55  ;;  %v1848_v53 = vmul.f32 %v5555_v35, %v1824_v3  ;;  %v1855_v14 = vmul.f32 %v7598_v27, %v1831_v46  ;;  %v7599_v32 = vld [vmem:[#allocation12_spill] sm:$0xff] }
 0x36b   :  { %v1861_v47 = vadd.f32 %v1849_v24, %v1777_v13  ;;  %v1776_v30 = vadd.f32 %v1764_v36, %v5535_v7  ;;  %v1779_v21 = vadd.f32 %v1767_v15, %v1695_v41  ;;  %v1854_v37 = vmul.f32 %v7598_v27, %v1830_v50 }
 0x36c   :  { %v1850_v20 = vmul.f32 %v5555_v35, %v1826_v54  ;;  %v1851_v56 = vmul.f32 %v5555_v35, %v1827_v38  ;;  %v1878_v40 = vpop.permute.xlu1 %1877  ;;  %v1760_v25 = vmul.f32 %v5646_v22, %v1736_v48  ;;  %v1778_v1 = vadd.f32 %v1766_v45, %v5739_v29 }
 0x36d   :  { %v1761_v39 = vmul.f32 %v5646_v22, %v1737_v60  ;;  %v1739_v3 = vmul.f32 %v1733_v42, %v7584_v6  ;;  %v1762_v46 = vmul.f32 %v5646_v22, %v1738_v34  ;;  %v1690_v35 = vadd.f32 %v1678_v0, %v7599_v32 }
 0x36e   :  { %v1864_v54 = vadd.f32 %v1852_v62, %v1780_v61  ;;  %v1860_v38 = vadd.f32 %v1848_v53, %v1776_v30  ;;  %v1865_v13 = vadd.f32 %v1853_v8, %v1781_v57  ;;  %v1862_v24 = vadd.f32 %v1850_v20, %v1778_v1  ;;  %v1910_v57 = vpop.permute.xlu0 %1909 }
 0x36f   :  { %v1867_v41 = vadd.f32 %v1855_v14, %v1783_v11  ;;  %v1885_v36 = vadd.f32 %v1874_v12, %v1861_v47  ;;  %v1863_v15 = vadd.f32 %v1851_v56, %v1779_v21  ;;  %v1866_v50 = vadd.f32 %v1854_v37, %v5788_v43 }
 0x370   :  { %v1791_v7 = vpop.permute.xlu1 %1790  ;;  %v1772_v29 = vadd.f32 %v1760_v25, %v5791_v4  ;;  %v1889_v48 = vadd.f32 %v1878_v40, %v1865_v13  ;;  %v1773_v60 = vadd.f32 %v1761_v39, %v5800_v2  ;;  %v1763_v61 = vmul.f32 %v5646_v22, %v1739_v3 }
 0x371   :  { %v1814_v45 = vsel %vm587_vm7, %v5793_v26, %v1791_v7  ;;  %v1774_v0 = vadd.f32 %v1762_v46, %v1690_v35  ;;  %v1891_v34 = vadd.f32 %v1878_v40, %v1867_v41  ;;  %v1811_v11 = vsel %vm587_vm7, %v1791_v7, %v1797_v28 }
 0x372   :  { %v1890_v27 = vadd.f32 %v1878_v40, %v1866_v50  ;;  %v1888_v62 = vadd.f32 %v1878_v40, %v1864_v54  ;;  %v1884_v43 = vadd.f32 %v1874_v12, %v1860_v38  ;;  %v1820_v4 = vmul.f32 %v1814_v45, %v7594_v16 }
 0x373   :  { %vm1897_vm9 = vcmp.ge.f32.partialorder %v1885_v36, 0.0  ;;  %v1887_v42 = vadd.f32 %v1874_v12, %v1863_v15  ;;  %v1886_v53 = vadd.f32 %v1874_v12, %v1862_v24  ;;  %vm1901_vm10 = vcmp.ge.f32.partialorder %v1889_v48, 0.0 }
 0x374   :  { %v1803_v8 = vpop.permute.xlu1 %1802  ;;  %v1921_v14 = vmul.f32 %v1910_v57, %v1885_v36  ;;  %v1821_v20 = vmul.f32 %v1811_v11, %v7595_v49  ;;  %vm1903_vm11 = vcmp.ge.f32.partialorder %v1891_v34, 0.0  ;;  %vm1902_vm12 = vcmp.ge.f32.partialorder %v1890_v27, 0.0 }
 0x375   :  { %v1808_v2 = vsel %vm587_vm7, %v1797_v28, %v1803_v8  ;;  %v1817_v22 = vsel %vm587_vm7, %v1803_v8, %v5793_v26  ;;  %vm1900_vm13 = vcmp.ge.f32.partialorder %v1888_v62, 0.0  ;;  %vm1896_vm14 = vcmp.ge.f32.partialorder %v1884_v43, 0.0 }
 0x376   :  { %v1822_v56 = vmul.f32 %v1808_v2, %v7597_v19  ;;  %v1823_v40 = vmul.f32 %v1817_v22, %v7596_v55  ;;  %v1920_v12 = vmul.f32 %v1910_v57, %v1884_v43  ;;  %v1844_v47 = vmul.f32 %v5757_v63, %v1820_v4  ;;  %v3351_v2 = vld [vmem:[%s6985_s5 + $0x20] sm:$0xff]  ;;  %v3352_v22 = vld [vmem:[%s6985_s5 + $0x28] sm:$0xff] }
 0x377   :  { %vm1899_vm15 = vcmp.ge.f32.partialorder %v1887_v42, 0.0  ;;  %v1923_v30 = vmul.f32 %v1910_v57, %v1887_v42  ;;  %v1922_v21 = vmul.f32 %v1910_v57, %v1886_v53  ;;  %v1845_v39 = vmul.f32 %v5757_v63, %v1821_v20 }
 0x378   :  { %v1914_v28 = vpop.permute.xlu1 %1913  ;;  %v1846_v3 = vmul.f32 %v5757_v63, %v1822_v56  ;;  %v1847_v46 = vmul.f32 %v5757_v63, %v1823_v40  ;;  %vm1898_vm8 = vcmp.ge.f32.partialorder %v1886_v53, 0.0  ;;  %v1775_v13 = vadd.f32 %v1763_v61, %v5796_v31  ;;  %v7601_v40 = vld [vmem:[#allocation4_spill] sm:$0xff] }
 0x379   :  { %v1925_v26 = vmul.f32 %v1914_v28, %v1889_v48  ;;  %v1927_v37 = vmul.f32 %v1914_v28, %v1891_v34  ;;  %v1926_v25 = vmul.f32 %v1914_v28, %v1890_v27  ;;  %v1924_v1 = vmul.f32 %v1914_v28, %v1888_v62 }
 0x37a   :  { %v1933_v24 = vsel %vm1897_vm9, %v1885_v36, %v1921_v14  ;;  %v1932_v7 = vsel %vm1896_vm14, %v1884_v43, %v1920_v12  ;;  %v1856_v41 = vadd.f32 %v1844_v47, %v1772_v29  ;;  %v1935_v15 = vsel %vm1899_vm15, %v1887_v42, %v1923_v30  ;;  %v3350_v42 = vld [vmem:[%s6985_s5 + $0x18] sm:$0xff]  ;;  %v7602_v12 = vld [vmem:[#allocation6_spill] sm:$0xff] }
 0x37b   :  { %v1937_v32 = vsel %vm1901_vm10, %v1889_v48, %v1925_v26  ;;  %v1939_v35 = vsel %vm1903_vm11, %v1891_v34, %v1927_v37  ;;  %v1938_v54 = vsel %vm1902_vm12, %v1890_v27, %v1926_v25  ;;  %v1936_v38 = vsel %vm1900_vm13, %v1888_v62, %v1924_v1  ;;  %v7604_v37 = vld [vmem:[#allocation7_spill] sm:$0xff] }
 0x37c   :  { %1988 = vmatprep.subr.mxu0 %v1937_v32  ;;  %2071 = vmatprep.subr.mxu1 %v1939_v35  ;;  %v1934_v50 = vsel %vm1898_vm8, %v1886_v53, %v1922_v21  ;;  %v1858_v45 = vadd.f32 %v1846_v3, %v1774_v0  ;;  %v1857_v48 = vadd.f32 %v1845_v39, %v1773_v60  ;;  %vm1955_vm9 = vcmask 195584   ;;  %v7603_v21 = vld [vmem:[#allocation13_spill] sm:$0xff] }
 0x37d   :  { %2072 = vmatpush1.msra.mxu1 %v1938_v54  ;;  %v1870_v63 = vpop.permute.xlu1 %1869  ;;  %1989 = vmatpush1.msra.mxu0 %v1936_v38  ;;  %v1859_v57 = vadd.f32 %v1847_v46, %v1775_v13  ;;  %v7600_v53 = vmov 0.0   ;;  %v781_v47 = vadd.f32 %v7602_v12, %v7601_v40  ;;  %v864_v25 = vadd.f32 %v7604_v37, %v7601_v40  ;;  %v7608_v12 = vld [vmem:[#allocation8_spill] sm:$0xff]  ;;  %v7610_v37 = vld [vmem:[#allocation14_spill] sm:$0xff] }
 0x37e   :  { %1990 = vmatprep.subr.mxu0 %v1933_v24  ;;  %2073 = vmatprep.subr.mxu1 %v1935_v15  ;;  %v1881_v31 = vadd.f32 %v1870_v63, %v1857_v48  ;;  %v1880_v34 = vadd.f32 %v1870_v63, %v1856_v41  ;;  %v1882_v36 = vadd.f32 %v1870_v63, %v1858_v45  ;;  %v7605_v45 = vld [vmem:[#allocation5_spill] sm:$0xff] }
 0x37f   :  { %1991 = vmatpush1.msra.mxu0 %v1932_v7  ;;  %2074 = vmatpush1.msra.mxu1 %v1934_v50  ;;  %v1883_v61 = vadd.f32 %v1870_v63, %v1859_v57  ;;  %v904_v26 = vmul.f32 %v7603_v21, %v781_v47  ;;  %vm880_vm14 = vcmp.ge.f32.partialorder %v781_v47, 0.0  ;;  %v906_v35 = vmul.f32 %v7603_v21, %v864_v25 }
 0x380   :  { %vm1893_vm10 = vcmp.ge.f32.partialorder %v1881_v31, 0.0  ;;  %vm1892_vm12 = vcmp.ge.f32.partialorder %v1880_v34, 0.0  ;;  %vm1894_vm13 = vcmp.ge.f32.partialorder %v1882_v36, 0.0  ;;  %v783_v48 = vadd.f32 %v7605_v45, %v7601_v40 }
 0x381   :  { %vm1895_vm11 = vcmp.ge.f32.partialorder %v1883_v61, 0.0  ;;  %v916_v54 = vsel %vm880_vm14, %v781_v47, %v904_v26 }
 0x382   :  { %v1906_v11 = vpop.permute.xlu1 %1905 }
 0x383   :  { %v1917_v29 = vmul.f32 %v1906_v11, %v1881_v31  ;;  %v1919_v27 = vmul.f32 %v1906_v11, %v1883_v61  ;;  %v1916_v62 = vmul.f32 %v1906_v11, %v1880_v34  ;;  %v1918_v43 = vmul.f32 %v1906_v11, %v1882_v36 }
 0x385   :  { %v1929_v0 = vsel %vm1893_vm10, %v1881_v31, %v1917_v29  ;;  %v1931_v4 = vsel %vm1895_vm11, %v1883_v61, %v1919_v27  ;;  %v1928_v60 = vsel %vm1892_vm12, %v1880_v34, %v1916_v62  ;;  %v1930_v8 = vsel %vm1894_vm13, %v1882_v36, %v1918_v43  ;;  %v7606_v34 = vld [vmem:[#allocation9_spill] sm:$0xff] }
 0x386   :  { %1992 = vmatprep.subr.mxu0 %v1929_v0  ;;  %2075 = vmatprep.subr.mxu1 %v1931_v4  ;;  %vm882_vm10 = vcmp.ge.f32.partialorder %v864_v25, 0.0  ;;  %v905_v61 = vmul.f32 %v7603_v21, %v783_v48  ;;  %v866_v36 = vadd.f32 %v7606_v34, %v7601_v40  ;;  %vm881_vm12 = vcmp.ge.f32.partialorder %v783_v48, 0.0  ;;  %v7607_v40 = vld [vmem:[#allocation18_spill] sm:$0xff] }
 0x387   :  { %1993 = vmatpush1.msra.mxu0 %v1928_v60  ;;  %2076 = vmatpush1.msra.mxu1 %v1930_v8  ;;  %v918_v41 = vsel %vm882_vm10, %v864_v25, %v906_v35  ;;  %v787_v47 = vadd.f32 %v7608_v12, %v7607_v40  ;;  %v870_v25 = vadd.f32 %v7610_v37, %v7607_v40  ;;  %v7624_v12 = vld [vmem:[#allocation17_spill] sm:$0xff] }
 0x388   :  { %3230 = vmatmul.mubr.msk.f32.vlgmr.msra.gmra.mxu0 %vm1955_vm9, %v3350_v42  ;;  %3233 = vmatmul.mubr.msk.f32.vlgmr.msra.gmra.mxu1 %vm1955_vm9, %v3350_v42  ;;  %v917_v27 = vsel %vm881_vm12, %v783_v48, %v905_v61  ;;  %v907_v62 = vmul.f32 %v7603_v21, %v866_v36  ;;  %vm883_vm14 = vcmp.ge.f32.partialorder %v866_v36, 0.0  ;;  %v7609_v21 = vld [vmem:[#allocation16_spill] sm:$0xff] }
 0x389   :  { %2032 = vmatprep.mubr.f32.mxu0 %v7600_v53  ;;  %2115 = vmatprep.mubr.f32.mxu1 %v7600_v53  ;;  %v1943_v14 = vpop.permute.xlu1 %1942  ;;  %v5977_v8 = vpop.permute.xlu0 %1952  ;;  %v908_v26 = vmul.f32 %v7609_v21, %v787_v47 }
 0x38a   :  { %v919_v4 = vsel %vm883_vm14, %v866_v36, %v907_v62 }
 0x38c   :  { %3231 = vmatmul.mubr.msk.f32.gmra.mxu0 %vm1955_vm9, %v3351_v2  ;;  %3234 = vmatmul.mubr.msk.f32.gmra.mxu1 %vm1955_vm9, %v3351_v2 }
 0x38d   :  { %2038 = vmatprep.mubr.f32.mxu0 %v7600_v53  ;;  %2121 = vmatprep.mubr.f32.mxu1 %v7600_v53  ;;  %v5925_v20 = vpop.permute.xlu1 %1947 }
 0x390   :  { %3232 = vmatmul.mubr.msk.f32.gmra.mxu0 %vm1955_vm9, %v3352_v22  ;;  %3235 = vmatmul.mubr.msk.f32.gmra.mxu1 %vm1955_vm9, %v3352_v22 }
 0x391   :  { %3052 = vmatprep.mubr.f32.mxu0 %v7600_v53  ;;  %3135 = vmatprep.mubr.f32.mxu1 %v7600_v53 }
 0x392   :  { %v5927_v56 = vpop.permute.xlu1 %2149 }
 0x396   :  { %v2142_v3 = vpop.permute.xlu1 %2141 }
 0x448   :  { %v2028_v28 = vpop.f32.mrf.mxu0  ;;  %v2111_v30 = vpop.f32.mrf.mxu1 }
 0x449   :  { %v2029_v1 = vadd.f32 %v2028_v28, %v1943_v14  ;;  %v2112_v39 = vadd.f32 %v2111_v30, %v1943_v14 }
 0x44a   :  { %v2030_v7 = vpop.f32.mrf.mxu0  ;;  %v2113_v50 = vpop.f32.mrf.mxu1 }
 0x44b   :  { %vm2128_vm15 = vcmp.ge.f32.partialorder %v2029_v1, 0.0  ;;  %v2152_v46 = vmul.f32 %v2142_v3, %v2029_v1  ;;  %v2154_v32 = vmul.f32 %v2142_v3, %v2112_v39  ;;  %vm2130_vm8 = vcmp.ge.f32.partialorder %v2112_v39, 0.0 }
 0x44c   :  { %v2031_v15 = vadd.f32 %v2030_v7, %v1943_v14  ;;  %v2114_v31 = vadd.f32 %v2113_v50, %v1943_v14  ;;  %v2034_v42 = vpop.f32.mrf.mxu0  ;;  %v2117_v22 = vpop.f32.mrf.mxu1 }
 0x44d   :  { %v2164_v38 = vsel %vm2128_vm15, %v2029_v1, %v2152_v46  ;;  %v2166_v24 = vsel %vm2130_vm8, %v2112_v39, %v2154_v32  ;;  %v2035_v2 = vadd.f32 %v2034_v42, %v5925_v20  ;;  %v5984_v14 = vpop.permute.xlu0 %2145  ;;  %v2118_v28 = vadd.f32 %v2117_v22, %v5925_v20 }
 0x44e   :  { %v5935_v13 = vadd.f32 %v2164_v38, %v916_v54  ;;  %v5941_v63 = vadd.f32 %v2166_v24, %v918_v41  ;;  %v2153_v57 = vmul.f32 %v2142_v3, %v2031_v15  ;;  %vm2129_vm11 = vcmp.ge.f32.partialorder %v2031_v15, 0.0  ;;  %v6013_v24 = vpop.permute.xlu1 %2198  ;;  %v2036_v34 = vpop.f32.mrf.mxu0 }
 0x44f   :  { %v2155_v29 = vmul.f32 %v2142_v3, %v2114_v31  ;;  %vm2131_vm13 = vcmp.ge.f32.partialorder %v2114_v31, 0.0  ;;  %v2156_v30 = vmul.f32 %v5984_v14, %v2035_v2  ;;  %vm2132_vm15 = vcmp.ge.f32.partialorder %v2035_v2, 0.0 }
 0x450   :  { %2391 = vrot.lane.b32.xlu0 %v5935_v13, %s3363_s0  ;;  %2223 = vrot.lane.b32.xlu1 %v5935_v13, %s3358_s25  ;;  %v2165_v11 = vsel %vm2129_vm11, %v2031_v15, %v2153_v57  ;;  %vm884_vm8 = vcmp.ge.f32.partialorder %v787_v47, 0.0  ;;  %v2158_v39 = vmul.f32 %v5984_v14, %v2118_v28  ;;  %vm2134_vm10 = vcmp.ge.f32.partialorder %v2118_v28, 0.0 }
 0x451   :  { %v5961_v43 = vadd.f32 %v2165_v11, %v917_v27  ;;  %v2167_v0 = vsel %vm2131_vm13, %v2114_v31, %v2155_v29  ;;  %v6001_v1 = vpop.permute.xlu0 %2203  ;;  %v2168_v3 = vsel %vm2132_vm15, %v2035_v2, %v2156_v30  ;;  %v920_v46 = vsel %vm884_vm8, %v787_v47, %v908_v26  ;;  %v2119_v29 = vpop.f32.mrf.mxu1  ;;  %v7621_v27 = vld [vmem:[#allocation10_spill] sm:$0xff] }
 0x452   :  { %v5967_v60 = vadd.f32 %v2167_v0, %v919_v4  ;;  %7611 = vst [vmem:[#allocation80_spill] sm:$0xff] %v6001_v1  ;;  %v910_v32 = vmul.f32 %v7609_v21, %v870_v25  ;;  %vm886_vm11 = vcmp.ge.f32.partialorder %v870_v25, 0.0  ;;  %v6009_v35 = vadd.f32 %v2168_v3, %v920_v46  ;;  %v6021_v15 = vpop.permute.xlu1 %2208 }
 0x453   :  { %v2170_v38 = vsel %vm2134_vm10, %v2118_v28, %v2158_v39  ;;  %7615 = vst [vmem:[#allocation82_spill] sm:$0xff] %v6021_v15  ;;  %v2037_v11 = vadd.f32 %v2036_v34, %v5925_v20  ;;  %v789_v62 = vadd.f32 %v7621_v27, %v7607_v40  ;;  %v2120_v42 = vadd.f32 %v2119_v29, %v5925_v20  ;;  %v2040_v29 = vpop.f32.mrf.mxu0  ;;  %v7630_v27 = vld [vmem:[#allocation21_spill] sm:$0xff] }
 0x454   :  { %2403 = vrot.lane.b32.xlu0 %v5941_v63, %s3363_s0  ;;  %2235 = vrot.lane.b32.xlu1 %v5941_v63, %s3358_s25  ;;  %7612 = vst [vmem:[#allocation105_spill] sm:$0xff] %v6009_v35  ;;  %v922_v7 = vsel %vm886_vm11, %v870_v25, %v910_v32  ;;  %v872_v47 = vadd.f32 %v7624_v12, %v7607_v40 }
 0x455   :  { %v6011_v54 = vpop.permute.xlu0 %2276  ;;  %v6019_v41 = vadd.f32 %v2170_v38, %v922_v7  ;;  %v2157_v4 = vmul.f32 %v5984_v14, %v2037_v11  ;;  %vm2133_vm12 = vcmp.ge.f32.partialorder %v2037_v11, 0.0  ;;  %v909_v22 = vmul.f32 %v7609_v21, %v789_v62  ;;  %v2123_v38 = vpop.f32.mrf.mxu1 }
 0x456   :  { %7613 = vst [vmem:[#allocation78_spill] sm:$0xff] %v6011_v54  ;;  %v6029_v45 = vpop.permute.xlu1 %2272  ;;  %vm885_vm13 = vcmp.ge.f32.partialorder %v789_v62, 0.0  ;;  %v2159_v30 = vmul.f32 %v5984_v14, %v2120_v42  ;;  %vm2135_vm14 = vcmp.ge.f32.partialorder %v2120_v42, 0.0  ;;  %v911_v20 = vmul.f32 %v7609_v21, %v872_v47 }
 0x457   :  { %7614 = vst [vmem:[#allocation24_spill] sm:$0xff] %v6019_v41  ;;  %v2169_v28 = vsel %vm2133_vm12, %v2037_v11, %v2157_v4  ;;  %v921_v37 = vsel %vm885_vm13, %v789_v62, %v909_v22  ;;  %vm887_vm15 = vcmp.ge.f32.partialorder %v872_v47, 0.0  ;;  %v2124_v34 = vadd.f32 %v2123_v38, %v5977_v8  ;;  %v7631_v62 = vld [vmem:[#allocation19_spill] sm:$0xff] }
 0x458   :  { %2487 = vrot.lane.b32.xlu0 %v5941_v63, %s3365_s19  ;;  %2307 = vrot.lane.b32.xlu1 %v5935_v13, %s3361_s18  ;;  %v6085_v40 = vadd.f32 %v2169_v28, %v921_v37  ;;  %v2171_v39 = vsel %vm2135_vm14, %v2120_v42, %v2159_v30  ;;  %v923_v14 = vsel %vm887_vm15, %v872_v47, %v911_v20  ;;  %v7633_v47 = vld [vmem:[#allocation11_spill] sm:$0xff] }
 0x459   :  { %v6025_v50 = vpop.permute.xlu0 %2364  ;;  %v6095_v21 = vadd.f32 %v2171_v39, %v923_v14  ;;  %v876_v4 = vadd.f32 %v7631_v62, %v7630_v27  ;;  %v2041_v42 = vadd.f32 %v2040_v29, %v5977_v8  ;;  %v2162_v22 = vmul.f32 %v5927_v56, %v2124_v34  ;;  %v7634_v30 = vld [vmem:[#allocation23_spill] sm:$0xff] }
 0x45a   :  { %7616 = vst [vmem:[#allocation66_spill] sm:$0xff] %v6025_v50  ;;  %v6041_v57 = vpop.permute.xlu1 %2280  ;;  %7625 = vst [vmem:[#allocation84_spill] sm:$0xff] %v6085_v40  ;;  %vm2138_vm8 = vcmp.ge.f32.partialorder %v2124_v34, 0.0  ;;  %v793_v28 = vadd.f32 %v7633_v47, %v7630_v27  ;;  %v7641_v50 = vld [vmem:[#allocation2_spill] sm:$0xff] }
 0x45b   :  { %7618 = vst [vmem:[#allocation67_spill] sm:$0xff] %v6041_v57  ;;  %v914_v20 = vmul.f32 %v7634_v30, %v876_v4  ;;  %vm890_vm10 = vcmp.ge.f32.partialorder %v876_v4, 0.0  ;;  %v2160_v39 = vmul.f32 %v5927_v56, %v2041_v42  ;;  %v2174_v14 = vsel %vm2138_vm8, %v2124_v34, %v2162_v22 }
 0x45c   :  { %2739 = vrot.lane.b32.xlu0 %v5941_v63, %s3371_s22  ;;  %2319 = vrot.lane.b32.xlu1 %v5941_v63, %s3361_s18  ;;  %vm2136_vm11 = vcmp.ge.f32.partialorder %v2041_v42, 0.0  ;;  %v912_v38 = vmul.f32 %v7634_v30, %v793_v28  ;;  %vm888_vm12 = vcmp.ge.f32.partialorder %v793_v28, 0.0 }
 0x45d   :  { %v6035_v48 = vpop.permute.xlu0 %2360  ;;  %v926_v29 = vsel %vm890_vm10, %v876_v4, %v914_v20  ;;  %v2172_v53 = vsel %vm2136_vm11, %v2041_v42, %v2160_v39 }
 0x45e   :  { %7617 = vst [vmem:[#allocation65_spill] sm:$0xff] %v6035_v48  ;;  %v6049_v61 = vpop.permute.xlu1 %2448  ;;  %v6139_v62 = vadd.f32 %v2174_v14, %v926_v29  ;;  %v924_v34 = vsel %vm888_vm12, %v793_v28, %v912_v38  ;;  %v2042_v14 = vpop.f32.mrf.mxu0 }
 0x45f   :  { %7619 = vst [vmem:[#allocation79_spill] sm:$0xff] %v6049_v61  ;;  %v6149_v22 = vadd.f32 %v2172_v53, %v924_v34  ;;  %v2043_v29 = vadd.f32 %v2042_v14, %v5977_v8 }
 0x460   :  { %2229 = vrot.lane.b32.xlu0 %v5961_v43, %s3358_s25  ;;  %2475 = vrot.lane.b32.xlu1 %v5935_v13, %s3365_s19  ;;  %7635 = vst [vmem:[#allocation53_spill] sm:$0xff] %v6139_v62 }
 0x461   :  { %v6045_v31 = vpop.permute.xlu0 %2356  ;;  %7638 = vst [vmem:[#allocation88_spill] sm:$0xff] %v6149_v22  ;;  %vm2137_vm13 = vcmp.ge.f32.partialorder %v2043_v29, 0.0 }
 0x462   :  { %v6064_v0 = vpop.permute.xlu1 %2444 }
 0x463   :  { %7622 = vst [vmem:[#allocation76_spill] sm:$0xff] %v6064_v0 }
 0x464   :  { %2241 = vrot.lane.b32.xlu0 %v5967_v60, %s3358_s25  ;;  %2559 = vrot.lane.b32.xlu1 %v5935_v13, %s3366_s20 }
 0x465   :  { %v6055_v36 = vpop.permute.xlu0 %2532 }
 0x466   :  { %7620 = vst [vmem:[#allocation74_spill] sm:$0xff] %v6055_v36  ;;  %v6078_v26 = vpop.permute.xlu1 %2440 }
 0x468   :  { %2325 = vrot.lane.b32.xlu0 %v5967_v60, %s3361_s18  ;;  %2571 = vrot.lane.b32.xlu1 %v5941_v63, %s3366_s20 }
 0x469   :  { %v6070_v2 = vpop.permute.xlu0 %2528 }
 0x46a   :  { %7623 = vst [vmem:[#allocation39_spill] sm:$0xff] %v6070_v2  ;;  %v6089_v3 = vpop.permute.xlu1 %2616 }
 0x46b   :  { %7626 = vst [vmem:[#allocation83_spill] sm:$0xff] %v6089_v3  ;;  %v2161_v3 = vmul.f32 %v5927_v56, %v2043_v29 }
 0x46c   :  { %2565 = vrot.lane.b32.xlu0 %v5961_v43, %s3366_s20  ;;  %2643 = vrot.lane.b32.xlu1 %v5935_v13, %s3368_s21 }
 0x46d   :  { %v6087_v25 = vpop.permute.xlu0 %2524  ;;  %v2173_v57 = vsel %vm2137_vm13, %v2043_v29, %v2161_v3 }
 0x46e   :  { %v6103_v32 = vpop.permute.xlu1 %2612 }
 0x46f   :  { %7627 = vst [vmem:[#allocation94_spill] sm:$0xff] %v6103_v32 }
 0x470   :  { %2577 = vrot.lane.b32.xlu0 %v5967_v60, %s3366_s20  ;;  %2655 = vrot.lane.b32.xlu1 %v5941_v63, %s3368_s21 }
 0x471   :  { %v6099_v46 = vpop.permute.xlu0 %2608 }
 0x472   :  { %v6112_v11 = vpop.permute.xlu1 %2784 }
 0x473   :  { %7629 = vst [vmem:[#allocation51_spill] sm:$0xff] %v6112_v11 }
 0x474   :  { %2649 = vrot.lane.b32.xlu0 %v5961_v43, %s3368_s21  ;;  %2727 = vrot.lane.b32.xlu1 %v5935_v13, %s3371_s22 }
 0x475   :  { %v6109_v7 = vpop.permute.xlu0 %2700 }
 0x476   :  { %7628 = vst [vmem:[#allocation81_spill] sm:$0xff] %v6109_v7  ;;  %v6131_v37 = vpop.permute.xlu1 %2692  ;;  %v7640_v7 = vld [vmem:[#allocation15_spill] sm:$0xff] }
 0x477   :  { %v795_v55 = vadd.f32 %v7640_v7, %v7630_v27  ;;  %v878_v7 = vadd.f32 %v7641_v50, %v7630_v27 }
 0x478   :  { %2661 = vrot.lane.b32.xlu0 %v5967_v60, %s3368_s21  ;;  %2313 = vrot.lane.b32.xlu1 %v5961_v43, %s3361_s18 }
 0x479   :  { %v6124_v12 = vpop.permute.xlu0 %2696  ;;  %v913_v14 = vmul.f32 %v7634_v30, %v795_v55  ;;  %vm889_vm14 = vcmp.ge.f32.partialorder %v795_v55, 0.0  ;;  %vm891_vm8 = vcmp.ge.f32.partialorder %v878_v7, 0.0 }
 0x47a   :  { %7632 = vst [vmem:[#allocation40_spill] sm:$0xff] %v6124_v12  ;;  %v6143_v11 = vpop.permute.xlu1 %2868 }
 0x47b   :  { %7637 = vst [vmem:[#allocation97_spill] sm:$0xff] %v6143_v11  ;;  %v2125_v11 = vpop.f32.mrf.mxu1 }
 0x47c   :  { %2225 = vrot.lane.b32.xlu0 %v6009_v35, %s3358_s25  ;;  %2397 = vrot.lane.b32.xlu1 %v5961_v43, %s3363_s0  ;;  %v2126_v36 = vadd.f32 %v2125_v11, %v5977_v8  ;;  %v915_v11 = vmul.f32 %v7634_v30, %v878_v7  ;;  %v7643_v30 = vld [vmem:[#allocation28_spill] sm:$0xff] }
 0x47d   :  { %v6141_v47 = vpop.permute.xlu0 %2780 }
 0x47e   :  { %7636 = vst [vmem:[#allocation96_spill] sm:$0xff] %v6141_v47  ;;  %v6157_v42 = vpop.permute.xlu1 %2776  ;;  %v2163_v49 = vmul.f32 %v5927_v56, %v2126_v36  ;;  %vm2139_vm15 = vcmp.ge.f32.partialorder %v2126_v36, 0.0 }
 0x480   :  { %2237 = vrot.lane.b32.xlu0 %v6019_v41, %s3358_s25  ;;  %2409 = vrot.lane.b32.xlu1 %v5967_v60, %s3363_s0  ;;  %v2175_v16 = vsel %vm2139_vm15, %v2126_v36, %v2163_v49 }
 0x481   :  { %v6153_v4 = vpop.permute.xlu0 %2864 }
 0x482   :  { %7639 = vst [vmem:[#allocation41_spill] sm:$0xff] %v6153_v4  ;;  %v925_v4 = vsel %vm889_vm14, %v795_v55, %v913_v14 }
 0x483   :  { %v6211_v50 = vadd.f32 %v2173_v57, %v925_v4  ;;  %v927_v57 = vsel %vm891_vm8, %v878_v7, %v915_v11  ;;  %v2211_v7 = vmul.f32 %v6013_v24, %v5935_v13  ;;  %v7645_v11 = vld [vmem:[#allocation31_spill] sm:$0xff] }
 0x484   :  { %2309 = vrot.lane.b32.xlu0 %v6009_v35, %s3361_s18  ;;  %2481 = vrot.lane.b32.xlu1 %v5961_v43, %s3365_s19  ;;  %v6227_v49 = vadd.f32 %v2175_v16, %v927_v57  ;;  %v2214_v16 = vmul.f32 %v6013_v24, %v5967_v60  ;;  %v7646_v57 = vld [vmem:[#allocation32_spill] sm:$0xff] }
 0x485   :  { %7642 = vst [vmem:[#allocation49_spill] sm:$0xff] %v6211_v50 }
 0x486   :  { %7644 = vst [vmem:[#allocation90_spill] sm:$0xff] %v6227_v49 }
 0x488   :  { %2321 = vrot.lane.b32.xlu0 %v6019_v41, %s3361_s18  ;;  %2493 = vrot.lane.b32.xlu1 %v5967_v60, %s3365_s19 }
 0x48c   :  { %2477 = vrot.lane.b32.xlu0 %v6009_v35, %s3365_s19  ;;  %2733 = vrot.lane.b32.xlu1 %v5961_v43, %s3371_s22 }
 0x490   :  { %2489 = vrot.lane.b32.xlu0 %v6019_v41, %s3365_s19  ;;  %2745 = vrot.lane.b32.xlu1 %v5967_v60, %s3371_s22 }
 0x494   :  { %2561 = vrot.lane.b32.xlu0 %v6009_v35, %s3366_s20  ;;  %2393 = vrot.lane.b32.xlu1 %v6009_v35, %s3363_s0 }
 0x498   :  { %2573 = vrot.lane.b32.xlu0 %v6019_v41, %s3366_s20  ;;  %2405 = vrot.lane.b32.xlu1 %v6019_v41, %s3363_s0 }
 0x49c   :  { %2813 = vrot.lane.b32.xlu0 %v6009_v35, %s3372_s23  ;;  %2645 = vrot.lane.b32.xlu1 %v6009_v35, %s3368_s21 }
 0x4a0   :  { %2399 = vrot.lane.b32.xlu0 %v6085_v40, %s3363_s0  ;;  %2657 = vrot.lane.b32.xlu1 %v6019_v41, %s3368_s21 }
 0x4a4   :  { %2411 = vrot.lane.b32.xlu0 %v6095_v21, %s3363_s0  ;;  %2729 = vrot.lane.b32.xlu1 %v6009_v35, %s3371_s22 }
 0x4a8   :  { %2651 = vrot.lane.b32.xlu0 %v6085_v40, %s3368_s21  ;;  %2741 = vrot.lane.b32.xlu1 %v6019_v41, %s3371_s22 }
 0x4ac   :  { %2663 = vrot.lane.b32.xlu0 %v6095_v21, %s3368_s21  ;;  %2231 = vrot.lane.b32.xlu1 %v6085_v40, %s3358_s25 }
 0x4b0   :  { %2735 = vrot.lane.b32.xlu0 %v6085_v40, %s3371_s22  ;;  %2243 = vrot.lane.b32.xlu1 %v6095_v21, %s3358_s25 }
 0x4b4   :  { %2747 = vrot.lane.b32.xlu0 %v6095_v21, %s3371_s22  ;;  %2315 = vrot.lane.b32.xlu1 %v6085_v40, %s3361_s18 }
 0x4b8   :  { %2323 = vrot.lane.b32.xlu0 %v6139_v62, %s3361_s18  ;;  %2327 = vrot.lane.b32.xlu1 %v6095_v21, %s3361_s18 }
 0x4bc   :  { %2479 = vrot.lane.b32.xlu0 %v6149_v22, %s3365_s19  ;;  %2483 = vrot.lane.b32.xlu1 %v6085_v40, %s3365_s19 }
 0x4c0   :  { %2491 = vrot.lane.b32.xlu0 %v6139_v62, %s3365_s19  ;;  %2495 = vrot.lane.b32.xlu1 %v6095_v21, %s3365_s19 }
 0x4c2   :  { %v6163_v28 = vpop.permute.xlu0 %2391  ;;  %v6165_v53 = vpop.permute.xlu1 %2223 }
 0x4c4   :  { %2659 = vrot.lane.b32.xlu0 %v6139_v62, %s3368_s21  ;;  %2567 = vrot.lane.b32.xlu1 %v6085_v40, %s3366_s20 }
 0x4c6   :  { %v6171_v20 = vpop.permute.xlu0 %2403  ;;  %v6173_v39 = vpop.permute.xlu1 %2235 }
 0x4c8   :  { %2731 = vrot.lane.b32.xlu0 %v6149_v22, %s3371_s22  ;;  %2579 = vrot.lane.b32.xlu1 %v6095_v21, %s3366_s20 }
 0x4ca   :  { %v6179_v38 = vpop.permute.xlu0 %2487  ;;  %v6182_v34 = vpop.permute.xlu1 %2307 }
 0x4cc   :  { %2743 = vrot.lane.b32.xlu0 %v6139_v62, %s3371_s22  ;;  %2819 = vrot.lane.b32.xlu1 %v6085_v40, %s3372_s23 }
 0x4ce   :  { %v6190_v19 = vpop.permute.xlu0 %2739  ;;  %v6194_v61 = vpop.permute.xlu1 %2319 }
 0x4d0   :  { %2815 = vrot.lane.b32.xlu0 %v6149_v22, %s3372_s23  ;;  %2227 = vrot.lane.b32.xlu1 %v6149_v22, %s3358_s25 }
 0x4d2   :  { %v2230_v15 = vpop.permute.xlu0 %2229  ;;  %v6204_v8 = vpop.permute.xlu1 %2475 }
 0x4d4   :  { %2827 = vrot.lane.b32.xlu0 %v6139_v62, %s3372_s23  ;;  %2239 = vrot.lane.b32.xlu1 %v6139_v62, %s3358_s25 }
 0x4d6   :  { %v2242_v27 = vpop.permute.xlu0 %2241  ;;  %v6219_v29 = vpop.permute.xlu1 %2559 }
 0x4d7   :  { %v2247_v56 = vsel %vm76_vm0, %v6173_v39, %v2242_v27  ;;  %v2256_v3 = vsel %vm76_vm0, %v2242_v27, %v6165_v53 }
 0x4d8   :  { %v2259_v55 = vmul.f32 %v2256_v3, %v7496_v10  ;;  %v2262_v14 = vmul.f32 %v2247_v56, %v7643_v30  ;;  %2233 = vrot.lane.b32.xlu0 %v6211_v50, %s3358_s25  ;;  %2311 = vrot.lane.b32.xlu1 %v6149_v22, %s3361_s18 }
 0x4da   :  { %v2283_v36 = vmul.f32 %v6029_v45, %v2259_v55  ;;  %v2286_v4 = vmul.f32 %v6029_v45, %v2262_v14  ;;  %v2326_v27 = vpop.permute.xlu0 %2325  ;;  %v2572_v47 = vpop.permute.xlu1 %2571 }
 0x4db   :  { %v2331_v3 = vsel %vm149_vm1, %v6194_v61, %v2326_v27  ;;  %v2340_v56 = vsel %vm149_vm1, %v2326_v27, %v6182_v34 }
 0x4dc   :  { %v2343_v55 = vmul.f32 %v2340_v56, %v7645_v11  ;;  %v2346_v14 = vmul.f32 %v2331_v3, %v7646_v57  ;;  %2245 = vrot.lane.b32.xlu0 %v6227_v49, %s3358_s25  ;;  %2395 = vrot.lane.b32.xlu1 %v6149_v22, %s3363_s0  ;;  %v2295_v32 = vadd.f32 %v2283_v36, %v2211_v7  ;;  %v7647_v7 = vld [vmem:[#allocation25_spill] sm:$0xff]  ;;  %v7650_v11 = vld [vmem:[#allocation30_spill] sm:$0xff] }
 0x4dd   :  { %v2298_v12 = vadd.f32 %v2286_v4, %v2214_v16  ;;  %v7649_v57 = vld [vmem:[#allocation29_spill] sm:$0xff] }
 0x4de   :  { %v2367_v27 = vmul.f32 %v6045_v31, %v2343_v55  ;;  %v2370_v2 = vmul.f32 %v6045_v31, %v2346_v14  ;;  %v2566_v48 = vpop.permute.xlu0 %2565  ;;  %v6249_v0 = vpop.permute.xlu1 %2643  ;;  %v7648_v55 = vld [vmem:[#allocation26_spill] sm:$0xff] }
 0x4e0   :  { %v6251_v40 = vadd.f32 %v2367_v27, %v2295_v32  ;;  %v6253_v56 = vadd.f32 %v2370_v2, %v2298_v12  ;;  %2401 = vrot.lane.b32.xlu0 %v6211_v50, %s3363_s0  ;;  %2407 = vrot.lane.b32.xlu1 %v6139_v62, %s3363_s0  ;;  %v2250_v32 = vsel %vm76_vm0, %v2230_v15, %v6173_v39 }
 0x4e1   :  { %v2253_v2 = vsel %vm76_vm0, %v6165_v53, %v2230_v15  ;;  %v2261_v14 = vmul.f32 %v2250_v32, %v7648_v55 }
 0x4e2   :  { %v2578_v3 = vpop.permute.xlu0 %2577  ;;  %v2656_v36 = vpop.permute.xlu1 %2655  ;;  %v2260_v16 = vmul.f32 %v2253_v2, %v7647_v7 }
 0x4e3   :  { %v2285_v32 = vmul.f32 %v6029_v45, %v2261_v14 }
 0x4e4   :  { %2413 = vrot.lane.b32.xlu0 %v6227_v49, %s3363_s0  ;;  %2563 = vrot.lane.b32.xlu1 %v6149_v22, %s3366_s20  ;;  %v2284_v2 = vmul.f32 %v6029_v45, %v2260_v16 }
 0x4e6   :  { %v6269_v12 = vpop.permute.xlu0 %2649  ;;  %v6271_v4 = vpop.permute.xlu1 %2727 }
 0x4e8   :  { %2569 = vrot.lane.b32.xlu0 %v6211_v50, %s3366_s20  ;;  %2575 = vrot.lane.b32.xlu1 %v6139_v62, %s3366_s20 }
 0x4ea   :  { %v6279_v27 = vpop.permute.xlu0 %2661  ;;  %v2314_v39 = vpop.permute.xlu1 %2313 }
 0x4eb   :  { %v2334_v15 = vsel %vm149_vm1, %v2314_v39, %v6194_v61  ;;  %v2337_v53 = vsel %vm149_vm1, %v6182_v34, %v2314_v39  ;;  %v2212_v61 = vmul.f32 %v6013_v24, %v5961_v43  ;;  %v2213_v34 = vmul.f32 %v6013_v24, %v5941_v63 }
 0x4ec   :  { %2581 = vrot.lane.b32.xlu0 %v6227_v49, %s3366_s20  ;;  %v2344_v62 = vmul.f32 %v2337_v53, %v7649_v57  ;;  %v2345_v1 = vmul.f32 %v2334_v15, %v7650_v11  ;;  %2647 = vrot.lane.b32.xlu1 %v6149_v22, %s3368_s21  ;;  %v7651_v11 = vld [vmem:[#allocation33_spill] sm:$0xff]  ;;  %v7652_v57 = vld [vmem:[#allocation34_spill] sm:$0xff] }
 0x4ed   :  { %v2296_v53 = vadd.f32 %v2284_v2, %v2212_v61  ;;  %v2297_v22 = vadd.f32 %v2285_v32, %v2213_v34  ;;  %v2583_v32 = vsel %vm368_vm4, %v2572_v47, %v2578_v3 }
 0x4ee   :  { %v6295_v35 = vpop.permute.xlu0 %2225  ;;  %v2368_v39 = vmul.f32 %v6045_v31, %v2344_v62  ;;  %v2369_v16 = vmul.f32 %v6045_v31, %v2345_v1  ;;  %v2398_v45 = vpop.permute.xlu1 %2397  ;;  %v2586_v1 = vsel %vm368_vm4, %v2566_v48, %v2572_v47  ;;  %v7655_v47 = vld [vmem:[#allocation36_spill] sm:$0xff] }
 0x4ef   :  { %v2418_v14 = vsel %vm222_vm2, %v2398_v45, %v6171_v20  ;;  %v2421_v15 = vsel %vm222_vm2, %v6163_v28, %v2398_v45 }
 0x4f0   :  { %2825 = vrot.lane.b32.xlu0 %v6019_v41, %s3372_s23  ;;  %v2428_v24 = vmul.f32 %v2421_v15, %v7651_v11  ;;  %v2429_v62 = vmul.f32 %v2418_v14, %v7652_v57  ;;  %2317 = vrot.lane.b32.xlu1 %v6211_v50, %s3361_s18  ;;  %v2380_v54 = vadd.f32 %v2368_v39, %v2296_v53  ;;  %v7654_v14 = vld [vmem:[#allocation35_spill] sm:$0xff] }
 0x4f1   :  { %v2381_v30 = vadd.f32 %v2369_v16, %v2297_v22  ;;  %v6332_v22 = vld [vmem:[%s6982_s4 + $0x30] sm:$0xff] }
 0x4f2   :  { %v6317_v31 = vpop.permute.xlu0 %2237  ;;  %v2452_v45 = vmul.f32 %v6078_v26, %v2428_v24  ;;  %v2453_v41 = vmul.f32 %v6078_v26, %v2429_v62  ;;  %v2410_v2 = vpop.permute.xlu1 %2409  ;;  %7653 = vst [vmem:[#allocation85_spill] sm:$0xff] %v6332_v22 }
 0x4f3   :  { %v2415_v61 = vsel %vm222_vm2, %v6171_v20, %v2410_v2  ;;  %v2424_v34 = vsel %vm222_vm2, %v2410_v2, %v6163_v28  ;;  %v2589_v28 = vsel %vm368_vm4, %v6219_v29, %v2566_v48  ;;  %v7656_v20 = vld [vmem:[#allocation46_spill] sm:$0xff]  ;;  %v2667_v48 = vsel %vm441_vm5, %v2656_v36, %v6279_v27 }
 0x4f4   :  { %2860 = vperm.xlu0 %3334, %v6332_v22   ;;  %v2464_v39 = vadd.f32 %v2452_v45, %v2380_v54  ;;  %v2465_v16 = vadd.f32 %v2453_v41, %v2381_v30  ;;  %v2427_v15 = vmul.f32 %v2424_v34, %v7654_v14  ;;  %v2430_v53 = vmul.f32 %v2415_v61, %v7655_v47  ;;  %v7657_v61 = vld [vmem:[#allocation47_spill] sm:$0xff] }
 0x4f5   :  { %2329 = vrot.lane.b32.xlu1 %v6227_v49, %s3361_s18  ;;  %v2596_v24 = vmul.f32 %v2586_v1, %v7656_v20  ;;  %v2592_v54 = vsel %vm368_vm4, %v2578_v3, %v6219_v29  ;;  %v2670_v41 = vsel %vm441_vm5, %v6269_v12, %v2656_v36  ;;  %v2597_v34 = vmul.f32 %v2583_v32, %v7657_v61  ;;  %v7658_v32 = vld [vmem:[#allocation42_spill] sm:$0xff]  ;;  %v7659_v36 = vld [vmem:[#allocation45_spill] sm:$0xff] }
 0x4f6   :  { %v6343_v62 = vpop.permute.xlu0 %2309  ;;  %v2451_v30 = vmul.f32 %v6078_v26, %v2427_v15  ;;  %v2454_v45 = vmul.f32 %v6078_v26, %v2430_v53  ;;  %v2482_v2 = vpop.permute.xlu1 %2481  ;;  %v2595_v61 = vmul.f32 %v2589_v28, %v7659_v36  ;;  %v2680_v22 = vmul.f32 %v2670_v41, %v7535_v44 }
 0x4f7   :  { %v2502_v1 = vsel %vm295_vm3, %v2482_v2, %v6179_v38  ;;  %v2505_v29 = vsel %vm295_vm3, %v6204_v8, %v2482_v2  ;;  %v2620_v20 = vmul.f32 %v6099_v46, %v2596_v24  ;;  %v2598_v2 = vmul.f32 %v2592_v54, %v7365_v33 }
 0x4f8   :  { %2811 = vrot.lane.b32.xlu0 %v5935_v13, %s3372_s23  ;;  %v2463_v26 = vadd.f32 %v2451_v30, %v6251_v40  ;;  %v2466_v3 = vadd.f32 %v2454_v45, %v6253_v56  ;;  %v2512_v15 = vmul.f32 %v2505_v29, %v7658_v32  ;;  %v2513_v53 = vmul.f32 %v2502_v1, %v7564_v9  ;;  %v7660_v1 = vld [vmem:[#allocation37_spill] sm:$0xff] }
 0x4f9   :  { %2485 = vrot.lane.b32.xlu1 %v6211_v50, %s3365_s19  ;;  %3336 = vset.pattern.permute.xlu0 %v7589_v18  ;;  %v2673_v40 = vsel %vm441_vm5, %v6249_v0, %v6269_v12  ;;  %v2676_v56 = vsel %vm441_vm5, %v6279_v27, %v6249_v0  ;;  %v2621_v41 = vmul.f32 %v6099_v46, %v2597_v34 }
 0x4fa   :  { %v6375_v13 = vpop.permute.xlu0 %2321  ;;  %v2536_v28 = vmul.f32 %v6087_v25, %v2512_v15  ;;  %v2537_v24 = vmul.f32 %v6087_v25, %v2513_v53  ;;  %v2494_v54 = vpop.permute.xlu1 %2493  ;;  %v2681_v30 = vmul.f32 %v2667_v48, %v7567_v52  ;;  %v7661_v15 = vld [vmem:[#allocation44_spill] sm:$0xff]  ;;  %v2619_v34 = vmul.f32 %v6099_v46, %v2595_v61 }
 0x4fb   :  { %v2499_v45 = vsel %vm295_vm3, %v6179_v38, %v2494_v54  ;;  %v2508_v12 = vsel %vm295_vm3, %v2494_v54, %v6204_v8  ;;  %v2679_v38 = vmul.f32 %v2673_v40, %v7533_v5  ;;  %v2704_v48 = vmul.f32 %v6131_v37, %v2680_v22 }
 0x4fc   :  { %2823 = vrot.lane.b32.xlu0 %v5941_v63, %s3372_s23  ;;  %v2548_v0 = vadd.f32 %v2536_v28, %v2464_v39  ;;  %v2549_v27 = vadd.f32 %v2537_v24, %v2465_v16  ;;  %v2511_v29 = vmul.f32 %v2508_v12, %v7660_v1  ;;  %v2514_v53 = vmul.f32 %v2499_v45, %v7661_v15 }
 0x4fd   :  { %2497 = vrot.lane.b32.xlu1 %v6227_v49, %s3365_s19  ;;  %v2682_v8 = vmul.f32 %v2676_v56, %v7568_v59  ;;  %v2622_v45 = vmul.f32 %v6099_v46, %v2598_v2  ;;  %v2705_v12 = vmul.f32 %v6131_v37, %v2681_v30 }
 0x4fe   :  { %v6406_v54 = vpop.permute.xlu0 %2477  ;;  %v2632_v63 = vadd.f32 %v2620_v20, %v2548_v0  ;;  %v2633_v39 = vadd.f32 %v2621_v41, %v2549_v27  ;;  %v2535_v16 = vmul.f32 %v6087_v25, %v2511_v29  ;;  %v2538_v28 = vmul.f32 %v6087_v25, %v2514_v53  ;;  %v2734_v24 = vpop.permute.xlu1 %2733  ;;  %v3354_v20 = vld [vmem:[%s6982_s4 + $0x38] sm:$0xff] }
 0x4ff   :  { %v2754_v61 = vsel %vm514_vm6, %v2734_v24, %v6190_v19  ;;  %v2757_v22 = vsel %vm514_vm6, %v6271_v4, %v2734_v24  ;;  %v2703_v0 = vmul.f32 %v6131_v37, %v2679_v38  ;;  %v2706_v27 = vmul.f32 %v6131_v37, %v2682_v8 }
 0x500   :  { %2900 = vperm.xlu0 %3336, %v3354_v20   ;;  %v2547_v40 = vadd.f32 %v2535_v16, %v2463_v26  ;;  %v2550_v25 = vadd.f32 %v2538_v28, %v2466_v3  ;;  %v2716_v56 = vadd.f32 %v2704_v48, %v2632_v63  ;;  %v2763_v46 = vmul.f32 %v2757_v22, %v7581_v58 }
 0x501   :  { %2653 = vrot.lane.b32.xlu1 %v6211_v50, %s3368_s21  ;;  %v2764_v2 = vmul.f32 %v2754_v61, %v7582_v51  ;;  %v2717_v30 = vadd.f32 %v2705_v12, %v2633_v39  ;;  %v7662_v39 = vmov 10  }
 0x502   :  { %v6425_v41 = vpop.permute.xlu0 %2489  ;;  %v2631_v29 = vadd.f32 %v2619_v34, %v2547_v40  ;;  %v2634_v53 = vadd.f32 %v2622_v45, %v2550_v25  ;;  %v2746_v24 = vpop.permute.xlu1 %2745  ;;  %v2787_v26 = vmul.f32 %v6157_v42, %v2763_v46  ;;  %v7667_v25 = vmov 24  }
 0x503   :  { %v2788_v3 = vmul.f32 %v6157_v42, %v2764_v2  ;;  %v2751_v48 = vsel %vm514_vm6, %v6190_v19, %v2746_v24  ;;  %v2760_v63 = vsel %vm514_vm6, %v2746_v24, %v6271_v4 }
 0x504   :  { %3339 = vset.pattern.permute.xlu0 %v7662_v39  ;;  %v2715_v38 = vadd.f32 %v2703_v0, %v2631_v29  ;;  %v2718_v16 = vadd.f32 %v2706_v27, %v2634_v53  ;;  %v2765_v37 = vmul.f32 %v2751_v48, %v7583_v23  ;;  %v2766_v34 = vmul.f32 %v2760_v63, %v7584_v6 }
 0x505   :  { %2665 = vrot.lane.b32.xlu1 %v6227_v49, %s3368_s21  ;;  %v6442_v8 = vadd.f32 %v2788_v3, %v2716_v56  ;;  %2936 = vperm.xlu0 %3339, %v3354_v20  }
 0x506   :  { %v6444_v28 = vpop.permute.xlu0 %2561  ;;  %v6446_v19 = vadd.f32 %v2787_v26, %v2715_v38  ;;  %v2789_v4 = vmul.f32 %v6157_v42, %v2765_v37  ;;  %v2790_v45 = vmul.f32 %v6157_v42, %v2766_v34  ;;  %v2394_v12 = vpop.permute.xlu1 %2393  ;;  %v3355_v38 = vld [vmem:[%s6982_s4 + $0x40] sm:$0xff] }
 0x507   :  { %7663 = vst [vmem:[#allocation100_spill] sm:$0xff] %v6442_v8  ;;  %v7670_v8 = vld [vmem:[#allocation78_spill] sm:$0xff] }
 0x508   :  { %7664 = vst [vmem:[#allocation98_spill] sm:$0xff] %v6446_v19  ;;  %v6450_v61 = vadd.f32 %v2789_v4, %v2717_v30  ;;  %v6452_v22 = vadd.f32 %v2790_v45, %v2718_v16 }
 0x509   :  { %2737 = vrot.lane.b32.xlu1 %v6211_v50, %s3371_s22  ;;  %3342 = vset.pattern.permute.xlu0 %v7667_v25 }
 0x50a   :  { %7665 = vst [vmem:[#allocation38_spill] sm:$0xff] %v6450_v61  ;;  %7666 = vst [vmem:[#allocation89_spill] sm:$0xff] %v6452_v22  ;;  %v6456_v40 = vpop.permute.xlu0 %2573  ;;  %v2406_v20 = vpop.permute.xlu1 %2405 }
 0x50d   :  { %2749 = vrot.lane.b32.xlu1 %v6227_v49, %s3371_s22 }
 0x50e   :  { %v6461_v56 = vpop.permute.xlu0 %2813  ;;  %v2646_v46 = vpop.permute.xlu1 %2645 }
 0x50f   :  { %7668 = vst [vmem:[#allocation103_spill] sm:$0xff] %v6461_v56 }
 0x511   :  { %2821 = vrot.lane.b32.xlu1 %v6211_v50, %s3372_s23 }
 0x512   :  { %v2400_v42 = vpop.permute.xlu0 %2399  ;;  %v2658_v0 = vpop.permute.xlu1 %2657 }
 0x513   :  { %v2419_v2 = vsel %vm222_vm2, %v2400_v42, %v2406_v20  ;;  %v2422_v30 = vsel %vm222_vm2, %v2394_v12, %v2400_v42 }
 0x515   :  { %2833 = vrot.lane.b32.xlu1 %v6227_v49, %s3372_s23 }
 0x516   :  { %v2412_v27 = vpop.permute.xlu0 %2411  ;;  %v2730_v24 = vpop.permute.xlu1 %2729 }
 0x517   :  { %v2416_v29 = vsel %vm222_vm2, %v2406_v20, %v2412_v27  ;;  %v2425_v53 = vsel %vm222_vm2, %v2412_v27, %v2394_v12 }
 0x519   :  { %2831 = vrot.lane.b32.xlu1 %v6095_v21, %s3372_s23 }
 0x51a   :  { %v2652_v26 = vpop.permute.xlu0 %2651  ;;  %v2742_v63 = vpop.permute.xlu1 %2741 }
 0x51b   :  { %v6479_v3 = vsel %vm441_vm5, %v2652_v26, %v2658_v0  ;;  %v6483_v48 = vsel %vm441_vm5, %v2646_v46, %v2652_v26 }
 0x51d   :  { %2904 = vperm.xlu1 %3335, %v3355_v38  }
 0x51e   :  { %v2664_v16 = vpop.permute.xlu0 %2663  ;;  %v2232_v4 = vpop.permute.xlu1 %2231 }
 0x51f   :  { %v6490_v37 = vsel %vm441_vm5, %v2658_v0, %v2664_v16  ;;  %v6494_v34 = vsel %vm441_vm5, %v2664_v16, %v2646_v46  ;;  %v2251_v45 = vsel %vm76_vm0, %v2232_v4, %v6317_v31  ;;  %v2254_v12 = vsel %vm76_vm0, %v6295_v35, %v2232_v4 }
 0x520   :  { %v2264_v42 = vmul.f32 %v2254_v12, %v7647_v7  ;;  %v2265_v46 = vmul.f32 %v2251_v45, %v7648_v55  ;;  %v2432_v4 = vmul.f32 %v2422_v30, %v7651_v11  ;;  %v2433_v45 = vmul.f32 %v2419_v2, %v7652_v57  ;;  %v7672_v30 = vld [vmem:[#allocation105_spill] sm:$0xff]  ;;  %v7673_v2 = vld [vmem:[#allocation80_spill] sm:$0xff] }
 0x521   :  { %2817 = vrot.lane.b32.xlu1 %v5961_v43, %s3372_s23 }
 0x522   :  { %v2736_v20 = vpop.permute.xlu0 %2735  ;;  %3337 = vset.pattern.permute.xlu1 %v7662_v39  ;;  %v2244_v26 = vpop.permute.xlu1 %2243  ;;  %v2288_v19 = vmul.f32 %v7670_v8, %v2264_v42 }
 0x523   :  { %v6509_v0 = vsel %vm514_vm6, %v2736_v20, %v2742_v63  ;;  %v6513_v27 = vsel %vm514_vm6, %v2730_v24, %v2736_v20  ;;  %v2248_v43 = vsel %vm76_vm0, %v6317_v31, %v2244_v26  ;;  %v2257_v16 = vsel %vm76_vm0, %v2244_v26, %v6295_v35  ;;  %v7669_v20 = vld [vmem:[#allocation28_spill] sm:$0xff] }
 0x524   :  { %v2263_v12 = vmul.f32 %v2257_v16, %v7496_v10  ;;  %v2266_v22 = vmul.f32 %v2248_v43, %v7669_v20  ;;  %v2289_v31 = vmul.f32 %v7670_v8, %v2265_v46  ;;  %v2215_v26 = vmul.f32 %v7673_v2, %v7672_v30  ;;  %v7674_v16 = vld [vmem:[#allocation84_spill] sm:$0xff]  ;;  %v7677_v30 = vld [vmem:[#allocation30_spill] sm:$0xff] }
 0x525   :  { %2829 = vrot.lane.b32.xlu1 %v5967_v60, %s3372_s23  ;;  %v2216_v43 = vmul.f32 %v7673_v2, %v7674_v16  ;;  %v7675_v46 = vld [vmem:[#allocation24_spill] sm:$0xff] }
 0x526   :  { %v2748_v61 = vpop.permute.xlu0 %2747  ;;  %v2316_v35 = vpop.permute.xlu1 %2315  ;;  %v2217_v57 = vmul.f32 %v7673_v2, %v7675_v46  ;;  %v7678_v16 = vld [vmem:[#allocation76_spill] sm:$0xff]  ;;  %v2287_v55 = vmul.f32 %v7670_v8, %v2263_v12  ;;  %v2290_v7 = vmul.f32 %v7670_v8, %v2266_v22 }
 0x527   :  { %v6531_v49 = vsel %vm514_vm6, %v2742_v63, %v2748_v61  ;;  %v6535_v60 = vsel %vm514_vm6, %v2748_v61, %v2730_v24  ;;  %v2335_v42 = vsel %vm149_vm1, %v2316_v35, %v6375_v13  ;;  %v2338_v63 = vsel %vm149_vm1, %v6343_v62, %v2316_v35  ;;  %v7676_v24 = vld [vmem:[#allocation29_spill] sm:$0xff] }
 0x528   :  { %7671 = vst [vmem:[#allocation99_spill] sm:$0xff] %v6535_v60  ;;  %v2218_v61 = vmul.f32 %v7673_v2, %v6095_v21  ;;  %v2348_v11 = vmul.f32 %v2338_v63, %v7676_v24  ;;  %v2349_v20 = vmul.f32 %v2335_v42, %v7677_v30  ;;  %v2456_v50 = vmul.f32 %v7678_v16, %v2432_v4  ;;  %v7679_v60 = vld [vmem:[#allocation65_spill] sm:$0xff] }
 0x529   :  { %2940 = vperm.xlu1 %3337, %v3355_v38   ;;  %v2457_v10 = vmul.f32 %v7678_v16, %v2433_v45  ;;  %v2300_v56 = vadd.f32 %v2288_v19, %v2216_v43  ;;  %v2301_v46 = vadd.f32 %v2289_v31, %v2217_v57  ;;  %v2431_v42 = vmul.f32 %v2425_v53, %v7654_v14  ;;  %v7680_v57 = vld [vmem:[#allocation31_spill] sm:$0xff]  ;;  %v7682_v31 = vld [vmem:[#allocation85_spill] sm:$0xff] }
 0x52a   :  { %v6557_v35 = vpop.permute.xlu0 %2323  ;;  %v2372_v6 = vmul.f32 %v7679_v60, %v2348_v11  ;;  %v2373_v21 = vmul.f32 %v7679_v60, %v2349_v20  ;;  %v2328_v2 = vpop.permute.xlu1 %2327  ;;  %v2434_v38 = vmul.f32 %v2416_v29, %v7655_v47  ;;  %v7681_v11 = vld [vmem:[#allocation32_spill] sm:$0xff]  ;;  %v2299_v20 = vadd.f32 %v2287_v55, %v2215_v26 }
 0x52b   :  { %v2332_v4 = vsel %vm149_vm1, %v6375_v13, %v2328_v2  ;;  %v2341_v8 = vsel %vm149_vm1, %v2328_v2, %v6343_v62  ;;  %v2302_v53 = vadd.f32 %v2290_v7, %v2218_v61 }
 0x52c   :  { %v2384_v22 = vadd.f32 %v2372_v6, %v2300_v56  ;;  %v2385_v19 = vadd.f32 %v2373_v21, %v2301_v46  ;;  %v2347_v45 = vmul.f32 %v2341_v8, %v7680_v57  ;;  %v2350_v12 = vmul.f32 %v2332_v4, %v7681_v11 }
 0x52d   :  { %3338 = vset.pattern.permute.xlu1 %v7589_v18  ;;  %v2455_v56 = vmul.f32 %v7678_v16, %v2431_v42  ;;  %v2458_v46 = vmul.f32 %v7678_v16, %v2434_v38 }
 0x52e   :  { %2896 = vperm.xlu1 %3338, %v7682_v31   ;;  %v6573_v29 = vpop.permute.xlu0 %2479  ;;  %v2371_v13 = vmul.f32 %v7679_v60, %v2347_v45  ;;  %v2374_v43 = vmul.f32 %v7679_v60, %v2350_v12  ;;  %v2468_v63 = vadd.f32 %v2456_v50, %v2384_v22  ;;  %v2469_v62 = vadd.f32 %v2457_v10, %v2385_v19  ;;  %v2484_v6 = vpop.permute.xlu1 %2483  ;;  %v7683_v60 = vld [vmem:[#allocation39_spill] sm:$0xff]  ;;  %v6604_v12 = vld [vmem:[%s6985_s5 + $0x38] sm:$0xff] }
 0x52f   :  { %v2503_v18 = vsel %vm295_vm3, %v2484_v6, %v6425_v41  ;;  %v2506_v7 = vsel %vm295_vm3, %v6406_v54, %v2484_v6  ;;  %7684 = vst [vmem:[#allocation87_spill] sm:$0xff] %v6604_v12  ;;  %2974 = vperm.xlu0 %3342, %v6604_v12  }
 0x530   :  { %v2383_v55 = vadd.f32 %v2371_v13, %v2299_v20  ;;  %v2386_v26 = vadd.f32 %v2374_v43, %v2302_v53  ;;  %v2516_v61 = vmul.f32 %v2506_v7, %v7658_v32  ;;  %v2517_v50 = vmul.f32 %v2503_v18, %v7564_v9  ;;  %v6618_v43 = vld [vmem:[%s6985_s5 + $0x30] sm:$0xff] }
 0x531   :  { %v2683_v20 = vmul.f32 %v6483_v48, %v7533_v5  ;;  %7685 = vst [vmem:[#allocation101_spill] sm:$0xff] %v6618_v43  ;;  %v7687_v18 = vld [vmem:[#allocation40_spill] sm:$0xff] }
 0x532   :  { %3340 = vset.pattern.permute.xlu1 %v7662_v39  ;;  %v6588_v10 = vpop.permute.xlu0 %2491  ;;  %v2540_v16 = vmul.f32 %v7683_v60, %v2516_v61  ;;  %v2541_v21 = vmul.f32 %v7683_v60, %v2517_v50  ;;  %v2467_v2 = vadd.f32 %v2455_v56, %v2383_v55  ;;  %v2470_v42 = vadd.f32 %v2458_v46, %v2386_v26  ;;  %v2496_v38 = vpop.permute.xlu1 %2495  ;;  %v7686_v56 = vld [vmem:[#allocation46_spill] sm:$0xff] }
 0x533   :  { %2932 = vperm.xlu1 %3340, %v7682_v31   ;;  %v2500_v4 = vsel %vm295_vm3, %v6425_v41, %v2496_v38  ;;  %v2509_v8 = vsel %vm295_vm3, %v2496_v38, %v6406_v54  ;;  %v2684_v54 = vmul.f32 %v6479_v3, %v7535_v44  ;;  %v2707_v7 = vmul.f32 %v7687_v18, %v2683_v20 }
 0x534   :  { %v2552_v39 = vadd.f32 %v2540_v16, %v2468_v63  ;;  %v2553_v22 = vadd.f32 %v2541_v21, %v2469_v62  ;;  %v2515_v19 = vmul.f32 %v2509_v8, %v7660_v1  ;;  %v2518_v45 = vmul.f32 %v2500_v4, %v7661_v15 }
 0x535   :  { %v7689_v26 = vmov 25   ;;  %v2708_v61 = vmul.f32 %v7687_v18, %v2684_v54  ;;  %v2685_v50 = vmul.f32 %v6490_v37, %v7567_v52  ;;  %v2768_v38 = vmul.f32 %v6509_v0, %v7582_v51 }
 0x536   :  { %v6608_v53 = vpop.permute.xlu0 %2659  ;;  %v2539_v41 = vmul.f32 %v7683_v60, %v2515_v19  ;;  %v2542_v31 = vmul.f32 %v7683_v60, %v2518_v45  ;;  %v2568_v13 = vpop.permute.xlu1 %2567  ;;  %3344 = vset.pattern.permute.xlu0 %v7689_v26  ;;  %v7690_v60 = vld [vmem:[#allocation94_spill] sm:$0xff]  ;;  %v7692_v45 = vld [vmem:[#allocation47_spill] sm:$0xff]  ;;  %v2769_v0 = vmul.f32 %v6531_v49, %v7583_v23 }
 0x537   :  { %3341 = vset.pattern.permute.xlu1 %v7667_v25  ;;  %v2587_v48 = vsel %vm368_vm4, %v2568_v13, %v6456_v40  ;;  %v2590_v3 = vsel %vm368_vm4, %v6444_v28, %v2568_v13  ;;  %v2767_v25 = vmul.f32 %v6513_v27, %v7581_v58  ;;  %3171 = vperm.xlu0 %3344, %v6604_v12   ;;  %v7695_v13 = vld [vmem:[#allocation99_spill] sm:$0xff]  ;;  %v7713_v58 = vld [vmem:[#allocation28_spill] sm:$0xff] }
 0x538   :  { %2969 = vperm.xlu1 %3341, %v6618_v43   ;;  %v2551_v63 = vadd.f32 %v2539_v41, %v2467_v2  ;;  %v2554_v62 = vadd.f32 %v2542_v31, %v2470_v42  ;;  %v2599_v6 = vmul.f32 %v2590_v3, %v7659_v36  ;;  %v2600_v46 = vmul.f32 %v2587_v48, %v7686_v56  ;;  %v6644_v42 = vld [vmem:[%s6985_s5 + $0x40] sm:$0xff]  ;;  %v7694_v31 = vld [vmem:[#allocation57_spill] sm:$0xff] }
 0x539   :  { %7691 = vst [vmem:[#allocation109_spill] sm:$0xff] %v6644_v42  ;;  %v2686_v27 = vmul.f32 %v6494_v34, %v7568_v59  ;;  %v7693_v34 = vld [vmem:[#allocation96_spill] sm:$0xff] }
 0x53a   :  { %v6633_v55 = vpop.permute.xlu0 %2731  ;;  %v2623_v16 = vmul.f32 %v7690_v60, %v2599_v6  ;;  %v2624_v21 = vmul.f32 %v7690_v60, %v2600_v46  ;;  %v2580_v2 = vpop.permute.xlu1 %2579  ;;  %v2791_v41 = vmul.f32 %v7693_v34, %v2767_v25  ;;  %v2709_v46 = vmul.f32 %v7687_v18, %v2685_v50 }
 0x53b   :  { %7688 = vst [vmem:[#allocation91_spill] sm:$0xff] %v6633_v55  ;;  %v2584_v37 = vsel %vm368_vm4, %v6456_v40, %v2580_v2  ;;  %v2593_v4 = vsel %vm368_vm4, %v2580_v2, %v6444_v28  ;;  %v2770_v40 = vmul.f32 %v7695_v13, %v7694_v31  ;;  %v2792_v25 = vmul.f32 %v7693_v34, %v2768_v38 }
 0x53c   :  { %2979 = vperm.xlu1 %3341, %v6644_v42   ;;  %v2635_v8 = vadd.f32 %v2623_v16, %v2551_v63  ;;  %v2636_v19 = vadd.f32 %v2624_v21, %v2552_v39  ;;  %v2601_v20 = vmul.f32 %v2584_v37, %v7692_v45  ;;  %v2602_v54 = vmul.f32 %v2593_v4, %v7365_v33  ;;  %v7696_v21 = vld [vmem:[#allocation103_spill] sm:$0xff]  ;;  %v7697_v37 = vld [vmem:[#allocation60_spill] sm:$0xff] }
 0x53d   :  { %v2710_v16 = vmul.f32 %v7687_v18, %v2686_v27  ;;  %v2794_v27 = vmul.f32 %v7693_v34, %v2770_v40 }
 0x53e   :  { %v6665_v48 = vpop.permute.xlu0 %2743  ;;  %v2719_v3 = vadd.f32 %v2707_v7, %v2635_v8  ;;  %v2720_v28 = vadd.f32 %v2708_v61, %v2636_v19  ;;  %v2625_v6 = vmul.f32 %v7690_v60, %v2601_v20  ;;  %v2626_v39 = vmul.f32 %v7690_v60, %v2602_v54  ;;  %v2820_v63 = vpop.permute.xlu1 %2819  ;;  %v7699_v19 = vld [vmem:[#allocation41_spill] sm:$0xff] }
 0x53f   :  { %v2842_v49 = vsel %vm587_vm7, %v7696_v21, %v2820_v63  ;;  %v2793_v60 = vmul.f32 %v7693_v34, %v2769_v0 }
 0x540   :  { %3343 = vset.pattern.permute.xlu1 %v7689_v26  ;;  %v2637_v2 = vadd.f32 %v2625_v6, %v2553_v22  ;;  %v2638_v7 = vadd.f32 %v2626_v39, %v2554_v62  ;;  %v2803_v61 = vadd.f32 %v2791_v41, %v2719_v3  ;;  %v2851_v4 = vmul.f32 %v2842_v49, %v7697_v37  ;;  %v7709_v37 = vld [vmem:[#allocation67_spill] sm:$0xff] }
 0x541   :  { %3167 = vperm.xlu1 %3343, %v6618_v43   ;;  %v2804_v18 = vadd.f32 %v2792_v25, %v2720_v28 }
 0x542   :  { %v6679_v50 = vpop.permute.xlu0 %2815  ;;  %v2721_v38 = vadd.f32 %v2709_v46, %v2637_v2  ;;  %v2722_v8 = vadd.f32 %v2710_v16, %v2638_v7  ;;  %v2875_v20 = vmul.f32 %v7699_v19, %v2851_v4  ;;  %v2228_v54 = vpop.permute.xlu1 %2227 }
 0x543   :  { %7698 = vst [vmem:[#allocation108_spill] sm:$0xff] %v6679_v50 }
 0x544   :  { %v6683_v26 = vadd.f32 %v2875_v20, %v2803_v61  ;;  %v6685_v22 = vadd.f32 %v2793_v60, %v2721_v38  ;;  %v6687_v62 = vadd.f32 %v2794_v27, %v2722_v8  ;;  %v7704_v60 = vld [vmem:[#allocation61_spill] sm:$0xff] }
 0x545   :  { %3175 = vperm.xlu1 %3343, %v6644_v42  }
 0x546   :  { %7700 = vst [vmem:[#allocation86_spill] sm:$0xff] %v6683_v26  ;;  %7701 = vst [vmem:[#allocation50_spill] sm:$0xff] %v6685_v22  ;;  %v6690_v41 = vpop.permute.xlu0 %2827  ;;  %v2240_v0 = vpop.permute.xlu1 %2239  ;;  %v7706_v22 = vld [vmem:[#allocation25_spill] sm:$0xff] }
 0x547   :  { %7702 = vst [vmem:[#allocation106_spill] sm:$0xff] %v6687_v62  ;;  %7703 = vst [vmem:[#allocation93_spill] sm:$0xff] %v6690_v41  ;;  %v7715_v41 = vld [vmem:[#allocation90_spill] sm:$0xff] }
 0x54a   :  { %v2234_v13 = vpop.permute.xlu0 %2233  ;;  %v2312_v3 = vpop.permute.xlu1 %2311 }
 0x54b   :  { %v2255_v26 = vsel %vm76_vm0, %v2228_v54, %v2234_v13  ;;  %v2252_v62 = vsel %vm76_vm0, %v2234_v13, %v2240_v0 }
 0x54e   :  { %v2246_v28 = vpop.permute.xlu0 %2245  ;;  %v2396_v34 = vpop.permute.xlu1 %2395 }
 0x54f   :  { %v2249_v23 = vsel %vm76_vm0, %v2240_v0, %v2246_v28 }
 0x550   :  { %v2270_v0 = vmul.f32 %v2249_v23, %v7713_v58  ;;  %v7716_v58 = vld [vmem:[#allocation33_spill] sm:$0xff] }
 0x552   :  { %v2402_v40 = vpop.permute.xlu0 %2401  ;;  %v2408_v6 = vpop.permute.xlu1 %2407 }
 0x556   :  { %v2414_v39 = vpop.permute.xlu0 %2413  ;;  %v6692_v46 = vpop.permute.xlu1 %2563 }
 0x55a   :  { %v2570_v16 = vpop.permute.xlu0 %2569  ;;  %v6694_v25 = vpop.permute.xlu1 %2575 }
 0x55e   :  { %v6696_v49 = vpop.permute.xlu0 %2581  ;;  %v6698_v2 = vpop.permute.xlu1 %2647 }
 0x562   :  { %v6700_v7 = vpop.permute.xlu0 %2825  ;;  %v2318_v4 = vpop.permute.xlu1 %2317 }
 0x563   :  { %v2839_v61 = vsel %vm587_vm7, %v2820_v63, %v6700_v7  ;;  %v2268_v63 = vmul.f32 %v2255_v26, %v7706_v22  ;;  %v7710_v26 = vld [vmem:[#allocation49_spill] sm:$0xff]  ;;  %v7711_v22 = vld [vmem:[#allocation82_spill] sm:$0xff] }
 0x564   :  { %v2852_v27 = vmul.f32 %v2839_v61, %v7704_v60  ;;  %v2258_v61 = vsel %vm76_vm0, %v2246_v28, %v2228_v54  ;;  %v2220_v51 = vmul.f32 %v7711_v22, %v7710_v26  ;;  %v2336_v26 = vsel %vm149_vm1, %v2318_v4, %v6557_v35 }
 0x565   :  { %v2292_v31 = vmul.f32 %v7709_v37, %v2268_v63 }
 0x566   :  { %v2876_v38 = vmul.f32 %v7699_v19, %v2852_v27  ;;  %v7707_v27 = vld [vmem:[#allocation26_spill] sm:$0xff]  ;;  %v2339_v19 = vsel %vm149_vm1, %v2312_v3, %v2318_v4 }
 0x567   :  { %v2330_v8 = vpop.permute.xlu1 %2329 }
 0x568   :  { %v6707_v20 = vadd.f32 %v2876_v38, %v2804_v18  ;;  %v2269_v18 = vmul.f32 %v2252_v62, %v7707_v27  ;;  %v7708_v38 = vld [vmem:[#allocation27_spill] sm:$0xff]  ;;  %v2423_v62 = vsel %vm222_vm2, %v2396_v34, %v2402_v40  ;;  %v2342_v27 = vsel %vm149_vm1, %v2330_v8, %v2312_v3 }
 0x569   :  { %v2333_v3 = vsel %vm149_vm1, %v6557_v35, %v2330_v8  ;;  %v2436_v23 = vmul.f32 %v2423_v62, %v7716_v58  ;;  %v2351_v4 = vmul.f32 %v2342_v27, %v7680_v57  ;;  %v7717_v35 = vld [vmem:[#allocation66_spill] sm:$0xff]  ;;  %v2294_v8 = vmul.f32 %v7709_v37, %v2270_v0 }
 0x56a   :  { %7705 = vst [vmem:[#allocation102_spill] sm:$0xff] %v6707_v20  ;;  %v2267_v20 = vmul.f32 %v2258_v61, %v7708_v38  ;;  %v2293_v54 = vmul.f32 %v7709_v37, %v2269_v18  ;;  %v2352_v61 = vmul.f32 %v2339_v19, %v7676_v24  ;;  %v7712_v38 = vld [vmem:[#allocation88_spill] sm:$0xff]  ;;  %v7714_v18 = vld [vmem:[#allocation53_spill] sm:$0xff]  ;;  %v2222_v24 = vmul.f32 %v7711_v22, %v7715_v41  ;;  %v7718_v62 = vld [vmem:[#allocation34_spill] sm:$0xff] }
 0x56b   :  { %v2486_v42 = vpop.permute.xlu1 %2485  ;;  %v2219_v63 = vmul.f32 %v7711_v22, %v7712_v38  ;;  %v2221_v50 = vmul.f32 %v7711_v22, %v7714_v18  ;;  %v2304_v19 = vadd.f32 %v2292_v31, %v2220_v51  ;;  %v2426_v51 = vsel %vm222_vm2, %v2414_v39, %v2396_v34 }
 0x56c   :  { %v2291_v28 = vmul.f32 %v7709_v37, %v2267_v20  ;;  %v2420_v20 = vsel %vm222_vm2, %v2402_v40, %v2408_v6  ;;  %v2507_v18 = vsel %vm295_vm3, %v6573_v29, %v2486_v42  ;;  %v2353_v31 = vmul.f32 %v2336_v26, %v7677_v30  ;;  %v7719_v37 = vld [vmem:[#allocation79_spill] sm:$0xff] }
 0x56d   :  { %v2305_v55 = vadd.f32 %v2293_v54, %v2221_v50  ;;  %v2376_v41 = vmul.f32 %v7717_v35, %v2352_v61  ;;  %v2417_v40 = vsel %vm222_vm2, %v2408_v6, %v2414_v39  ;;  %v2354_v57 = vmul.f32 %v2333_v3, %v7681_v11 }
 0x56e   :  { %v2303_v22 = vadd.f32 %v2291_v28, %v2219_v63  ;;  %v2437_v27 = vmul.f32 %v2420_v20, %v7718_v62  ;;  %v2591_v50 = vsel %vm368_vm4, %v6692_v46, %v2570_v16  ;;  %v2520_v34 = vmul.f32 %v2507_v18, %v7658_v32 }
 0x56f   :  { %v2498_v12 = vpop.permute.xlu1 %2497  ;;  %v2460_v61 = vmul.f32 %v7719_v37, %v2436_v23  ;;  %v2435_v6 = vmul.f32 %v2426_v51, %v7654_v14  ;;  %v2375_v11 = vmul.f32 %v7717_v35, %v2351_v4  ;;  %v2504_v39 = vsel %vm295_vm3, %v2486_v42, %v6588_v10  ;;  %v6796_v3 = vpop.permute.xlu0 %2860 }
 0x570   :  { %v2510_v30 = vsel %vm295_vm3, %v2498_v12, %v6573_v29  ;;  %v2438_v63 = vmul.f32 %v2417_v40, %v7655_v47  ;;  %v2588_v32 = vsel %vm368_vm4, %v2570_v16, %v6694_v25  ;;  %v2377_v29 = vmul.f32 %v7717_v35, %v2353_v31 }
 0x571   :  { %v2388_v0 = vadd.f32 %v2376_v41, %v2304_v19  ;;  %v2603_v28 = vmul.f32 %v2591_v50, %v7659_v36  ;;  %v2585_v14 = vsel %vm368_vm4, %v6694_v25, %v6696_v49  ;;  %v2378_v26 = vmul.f32 %v7717_v35, %v2354_v57  ;;  %v7720_v19 = vld [vmem:[#allocation74_spill] sm:$0xff] }
 0x572   :  { %v2519_v42 = vmul.f32 %v2510_v30, %v7660_v1  ;;  %v2594_v47 = vsel %vm368_vm4, %v6696_v49, %v6692_v46  ;;  %v2521_v16 = vmul.f32 %v2504_v39, %v7564_v9  ;;  %v2544_v36 = vmul.f32 %v7720_v19, %v2520_v34 }
 0x573   :  { %v6709_v43 = vpop.permute.xlu1 %2653  ;;  %v2501_v58 = vsel %vm295_vm3, %v6588_v10, %v2498_v12  ;;  %v2306_v23 = vadd.f32 %v2294_v8, %v2222_v24  ;;  %v2461_v20 = vmul.f32 %v7719_v37, %v2437_v27  ;;  %v2604_v1 = vmul.f32 %v2588_v32, %v7686_v56  ;;  %v7721_v24 = vld [vmem:[#allocation83_spill] sm:$0xff] }
 0x574   :  { %v2387_v4 = vadd.f32 %v2375_v11, %v2303_v22  ;;  %v2459_v18 = vmul.f32 %v7719_v37, %v2435_v6  ;;  %v2605_v51 = vmul.f32 %v2585_v14, %v7692_v45  ;;  %v2389_v46 = vadd.f32 %v2377_v29, %v2305_v55  ;;  %v6826_v55 = vpop.permute.xlu0 %2811 }
 0x575   :  { %v2472_v49 = vadd.f32 %v2460_v61, %v2388_v0  ;;  %v2606_v9 = vmul.f32 %v2594_v47, %v7365_v33  ;;  %v2390_v31 = vadd.f32 %v2378_v26, %v2306_v23  ;;  %v2522_v35 = vmul.f32 %v2501_v58, %v7661_v15  ;;  %v7723_v0 = vld [vmem:[#allocation93_spill] sm:$0xff]  ;;  %v7725_v26 = vld [vmem:[#allocation62_spill] sm:$0xff]  ;;  %v7726_v47 = vld [vmem:[#allocation63_spill] sm:$0xff] }
 0x576   :  { %v2543_v10 = vmul.f32 %v7720_v19, %v2519_v42  ;;  %v2462_v12 = vmul.f32 %v7719_v37, %v2438_v63  ;;  %v2627_v41 = vmul.f32 %v7721_v24, %v2603_v28  ;;  %v2545_v56 = vmul.f32 %v7720_v19, %v2521_v16  ;;  %v7728_v58 = vld [vmem:[#allocation58_spill] sm:$0xff] }
 0x577   :  { %v6718_v60 = vpop.permute.xlu1 %2665  ;;  %v2556_v8 = vadd.f32 %v2544_v36, %v2472_v49  ;;  %v2628_v22 = vmul.f32 %v7721_v24, %v2604_v1  ;;  %v2471_v40 = vadd.f32 %v2459_v18, %v2387_v4  ;;  %v2672_v33 = vsel %vm441_vm5, %v6709_v43, %v6608_v53  ;;  %v7730_v4 = vld [vmem:[#allocation57_spill] sm:$0xff] }
 0x578   :  { %v2675_v15 = vsel %vm441_vm5, %v6698_v2, %v6709_v43  ;;  %v2629_v45 = vmul.f32 %v7721_v24, %v2605_v51  ;;  %v2473_v57 = vadd.f32 %v2461_v20, %v2389_v46  ;;  %v2669_v62 = vsel %vm441_vm5, %v6608_v53, %v6718_v60  ;;  %v2824_v29 = vpop.permute.xlu0 %2823  ;;  %v7729_v20 = vld [vmem:[#allocation59_spill] sm:$0xff]  ;;  %v7731_v18 = vld [vmem:[#allocation81_spill] sm:$0xff] }
 0x579   :  { %v2678_v27 = vsel %vm441_vm5, %v6718_v60, %v6698_v2  ;;  %v2630_v34 = vmul.f32 %v7721_v24, %v2606_v9  ;;  %v2474_v30 = vadd.f32 %v2462_v12, %v2390_v31  ;;  %v2546_v43 = vmul.f32 %v7720_v19, %v2522_v35  ;;  %v7727_v19 = vld [vmem:[#allocation56_spill] sm:$0xff]  ;;  %v7733_v35 = vld [vmem:[#allocation61_spill] sm:$0xff] }
 0x57a   :  { %v2555_v37 = vadd.f32 %v2543_v10, %v2471_v40  ;;  %v2557_v61 = vadd.f32 %v2545_v56, %v2473_v57  ;;  %v2640_v6 = vadd.f32 %v2628_v22, %v2556_v8  ;;  %v2687_v11 = vmul.f32 %v2675_v15, %v7533_v5  ;;  %v7722_v5 = vld [vmem:[#allocation91_spill] sm:$0xff]  ;;  %v7732_v9 = vld [vmem:[#allocation60_spill] sm:$0xff]  ;;  %v7734_v8 = vld [vmem:[#allocation41_spill] sm:$0xff] }
 0x57b   :  { %v6727_v13 = vpop.permute.xlu1 %2737  ;;  %v2688_v39 = vmul.f32 %v2672_v33, %v7535_v44  ;;  %v2689_v53 = vmul.f32 %v2669_v62, %v7567_v52  ;;  %v2690_v63 = vmul.f32 %v2678_v27, %v7568_v59  ;;  %v7735_v33 = vld [vmem:[#allocation51_spill] sm:$0xff] }
 0x57c   :  { %v2756_v32 = vsel %vm514_vm6, %v6727_v13, %v6665_v48  ;;  %v2759_v44 = vsel %vm514_vm6, %v7722_v5, %v6727_v13  ;;  %v7724_v13 = vld [vmem:[#allocation108_spill] sm:$0xff]  ;;  %v2711_v51 = vmul.f32 %v7731_v18, %v2687_v11  ;;  %v2901_v62 = vpop.permute.xlu0 %2900 }
 0x57d   :  { %v2771_v36 = vmul.f32 %v2759_v44, %v7727_v19  ;;  %v2772_v23 = vmul.f32 %v2756_v32, %v7728_v58  ;;  %v2712_v46 = vmul.f32 %v7731_v18, %v2688_v39  ;;  %v2713_v49 = vmul.f32 %v7731_v18, %v2689_v53  ;;  %v7738_v32 = vld [vmem:[#allocation106_spill] sm:$0xff] }
 0x57f   :  { %v6751_v38 = vpop.permute.xlu1 %2749  ;;  %v2795_v15 = vmul.f32 %v7735_v33, %v2771_v36  ;;  %v2796_v57 = vmul.f32 %v7735_v33, %v2772_v23 }
 0x580   :  { %v2753_v59 = vsel %vm514_vm6, %v6665_v48, %v6751_v38  ;;  %v2762_v52 = vsel %vm514_vm6, %v6751_v38, %v7722_v5 }
 0x581   :  { %v2773_v1 = vmul.f32 %v2753_v59, %v7729_v20 }
 0x583   :  { %v6776_v54 = vpop.permute.xlu1 %2821  ;;  %v2797_v27 = vmul.f32 %v7735_v33, %v2773_v1 }
 0x584   :  { %v2840_v28 = vsel %vm587_vm7, %v6776_v54, %v7723_v0  ;;  %v2843_v14 = vsel %vm587_vm7, %v7724_v13, %v6776_v54  ;;  %v2774_v54 = vmul.f32 %v2762_v52, %v7730_v4 }
 0x585   :  { %v2855_v31 = vmul.f32 %v2843_v14, %v7732_v9  ;;  %v2856_v10 = vmul.f32 %v2840_v28, %v7733_v35  ;;  %v2937_v28 = vpop.permute.xlu0 %2936 }
 0x587   :  { %v2834_v25 = vpop.permute.xlu1 %2833 }
 0x588   :  { %v2837_v48 = vsel %vm587_vm7, %v7723_v0, %v2834_v25  ;;  %v2846_v38 = vsel %vm587_vm7, %v2834_v25, %v7724_v13  ;;  %v2714_v25 = vmul.f32 %v7731_v18, %v2690_v63 }
 0x589   :  { %v2857_v12 = vmul.f32 %v2837_v48, %v7725_v26  ;;  %v2858_v24 = vmul.f32 %v2846_v38, %v7726_v47 }
 0x58b   :  { %v2832_v50 = vpop.permute.xlu1 %2831 }
 0x58c   :  { %v2836_v2 = vsel %vm587_vm7, %v6700_v7, %v2832_v50  ;;  %v2845_v60 = vsel %vm587_vm7, %v2832_v50, %v7696_v21  ;;  %v2558_v21 = vadd.f32 %v2546_v43, %v2474_v30  ;;  %v2639_v7 = vadd.f32 %v2627_v41, %v2555_v37 }
 0x58d   :  { %v2853_v42 = vmul.f32 %v2836_v2, %v7725_v26  ;;  %v2854_v16 = vmul.f32 %v2845_v60, %v7726_v47  ;;  %v2641_v41 = vadd.f32 %v2629_v45, %v2557_v61  ;;  %v2798_v50 = vmul.f32 %v7735_v33, %v2774_v54  ;;  %v7736_v45 = vld [vmem:[#allocation97_spill] sm:$0xff]  ;;  %v7737_v2 = vld [vmem:[#allocation50_spill] sm:$0xff] }
 0x58e   :  { %v2642_v56 = vadd.f32 %v2630_v34, %v2558_v21  ;;  %v2723_v43 = vadd.f32 %v2711_v51, %v2639_v7  ;;  %v2724_v37 = vadd.f32 %v2712_v46, %v2640_v6  ;;  %v2879_v34 = vmul.f32 %v7736_v45, %v2855_v31  ;;  %v7739_v6 = vld [vmem:[#allocation86_spill] sm:$0xff] }
 0x58f   :  { %v2877_v22 = vmul.f32 %v7734_v8, %v2853_v42  ;;  %v2878_v40 = vmul.f32 %v7734_v8, %v2854_v16  ;;  %v2725_v11 = vadd.f32 %v2713_v49, %v2641_v41  ;;  %v2880_v61 = vmul.f32 %v7736_v45, %v2856_v10  ;;  %v7740_v54 = vld [vmem:[#allocation102_spill] sm:$0xff] }
 0x590   :  { %v2726_v39 = vadd.f32 %v2714_v25, %v2642_v56  ;;  %v2881_v53 = vmul.f32 %v7736_v45, %v2857_v12  ;;  %v2882_v63 = vmul.f32 %v7736_v45, %v2858_v24  ;;  %v2807_v44 = vadd.f32 %v2795_v15, %v2723_v43  ;;  %v7741_v43 = vld [vmem:[#allocation98_spill] sm:$0xff] }
 0x591   :  { %v2889_v60 = vadd.f32 %v2877_v22, %v7737_v2  ;;  %v2890_v5 = vadd.f32 %v2878_v40, %v7738_v32  ;;  %v2808_v59 = vadd.f32 %v2796_v57, %v2724_v37  ;;  %v2809_v52 = vadd.f32 %v2797_v27, %v2725_v11  ;;  %v7742_v11 = vld [vmem:[#allocation100_spill] sm:$0xff] }
 0x592   :  { %v2810_v21 = vadd.f32 %v2798_v50, %v2726_v39  ;;  %v2911_v0 = vadd.f32 %v2901_v62, %v7739_v6  ;;  %v2891_v13 = vadd.f32 %v2879_v34, %v2807_v44  ;;  %v2912_v18 = vadd.f32 %v2901_v62, %v7740_v54  ;;  %v7743_v39 = vld [vmem:[#allocation38_spill] sm:$0xff]  ;;  %v7744_v34 = vld [vmem:[#allocation89_spill] sm:$0xff] }
 0x593   :  { %v2892_v14 = vadd.f32 %v2880_v61, %v2808_v59  ;;  %v2893_v48 = vadd.f32 %v2881_v53, %v2809_v52  ;;  %v2914_v19 = vadd.f32 %v2901_v62, %v2890_v5  ;;  %v2913_v36 = vadd.f32 %v2901_v62, %v2889_v60 }
 0x594   :  { %v2894_v38 = vadd.f32 %v2882_v63, %v2810_v21  ;;  %v2947_v51 = vmul.f32 %v2937_v28, %v2911_v0  ;;  %v2948_v24 = vmul.f32 %v2937_v28, %v2912_v18  ;;  %vm2924_vm5 = vcmp.ge.f32.partialorder %v2912_v18, 0.0 }
 0x595   :  { %vm2926_vm0 = vcmp.ge.f32.partialorder %v2914_v19, 0.0  ;;  %v2950_v41 = vmul.f32 %v2937_v28, %v2914_v19  ;;  %v2949_v56 = vmul.f32 %v2937_v28, %v2913_v36  ;;  %vm2923_vm6 = vcmp.ge.f32.partialorder %v2911_v0, 0.0 }
 0x596   :  { %v2960_v27 = vsel %vm2924_vm5, %v2912_v18, %v2948_v24 }
 0x597   :  { %v2962_v50 = vsel %vm2926_vm0, %v2914_v19, %v2950_v41 }
 0x598   :  { %v2905_v30 = vpop.permute.xlu1 %2904 }
 0x599   :  { %v2915_v58 = vadd.f32 %v2905_v30, %v2891_v13  ;;  %v2916_v23 = vadd.f32 %v2905_v30, %v2892_v14  ;;  %v2917_v20 = vadd.f32 %v2905_v30, %v2893_v48  ;;  %v2918_v1 = vadd.f32 %v2905_v30, %v2894_v38  ;;  %v7745_v13 = vld [vmem:[#allocation101_spill] sm:$0xff]  ;;  %v7747_v48 = vld [vmem:[#allocation87_spill] sm:$0xff] }
 0x59a   :  { %v2959_v30 = vsel %vm2923_vm6, %v2911_v0, %v2947_v51  ;;  %v7746_v14 = vmov 0.0   ;;  %v7748_v38 = vld [vmem:[#allocation109_spill] sm:$0xff] }
 0x59b   :  { %vm2928_vm1 = vcmp.ge.f32.partialorder %v2916_v23, 0.0  ;;  %vm2930_vm2 = vcmp.ge.f32.partialorder %v2918_v1, 0.0  ;;  %vm2927_vm3 = vcmp.ge.f32.partialorder %v2915_v58, 0.0  ;;  %vm2929_vm4 = vcmp.ge.f32.partialorder %v2917_v20, 0.0 }
 0x59c   :  { %v2818_v7 = vpop.permute.xlu1 %2817 }
 0x59d   :  { %v2838_v42 = vsel %vm587_vm7, %v2818_v7, %v2824_v29  ;;  %v2841_v16 = vsel %vm587_vm7, %v6826_v55, %v2818_v7 }
 0x59e   :  { %v2847_v25 = vmul.f32 %v2841_v16, %v7732_v9  ;;  %v2848_v31 = vmul.f32 %v2838_v42, %v7733_v35 }
 0x5a0   :  { %v2830_v4 = vpop.permute.xlu1 %2829  ;;  %v2871_v9 = vmul.f32 %v6796_v3, %v2847_v25  ;;  %v2872_v35 = vmul.f32 %v6796_v3, %v2848_v31 }
 0x5a1   :  { %v2835_v46 = vsel %vm587_vm7, %v2824_v29, %v2830_v4  ;;  %v2844_v49 = vsel %vm587_vm7, %v2830_v4, %v6826_v55  ;;  %vm2925_vm7 = vcmp.ge.f32.partialorder %v2913_v36, 0.0 }
 0x5a2   :  { %v2849_v10 = vmul.f32 %v2835_v46, %v7725_v26  ;;  %v2850_v12 = vmul.f32 %v2844_v49, %v7726_v47  ;;  %v2883_v37 = vadd.f32 %v2871_v9, %v7741_v43  ;;  %v2961_v53 = vsel %vm2925_vm7, %v2913_v36, %v2949_v56 }
 0x5a4   :  { %v2941_v8 = vpop.permute.xlu1 %2940  ;;  %v2873_v26 = vmul.f32 %v6796_v3, %v2849_v10  ;;  %v2874_v47 = vmul.f32 %v6796_v3, %v2850_v12  ;;  %v2884_v3 = vadd.f32 %v2872_v35, %v7742_v11 }
 0x5a5   :  { %v2951_v29 = vmul.f32 %v2941_v8, %v2915_v58  ;;  %v2952_v17 = vmul.f32 %v2941_v8, %v2916_v23  ;;  %v2953_v55 = vmul.f32 %v2941_v8, %v2917_v20  ;;  %v2954_v22 = vmul.f32 %v2941_v8, %v2918_v1 }
 0x5a6   :  { %v2885_v45 = vadd.f32 %v2873_v26, %v7743_v39  ;;  %v2886_v61 = vadd.f32 %v2874_v47, %v7744_v34 }
 0x5a7   :  { %v2964_v40 = vsel %vm2928_vm1, %v2916_v23, %v2952_v17  ;;  %v2966_v33 = vsel %vm2930_vm2, %v2918_v1, %v2954_v22  ;;  %v2963_v15 = vsel %vm2927_vm3, %v2915_v58, %v2951_v29  ;;  %v2965_v57 = vsel %vm2929_vm4, %v2917_v20, %v2953_v55 }
 0x5a8   :  { %3014 = vmatprep.subr.mxu0 %v2964_v40  ;;  %3097 = vmatprep.subr.mxu1 %v2966_v33 }
 0x5a9   :  { %3015 = vmatpush1.msra.mxu0 %v2963_v15  ;;  %3098 = vmatpush1.msra.mxu1 %v2965_v57  ;;  %v2897_v62 = vpop.permute.xlu1 %2896 }
 0x5aa   :  { %3016 = vmatprep.subr.mxu0 %v2960_v27  ;;  %3099 = vmatprep.subr.mxu1 %v2962_v50  ;;  %v2907_v63 = vadd.f32 %v2897_v62, %v2883_v37  ;;  %v2908_v2 = vadd.f32 %v2897_v62, %v2884_v3  ;;  %v2909_v60 = vadd.f32 %v2897_v62, %v2885_v45  ;;  %v2975_v36 = vpop.permute.xlu0 %2974 }
 0x5ab   :  { %3017 = vmatpush1.msra.mxu0 %v2959_v30  ;;  %v2910_v32 = vadd.f32 %v2897_v62, %v2886_v61  ;;  %3100 = vmatpush1.msra.mxu1 %v2961_v53 }
 0x5ac   :  { %vm2920_vm10 = vcmp.ge.f32.partialorder %v2908_v2, 0.0  ;;  %vm2919_vm12 = vcmp.ge.f32.partialorder %v2907_v63, 0.0  ;;  %vm2921_vm13 = vcmp.ge.f32.partialorder %v2909_v60, 0.0 }
 0x5ad   :  { %vm2922_vm11 = vcmp.ge.f32.partialorder %v2910_v32, 0.0 }
 0x5ae   :  { %v2933_v5 = vpop.permute.xlu1 %2932 }
 0x5af   :  { %v2943_v44 = vmul.f32 %v2933_v5, %v2907_v63  ;;  %v2944_v59 = vmul.f32 %v2933_v5, %v2908_v2  ;;  %v2945_v52 = vmul.f32 %v2933_v5, %v2909_v60  ;;  %v2946_v21 = vmul.f32 %v2933_v5, %v2910_v32 }
 0x5b1   :  { %v2956_v7 = vsel %vm2920_vm10, %v2908_v2, %v2944_v59  ;;  %v2958_v6 = vsel %vm2922_vm11, %v2910_v32, %v2946_v21  ;;  %v2955_v0 = vsel %vm2919_vm12, %v2907_v63, %v2943_v44  ;;  %v2957_v28 = vsel %vm2921_vm13, %v2909_v60, %v2945_v52 }
 0x5b2   :  { %3018 = vmatprep.subr.mxu0 %v2956_v7  ;;  %3101 = vmatprep.subr.mxu1 %v2958_v6  ;;  %v3172_v41 = vpop.permute.xlu0 %3171 }
 0x5b3   :  { %3019 = vmatpush1.msra.mxu0 %v2955_v0  ;;  %3102 = vmatpush1.msra.mxu1 %v2957_v28  ;;  %v2970_v42 = vpop.permute.xlu1 %2969 }
 0x5b4   :  { %3242 = vmatmul.mubr.msk.f32.vlgmr.msra.gmra.mxu0 %vm1955_vm9, %v7745_v13  ;;  %3245 = vmatmul.mubr.msk.f32.vlgmr.msra.gmra.mxu1 %vm1955_vm9, %v7745_v13 }
 0x5b5   :  { %3058 = vmatprep.mubr.f32.mxu0 %v7746_v14  ;;  %3141 = vmatprep.mubr.f32.mxu1 %v7746_v14 }
 0x5b7   :  { %v2980_v16 = vpop.permute.xlu1 %2979 }
 0x5b8   :  { %3243 = vmatmul.mubr.msk.f32.gmra.mxu0 %vm1955_vm9, %v7747_v48  ;;  %3246 = vmatmul.mubr.msk.f32.gmra.mxu1 %vm1955_vm9, %v7747_v48 }
 0x5b9   :  { %3064 = vmatprep.mubr.f32.mxu0 %v7746_v14  ;;  %3147 = vmatprep.mubr.f32.mxu1 %v7746_v14 }
 0x5bc   :  { %3244 = vmatmul.mubr.msk.f32.gmra.mxu0 %vm1955_vm9, %v7748_v38  ;;  %3247 = vmatmul.mubr.msk.f32.gmra.mxu1 %vm1955_vm9, %v7748_v38  ;;  %v3168_v19 = vpop.permute.xlu1 %3167 }
 0x5c0   :  { %v3176_v34 = vpop.permute.xlu1 %3175 }
 0x674   :  { %v3054_v58 = vpop.f32.mrf.mxu0  ;;  %v3137_v23 = vpop.f32.mrf.mxu1 }
 0x675   :  { %v3055_v20 = vadd.f32 %v3054_v58, %v2970_v42  ;;  %v3138_v1 = vadd.f32 %v3137_v23, %v2970_v42 }
 0x676   :  { %v3139_v4 = vpop.f32.mrf.mxu1  ;;  %v3056_v54 = vpop.f32.mrf.mxu0 }
 0x677   :  { %vm3154_vm14 = vcmp.ge.f32.partialorder %v3055_v20, 0.0  ;;  %vm3156_vm15 = vcmp.ge.f32.partialorder %v3138_v1, 0.0  ;;  %v3140_v18 = vadd.f32 %v3139_v4, %v2970_v42  ;;  %v3178_v51 = vmul.f32 %v3168_v19, %v3055_v20 }
 0x678   :  { %v3180_v46 = vmul.f32 %v3168_v19, %v3138_v1  ;;  %v3057_v49 = vadd.f32 %v3056_v54, %v2970_v42  ;;  %v3060_v25 = vpop.f32.mrf.mxu0  ;;  %v3143_v31 = vpop.f32.mrf.mxu1 }
 0x679   :  { %vm3157_vm8 = vcmp.ge.f32.partialorder %v3140_v18, 0.0  ;;  %v3181_v10 = vmul.f32 %v3168_v19, %v3140_v18  ;;  %v3190_v12 = vsel %vm3154_vm14, %v3055_v20, %v3178_v51  ;;  %v3061_v24 = vadd.f32 %v3060_v25, %v2975_v36 }
 0x67a   :  { %v3192_v56 = vsel %vm3156_vm15, %v3138_v1, %v3180_v46  ;;  %3202 = vst [vmem:[%s6988_s6] sm:$0xff] %v3190_v12  ;;  %vm3155_vm9 = vcmp.ge.f32.partialorder %v3057_v49, 0.0  ;;  %v3179_v8 = vmul.f32 %v3168_v19, %v3057_v49  ;;  %v3144_v29 = vadd.f32 %v3143_v31, %v2975_v36  ;;  %v3062_v17 = vpop.f32.mrf.mxu0  ;;  %v3145_v55 = vpop.f32.mrf.mxu1 }
 0x67b   :  { %v3193_v22 = vsel %vm3157_vm8, %v3140_v18, %v3181_v10  ;;  %3204 = vst [vmem:[%s6988_s6 + $0x10] sm:$0xff] %v3192_v56  ;;  %vm3158_vm0 = vcmp.ge.f32.partialorder %v3061_v24, 0.0  ;;  %v3063_v9 = vadd.f32 %v3062_v17, %v2975_v36  ;;  %v3146_v35 = vadd.f32 %v3145_v55, %v2975_v36 }
 0x67c   :  { %3205 = vst [vmem:[%s6988_s6 + $0x18] sm:$0xff] %v3193_v22  ;;  %v3191_v26 = vsel %vm3155_vm9, %v3057_v49, %v3179_v8  ;;  %vm3160_vm1 = vcmp.ge.f32.partialorder %v3144_v29, 0.0  ;;  %v3182_v47 = vmul.f32 %v3172_v41, %v3061_v24  ;;  %v3184_v40 = vmul.f32 %v3172_v41, %v3144_v29  ;;  %v3066_v33 = vpop.f32.mrf.mxu0  ;;  %v3149_v15 = vpop.f32.mrf.mxu1 }
 0x67d   :  { %3203 = vst [vmem:[%s6988_s6 + $0x8] sm:$0xff] %v3191_v26  ;;  %vm3159_vm2 = vcmp.ge.f32.partialorder %v3063_v9, 0.0  ;;  %vm3161_vm3 = vcmp.ge.f32.partialorder %v3146_v35, 0.0  ;;  %v3183_v57 = vmul.f32 %v3172_v41, %v3063_v9  ;;  %v3185_v62 = vmul.f32 %v3172_v41, %v3146_v35 }
 0x67e   :  { %v3194_v27 = vsel %vm3158_vm0, %v3061_v24, %v3182_v47  ;;  %v3196_v50 = vsel %vm3160_vm1, %v3144_v29, %v3184_v40  ;;  %v3067_v30 = vadd.f32 %v3066_v33, %v2980_v16  ;;  %v3150_v43 = vadd.f32 %v3149_v15, %v2980_v16  ;;  %v3151_v37 = vpop.f32.mrf.mxu1  ;;  %v3068_v11 = vpop.f32.mrf.mxu0 }
 0x67f   :  { %v3195_v3 = vsel %vm3159_vm2, %v3063_v9, %v3183_v57  ;;  %v3197_v39 = vsel %vm3161_vm3, %v3146_v35, %v3185_v62  ;;  %3206 = vst [vmem:[%s6988_s6 + $0x20] sm:$0xff] %v3194_v27  ;;  %3208 = vst [vmem:[%s6988_s6 + $0x30] sm:$0xff] %v3196_v50  ;;  %v3152_v45 = vadd.f32 %v3151_v37, %v2980_v16 }
 0x680   :  { %v3069_v61 = vadd.f32 %v3068_v11, %v2980_v16  ;;  %3207 = vst [vmem:[%s6988_s6 + $0x28] sm:$0xff] %v3195_v3  ;;  %3209 = vst [vmem:[%s6988_s6 + $0x38] sm:$0xff] %v3197_v39  ;;  %vm3162_vm4 = vcmp.ge.f32.partialorder %v3067_v30, 0.0  ;;  %vm3164_vm5 = vcmp.ge.f32.partialorder %v3150_v43, 0.0  ;;  %v3186_v53 = vmul.f32 %v3176_v34, %v3067_v30 }
 0x681   :  { %v3188_v63 = vmul.f32 %v3176_v34, %v3150_v43  ;;  %vm3165_vm6 = vcmp.ge.f32.partialorder %v3152_v45, 0.0  ;;  %v3189_v2 = vmul.f32 %v3176_v34, %v3152_v45 }
 0x682   :  { %vm3163_vm7 = vcmp.ge.f32.partialorder %v3069_v61, 0.0  ;;  %v3187_v60 = vmul.f32 %v3176_v34, %v3069_v61  ;;  %v3198_v32 = vsel %vm3162_vm4, %v3067_v30, %v3186_v53 }
 0x683   :  { %v3200_v5 = vsel %vm3164_vm5, %v3150_v43, %v3188_v63  ;;  %v3201_v44 = vsel %vm3165_vm6, %v3152_v45, %v3189_v2  ;;  %3210 = vst [vmem:[%s6988_s6 + $0x40] sm:$0xff] %v3198_v32 }
 0x684   :  { %3212 = vst [vmem:[%s6988_s6 + $0x50] sm:$0xff] %v3200_v5  ;;  %v3199_v59 = vsel %vm3163_vm7, %v3069_v61, %v3187_v60  ;;  %3213 = vst [vmem:[%s6988_s6 + $0x58] sm:$0xff] %v3201_v44 }
 0x685   :  { %3211 = vst [vmem:[%s6988_s6 + $0x48] sm:$0xff] %v3199_v59 }

</bundles_post_ra>
